<compile_context>
chip_gen: v7x
topology: tpu7x:2x2x1
jax: 0.10.0
libtpu: 0.0.40
codegen_flags: <defaults>
</compile_context>

<pallas_src>
import math
from functools import partial

import jax
import jax.numpy as jnp
from jax import lax
from jax.experimental import pallas as pl
from jax.experimental.pallas import tpu as pltpu

VMEM_LIMIT = 32 * 1024 * 1024  # explicit scoped-VMEM budget (safe on v5e/v6e/v7x)
LN_EPS = 1e-5


# ----------------------------------------------------------------------------
# Small helpers (tiling / padding)
# ----------------------------------------------------------------------------

def _round_up(x, m):
    return (x + m - 1) // m * m


def _tile_rows(m, pref=256):
    """Row tile: prefer 256, otherwise the (8-aligned) full extent."""
    mp = _round_up(m, 8)
    return pref if mp > pref else mp


def _tile_cols(n, pref):
    """Lane-dim tile: multiple of 128; prefer `pref`, fall back to 128."""
    npad = _round_up(n, 128)
    if npad <= pref:
        return npad
    return pref if npad % pref == 0 else 128


def _pad2(a, rows, cols):
    r, c = a.shape
    if r == rows and c == cols:
        return a
    return jnp.pad(a, ((0, rows - r), (0, cols - c)))


# ----------------------------------------------------------------------------
# Kernel 1: tiled matmul + bias (+ optional ReLU)
# ----------------------------------------------------------------------------

def _mm_kernel(x_ref, w_ref, b_ref, o_ref, acc_ref, *, activation):
    k = pl.program_id(2)

    @pl.when(k == 0)
    def _():
        acc_ref[...] = jnp.zeros_like(acc_ref)

    acc_ref[...] += jnp.dot(x_ref[...].astype(jnp.bfloat16), w_ref[...],
                            preferred_element_type=jnp.float32)

    @pl.when(k == pl.num_programs(2) - 1)
    def _():
        y = acc_ref[...] + b_ref[...]
        if activation == "relu":
            y = jnp.maximum(y, 0.0)
        o_ref[...] = y.astype(o_ref.dtype)


def matmul_bias(x, w, b, activation="none"):
    """y = x @ w + b (optional ReLU). x: (M,K) f32, w: (K,N) bf16, b: (N,) f32."""
    M, K = x.shape
    Kw, N = w.shape
    assert K == Kw
    tm = _tile_rows(M)
    tn = _tile_cols(N, 256)
    tk = _tile_cols(K, 512)
    Mp, Np, Kp = _round_up(M, tm), _round_up(N, tn), _round_up(K, tk)

    xp = _pad2(x, Mp, Kp)
    wp = _pad2(w, Kp, Np)
    bp = jnp.pad(b.astype(jnp.float32), (0, Np - N)).reshape(1, Np)

    out = pl.pallas_call(
        partial(_mm_kernel, activation=activation),
        out_shape=jax.ShapeDtypeStruct((Mp, Np), jnp.float32),
        grid=(Mp // tm, Np // tn, Kp // tk),
        in_specs=[
            pl.BlockSpec((tm, tk), lambda i, j, k: (i, k)),
            pl.BlockSpec((tk, tn), lambda i, j, k: (k, j)),
            pl.BlockSpec((1, tn), lambda i, j, k: (0, j)),
        ],
        out_specs=pl.BlockSpec((tm, tn), lambda i, j, k: (i, j)),
        scratch_shapes=[pltpu.VMEM((tm, tn), jnp.float32)],
        compiler_params=pltpu.CompilerParams(
            dimension_semantics=("parallel", "parallel", "arbitrary"),
            vmem_limit_bytes=VMEM_LIMIT),
    )(xp, wp, bp)
    return out[:M, :N]


# ----------------------------------------------------------------------------
# Kernel 2: tiled matmul + bias + residual add + LayerNorm (fused epilogue)
# ----------------------------------------------------------------------------

def _mm_addln_kernel(x_ref, w_ref, b_ref, r_ref, g_ref, be_ref, o_ref, acc_ref,
                     *, n_valid, eps):
    k = pl.program_id(1)

    @pl.when(k == 0)
    def _():
        acc_ref[...] = jnp.zeros_like(acc_ref)

    acc_ref[...] += jnp.dot(x_ref[...].astype(jnp.bfloat16), w_ref[...],
                            preferred_element_type=jnp.float32)

    @pl.when(k == pl.num_programs(1) - 1)
    def _():
        y = acc_ref[...] + b_ref[...] + r_ref[...]
        npad = y.shape[-1]
        if n_valid == npad:
            mean = jnp.mean(y, axis=-1, keepdims=True)
            var = jnp.mean(jnp.square(y - mean), axis=-1, keepdims=True)
        else:  # masked stats when the feature dim was lane-padded
            lane = lax.broadcasted_iota(jnp.int32, y.shape, 1)
            mask = lane < n_valid
            inv_n = 1.0 / n_valid
            mean = jnp.sum(jnp.where(mask, y, 0.0), axis=-1, keepdims=True) * inv_n
            var = jnp.sum(jnp.where(mask, jnp.square(y - mean), 0.0),
                          axis=-1, keepdims=True) * inv_n
        norm = (y - mean) * lax.rsqrt(var + eps)
        o_ref[...] = (norm * g_ref[...] + be_ref[...]).astype(o_ref.dtype)


def matmul_bias_add_ln(x, w, b, residual, gamma, beta, eps=LN_EPS):
    """LayerNorm(residual + x @ w + b) over the last dim (post-norm block)."""
    M, K = x.shape
    Kw, N = w.shape
    assert K == Kw and residual.shape == (M, N)
    tm = _tile_rows(M)
    tk = _tile_cols(K, 512)
    Np = _round_up(N, 128)        # LayerNorm needs the full row in one tile
    Mp, Kp = _round_up(M, tm), _round_up(K, tk)

    xp = _pad2(x, Mp, Kp)
    wp = _pad2(w, Kp, Np)
    rp = _pad2(residual, Mp, Np)
    bp = jnp.pad(b.astype(jnp.float32), (0, Np - N)).reshape(1, Np)
    gp = jnp.pad(gamma.astype(jnp.float32), (0, Np - N)).reshape(1, Np)
    bep = jnp.pad(beta.astype(jnp.float32), (0, Np - N)).reshape(1, Np)

    out = pl.pallas_call(
        partial(_mm_addln_kernel, n_valid=N, eps=eps),
        out_shape=jax.ShapeDtypeStruct((Mp, Np), jnp.float32),
        grid=(Mp // tm, Kp // tk),
        in_specs=[
            pl.BlockSpec((tm, tk), lambda i, k: (i, k)),
            pl.BlockSpec((tk, Np), lambda i, k: (k, 0)),
            pl.BlockSpec((1, Np), lambda i, k: (0, 0)),
            pl.BlockSpec((tm, Np), lambda i, k: (i, 0)),
            pl.BlockSpec((1, Np), lambda i, k: (0, 0)),
            pl.BlockSpec((1, Np), lambda i, k: (0, 0)),
        ],
        out_specs=pl.BlockSpec((tm, Np), lambda i, k: (i, 0)),
        scratch_shapes=[pltpu.VMEM((tm, Np), jnp.float32)],
        compiler_params=pltpu.CompilerParams(
            dimension_semantics=("parallel", "arbitrary"),
            vmem_limit_bytes=VMEM_LIMIT),
    )(xp, wp, bp, rp, gp, bep)
    return out[:M, :N]


# ----------------------------------------------------------------------------
# Kernel 3: fused multi-head attention (per-batch, lane-dense (Sq, D) output)
# ----------------------------------------------------------------------------

def _mha_kernel(q_ref, k_ref, v_ref, o_ref, *, nhead, scale, causal):
    q = q_ref[0].astype(jnp.bfloat16)   # (Sq, D)
    k = k_ref[0].astype(jnp.bfloat16)   # (Sk, D)
    v = v_ref[0].astype(jnp.bfloat16)   # (Sk, D)
    sq, d = q.shape
    sk = k.shape[0]
    dh = d // nhead

    if causal:
        row = lax.broadcasted_iota(jnp.int32, (sq, sk), 0)
        col = lax.broadcasted_iota(jnp.int32, (sq, sk), 1)
        allow = col <= row

    heads = []
    for h in range(nhead):  # static unroll; heads stay resident in VMEM/vregs
        sl = slice(h * dh, (h + 1) * dh)
        qh, kh, vh = q[:, sl], k[:, sl], v[:, sl]
        # contract feature dims directly (no k.T / XLU transpose), f32 accumulate
        s = lax.dot_general(qh, kh, (((1,), (1,)), ((), ())),
                            preferred_element_type=jnp.float32) * scale
        if causal:
            s = jnp.where(allow, s, -1e30)  # f32 scores; safe mask constant
        m = jnp.max(s, axis=-1, keepdims=True)
        p = jnp.exp(s - m)
        p = p * pl.reciprocal(jnp.sum(p, axis=-1, keepdims=True), approx=True)
        heads.append(jnp.dot(p.astype(jnp.bfloat16), vh,
                             preferred_element_type=jnp.float32))
    o_ref[0] = jnp.concatenate(heads, axis=-1).astype(o_ref.dtype)


def fused_mha(q, k, v, nhead, *, causal):
    """q: (B,Sq,D), k/v: (B,Sk,D) -> (B,Sq,D). Whole-sequence attention per batch."""
    # TODO(synk): for long sequences switch to flash-style online softmax that
    #             streams K/V tiles over an "arbitrary" grid axis.
    B, Sq, D = q.shape
    Sk = k.shape[1]
    scale = 1.0 / math.sqrt(D // nhead)
    return pl.pallas_call(
        partial(_mha_kernel, nhead=nhead, scale=scale, causal=causal),
        out_shape=jax.ShapeDtypeStruct((B, Sq, D), jnp.float32),
        grid=(B,),
        in_specs=[
            pl.BlockSpec((1, Sq, D), lambda b: (b, 0, 0)),
            pl.BlockSpec((1, Sk, D), lambda b: (b, 0, 0)),
            pl.BlockSpec((1, Sk, D), lambda b: (b, 0, 0)),
        ],
        out_specs=pl.BlockSpec((1, Sq, D), lambda b: (b, 0, 0)),
        compiler_params=pltpu.CompilerParams(
            dimension_semantics=("parallel",),
            vmem_limit_bytes=VMEM_LIMIT),
    )(q, k, v)


# ----------------------------------------------------------------------------
# Transformer layers (glue in JAX, compute in Pallas kernels)
# ----------------------------------------------------------------------------

def encoder_layer(x, p, nhead):
    B, S, D = x.shape
    xf = x.reshape(B * S, D)
    # fused QKV projection (one matmul against pre-concatenated (D, 3D) weight)
    qkv = matmul_bias(xf, p["w_qkv"], p["b_qkv"])
    q, k, v = jnp.split(qkv, 3, axis=-1)
    attn = fused_mha(q.reshape(B, S, D), k.reshape(B, S, D), v.reshape(B, S, D),
                     nhead, causal=False)
    # out-proj + residual + LayerNorm fused (post-norm)
    xf = matmul_bias_add_ln(attn.reshape(B * S, D), p["w_o"], p["b_o"],
                            xf, p["norm1_w"], p["norm1_b"])
    # FFN: linear1+ReLU, then linear2 + residual + LayerNorm fused
    h = matmul_bias(xf, p["w_ff1"], p["b_ff1"], activation="relu")
    xf = matmul_bias_add_ln(h, p["w_ff2"], p["b_ff2"],
                            xf, p["norm2_w"], p["norm2_b"])
    return xf.reshape(B, S, D)


def decoder_layer(x, memory, p, nhead):
    B, S, D = x.shape
    Bm, Sm, _ = memory.shape
    xf = x.reshape(B * S, D)
    # causal self-attention
    qkv = matmul_bias(xf, p["w_qkv"], p["b_qkv"])
    q, k, v = jnp.split(qkv, 3, axis=-1)
    sa = fused_mha(q.reshape(B, S, D), k.reshape(B, S, D), v.reshape(B, S, D),
                   nhead, causal=True)
    xf = matmul_bias_add_ln(sa.reshape(B * S, D), p["w_o"], p["b_o"],
                            xf, p["norm1_w"], p["norm1_b"])
    # cross-attention (Q from target, fused KV from encoder memory)
    qc = matmul_bias(xf, p["w_q_cross"], p["b_q_cross"])
    kvc = matmul_bias(memory.reshape(Bm * Sm, D), p["w_kv_cross"], p["b_kv_cross"])
    kc, vc = jnp.split(kvc, 2, axis=-1)
    ca = fused_mha(qc.reshape(B, S, D), kc.reshape(Bm, Sm, D),
                   vc.reshape(Bm, Sm, D), nhead, causal=False)
    xf = matmul_bias_add_ln(ca.reshape(B * S, D), p["w_o_cross"], p["b_o_cross"],
                            xf, p["norm2_w"], p["norm2_b"])
    # FFN
    h = matmul_bias(xf, p["w_ff1"], p["b_ff1"], activation="relu")
    xf = matmul_bias_add_ln(h, p["w_ff2"], p["b_ff2"],
                            xf, p["norm3_w"], p["norm3_b"])
    return xf.reshape(B, S, D)


def make_positional_encoding(max_len, d_model):
    position = jnp.arange(max_len, dtype=jnp.float32)[:, None]
    div_term = jnp.exp(jnp.arange(0, d_model, 2, dtype=jnp.float32)
                       * (-math.log(10000.0) / d_model))
    pe = jnp.zeros((max_len, d_model), jnp.float32)
    pe = pe.at[:, 0::2].set(jnp.sin(position * div_term))
    pe = pe.at[:, 1::2].set(jnp.cos(position * div_term))
    return pe


def encoder_forward(tokens, params, cfg):
    S = tokens.shape[1]
    # embedding gather + positional encoding (XLA fuses gather + add)
    x = jnp.take(params["enc_embedding"], tokens, axis=0) \
        + params["enc_pe"][:S][None, :, :]
    for lp in params["enc_layers"]:
        x = encoder_layer(x, lp, cfg["nhead"])
    return x


def decoder_forward(tgt_tokens, memory, params, cfg):
    S = tgt_tokens.shape[1]
    x = jnp.take(params["dec_embedding"], tgt_tokens, axis=0) \
        + params["dec_pe"][:S][None, :, :]
    for lp in params["dec_layers"]:
        x = decoder_layer(x, memory, lp, cfg["nhead"])
    B, St, D = x.shape
    logits = matmul_bias(x.reshape(B * St, D), params["fc_w"], params["fc_b"])
    return logits.reshape(B, St, cfg["vocab_size"])


def encoder_decoder_forward(tokens, params, cfg):
    """EncoderDecoderModel.forward: encode, prepend EOS to target, decode causally."""
    memory = encoder_forward(tokens, params, cfg)
    B = tokens.shape[0]
    shift = jnp.full((B, 1), cfg["eos_id"], dtype=tokens.dtype)
    tgt = jnp.concatenate([shift, tokens], axis=-1)   # (B, S+1)
    return decoder_forward(tgt, memory, params, cfg)
    # TODO(synk): key-padding masks and forward_inference (beam search) are not
    #             implemented; the reference forward call passes None masks.


# ----------------------------------------------------------------------------
# Parameter init (weights stored pre-transposed (in, out) and cast to bf16;
# matches the PyTorch module's layer structure)
# ----------------------------------------------------------------------------

def _w(key, shape):
    return (0.02 * jax.random.normal(key, shape, jnp.float32)).astype(jnp.bfloat16)


def init_enc_layer(key, d, ff):
    k1, k2, k3, k4 = jax.random.split(key, 4)
    return {
        "w_qkv": _w(k1, (d, 3 * d)), "b_qkv": jnp.zeros((3 * d,), jnp.float32),
        "w_o": _w(k2, (d, d)), "b_o": jnp.zeros((d,), jnp.float32),
        "w_ff1": _w(k3, (d, ff)), "b_ff1": jnp.zeros((ff,), jnp.float32),
        "w_ff2": _w(k4, (ff, d)), "b_ff2": jnp.zeros((d,), jnp.float32),
        "norm1_w": jnp.ones((d,), jnp.float32), "norm1_b": jnp.zeros((d,), jnp.float32),
        "norm2_w": jnp.ones((d,), jnp.float32), "norm2_b": jnp.zeros((d,), jnp.float32),
    }


def init_dec_layer(key, d, ff):
    k1, k2, k3, k4 = jax.random.split(key, 4)
    p = init_enc_layer(k1, d, ff)
    p.update({
        "w_q_cross": _w(k2, (d, d)), "b_q_cross": jnp.zeros((d,), jnp.float32),
        "w_kv_cross": _w(k3, (d, 2 * d)), "b_kv_cross": jnp.zeros((2 * d,), jnp.float32),
        "w_o_cross": _w(k4, (d, d)), "b_o_cross": jnp.zeros((d,), jnp.float32),
        "norm3_w": jnp.ones((d,), jnp.float32), "norm3_b": jnp.zeros((d,), jnp.float32),
    })
    return p


def init_params(key, cfg):
    d, ff, v = cfg["d_model"], cfg["dim_feedforward"], cfg["vocab_size"]
    keys = jax.random.split(key, 4 + 2 * cfg["num_layers"])
    return {
        "enc_embedding": 0.02 * jax.random.normal(keys[0], (v, d), jnp.float32),
        "dec_embedding": 0.02 * jax.random.normal(keys[1], (v, d), jnp.float32),
        "enc_pe": make_positional_encoding(cfg["max_len"], d),
        "dec_pe": make_positional_encoding(cfg["max_len"] + 1, d),
        "fc_w": _w(keys[2], (d, v)), "fc_b": jnp.zeros((v,), jnp.float32),
        "enc_layers": [init_enc_layer(keys[4 + i], d, ff)
                       for i in range(cfg["num_layers"])],
        "dec_layers": [init_dec_layer(keys[4 + cfg["num_layers"] + i], d, ff)
                       for i in range(cfg["num_layers"])],
    }


# ----------------------------------------------------------------------------
# Main
# ----------------------------------------------------------------------------

if __name__ == "__main__":
    # small, lane-friendly config (d_model multiple of 128 keeps every kernel
    # output lane-dense with zero feature padding)
    cfg = dict(vocab_size=128, max_len=16, eos_id=1, d_model=128, nhead=4,
               dim_feedforward=256, num_layers=2)

    key = jax.random.PRNGKey(0)
    kp, kx = jax.random.split(key)
    params = init_params(kp, cfg)

    B, S = 2, 8
    tokens = jax.random.randint(kx, (B, S), 0, cfg["vocab_size"], dtype=jnp.int32)

    fwd = jax.jit(lambda t: encoder_decoder_forward(t, params, cfg))
    logits = jax.block_until_ready(fwd(tokens))

    assert logits.shape == (B, S + 1, cfg["vocab_size"])
    assert bool(jnp.all(jnp.isfinite(logits)))
    print("KERNEL_OK")
</pallas_src>

<mosaic_0001>
module attributes {stable_mosaic.version = 11 : i64} {
  func.func @_mm_kernel(%arg0: i32, %arg1: i32, %arg2: i32, %arg3: memref<24x128xf32, #tpu.memory_space<vmem>>, %arg4: memref<128x128xbf16, #tpu.memory_space<vmem>>, %arg5: memref<1x128xf32, #tpu.memory_space<vmem>>, %arg6: memref<24x128xf32, #tpu.memory_space<vmem>>, %arg7: memref<24x128xf32, #tpu.memory_space<vmem>>) attributes {dimension_semantics = [#tpu.dimension_semantics<parallel>, #tpu.dimension_semantics<parallel>, #tpu.dimension_semantics<arbitrary>], iteration_bounds = array<i64: 1, 3, 1>, scalar_prefetch = 0 : i64, scratch_operands = 1 : i64, tpu.core_type = #tpu.core_type<tc>, window_params = [{transform_indices = @transform_0, window_bounds = array<i64: 24, 128>}, {transform_indices = @transform_1, window_bounds = array<i64: 128, 128>}, {transform_indices = @transform_2, window_bounds = array<i64: 1, 128>}, {transform_indices = @transform_3, window_bounds = array<i64: 24, 128>}]} {
    %c0_i32 = arith.constant 0 : i32
    %0 = arith.cmpi eq, %arg2, %c0_i32 : i32
    %1 = arith.extui %0 : i1 to i32
    %c0_i32_0 = arith.constant 0 : i32
    %2 = arith.cmpi ne, %1, %c0_i32_0 : i32
    scf.if %2 {
      %cst_10 = arith.constant 0.000000e+00 : f32
      %13 = vector.broadcast %cst_10 : f32 to vector<24x128xf32>
      %c0_11 = arith.constant 0 : index
      %c0_12 = arith.constant 0 : index
      %14 = vector.load %arg7[%c0_11, %c0_12] : memref<24x128xf32, #tpu.memory_space<vmem>>, vector<24x128xf32>
      tpu.vector_store %arg7[%c0_11, %c0_12], %13 {strides = array<i32>} : memref<24x128xf32, #tpu.memory_space<vmem>>, vector<24x128xf32>,
    } else {
    }
    %c0 = arith.constant 0 : index
    %c0_1 = arith.constant 0 : index
    %3 = vector.load %arg7[%c0, %c0_1] : memref<24x128xf32, #tpu.memory_space<vmem>>, vector<24x128xf32>
    %c0_2 = arith.constant 0 : index
    %c0_3 = arith.constant 0 : index
    %4 = vector.load %arg3[%c0_2, %c0_3] : memref<24x128xf32, #tpu.memory_space<vmem>>, vector<24x128xf32>
    %5 = arith.truncf %4 : vector<24x128xf32> to vector<24x128xbf16>
    %c0_4 = arith.constant 0 : index
    %c0_5 = arith.constant 0 : index
    %6 = vector.load %arg4[%c0_4, %c0_5] : memref<128x128xbf16, #tpu.memory_space<vmem>>, vector<128x128xbf16>
    %cst = arith.constant dense<0.000000e+00> : vector<24x128xf32>
    %7 = tpu.matmul %5, %6, %cst {dimension_numbers = #tpu.dot_dimension_numbers<[1], [0], [0], [1], [0, 0, 1, 1], [], []>} : vector<24x128xbf16>, vector<128x128xbf16>, vector<24x128xf32> -> vector<24x128xf32>
    %8 = arith.addf %3, %7 : vector<24x128xf32>
    %c0_6 = arith.constant 0 : index
    %c0_7 = arith.constant 0 : index
    %9 = vector.load %arg7[%c0_6, %c0_7] : memref<24x128xf32, #tpu.memory_space<vmem>>, vector<24x128xf32>
    tpu.vector_store %arg7[%c0_6, %c0_7], %8 {strides = array<i32>} : memref<24x128xf32, #tpu.memory_space<vmem>>, vector<24x128xf32>,
    %c0_i32_8 = arith.constant 0 : i32
    %10 = arith.cmpi eq, %arg2, %c0_i32_8 : i32
    %11 = arith.extui %10 : i1 to i32
    %c0_i32_9 = arith.constant 0 : i32
    %12 = arith.cmpi ne, %11, %c0_i32_9 : i32
    scf.if %12 {
      %c0_10 = arith.constant 0 : index
      %c0_11 = arith.constant 0 : index
      %13 = vector.load %arg7[%c0_10, %c0_11] : memref<24x128xf32, #tpu.memory_space<vmem>>, vector<24x128xf32>
      %c0_12 = arith.constant 0 : index
      %c0_13 = arith.constant 0 : index
      %14 = vector.load %arg5[%c0_12, %c0_13] : memref<1x128xf32, #tpu.memory_space<vmem>>, vector<1x128xf32>
      %15 = vector.broadcast %14 : vector<1x128xf32> to vector<24x128xf32>
      %16 = arith.addf %13, %15 : vector<24x128xf32>
      %c0_14 = arith.constant 0 : index
      %c0_15 = arith.constant 0 : index
      %17 = vector.load %arg6[%c0_14, %c0_15] : memref<24x128xf32, #tpu.memory_space<vmem>>, vector<24x128xf32>
      tpu.vector_store %arg6[%c0_14, %c0_15], %16 {strides = array<i32>} : memref<24x128xf32, #tpu.memory_space<vmem>>, vector<24x128xf32>,
    } else {
    }
    return
  }
  func.func @transform_0(%arg0: i32, %arg1: i32, %arg2: i32) -> (i32, i32) {
    %c0_i32 = arith.constant 0 : i32
    return %arg0, %arg2 : i32, i32
  }
  func.func @transform_1(%arg0: i32, %arg1: i32, %arg2: i32) -> (i32, i32) {
    %c0_i32 = arith.constant 0 : i32
    return %arg2, %arg1 : i32, i32
  }
  func.func @transform_2(%arg0: i32, %arg1: i32, %arg2: i32) -> (i32, i32) {
    %c0_i32 = arith.constant 0 : i32
    %c0_i32_0 = arith.constant 0 : i32
    return %c0_i32, %arg1 : i32, i32
  }
  func.func @transform_3(%arg0: i32, %arg1: i32, %arg2: i32) -> (i32, i32) {
    %c0_i32 = arith.constant 0 : i32
    return %arg0, %arg1 : i32, i32
  }
}

module attributes {stable_mosaic.version = 11 : i64} {
  func.func @_mha_kernel(%arg0: i32, %arg1: memref<1x9x128xf32, #tpu.memory_space<vmem>>, %arg2: memref<1x9x128xf32, #tpu.memory_space<vmem>>, %arg3: memref<1x9x128xf32, #tpu.memory_space<vmem>>, %arg4: memref<1x9x128xf32, #tpu.memory_space<vmem>>) attributes {dimension_semantics = [#tpu.dimension_semantics<parallel>], iteration_bounds = array<i64: 2>, scalar_prefetch = 0 : i64, scratch_operands = 0 : i64, tpu.core_type = #tpu.core_type<tc>, window_params = [{transform_indices = @transform_0, window_bounds = array<i64: 1, 9, 128>}, {transform_indices = @transform_1, window_bounds = array<i64: 1, 9, 128>}, {transform_indices = @transform_2, window_bounds = array<i64: 1, 9, 128>}, {transform_indices = @transform_3, window_bounds = array<i64: 1, 9, 128>}]} {
    %c0 = arith.constant 0 : index
    %c0_0 = arith.constant 0 : index
    %c0_1 = arith.constant 0 : index
    %0 = vector.load %arg1[%c0, %c0_0, %c0_1] : memref<1x9x128xf32, #tpu.memory_space<vmem>>, vector<1x9x128xf32>
    %1 = vector.shape_cast %0 : vector<1x9x128xf32> to vector<9x128xf32>
    %2 = arith.truncf %1 : vector<9x128xf32> to vector<9x128xbf16>
    %c0_2 = arith.constant 0 : index
    %c0_3 = arith.constant 0 : index
    %c0_4 = arith.constant 0 : index
    %3 = vector.load %arg2[%c0_2, %c0_3, %c0_4] : memref<1x9x128xf32, #tpu.memory_space<vmem>>, vector<1x9x128xf32>
    %4 = vector.shape_cast %3 : vector<1x9x128xf32> to vector<9x128xf32>
    %5 = arith.truncf %4 : vector<9x128xf32> to vector<9x128xbf16>
    %c0_5 = arith.constant 0 : index
    %c0_6 = arith.constant 0 : index
    %c0_7 = arith.constant 0 : index
    %6 = vector.load %arg3[%c0_5, %c0_6, %c0_7] : memref<1x9x128xf32, #tpu.memory_space<vmem>>, vector<1x9x128xf32>
    %7 = vector.shape_cast %6 : vector<1x9x128xf32> to vector<9x128xf32>
    %8 = arith.truncf %7 : vector<9x128xf32> to vector<9x128xbf16>
    %9 = tpu.iota {dimensions = array<i32: 0>} : vector<9x9xi32>
    %10 = tpu.iota {dimensions = array<i32: 1>} : vector<9x9xi32>
    %11 = arith.cmpi sle, %10, %9 : vector<9x9xi32>
    %12 = vector.extract_strided_slice %2 {offsets = [0, 0], sizes = [9, 32], strides = [1, 1]} : vector<9x128xbf16> to vector<9x32xbf16>
    %13 = vector.extract_strided_slice %5 {offsets = [0, 0], sizes = [9, 32], strides = [1, 1]} : vector<9x128xbf16> to vector<9x32xbf16>
    %14 = vector.extract_strided_slice %8 {offsets = [0, 0], sizes = [9, 32], strides = [1, 1]} : vector<9x128xbf16> to vector<9x32xbf16>
    %cst = arith.constant dense<0.000000e+00> : vector<9x9xf32>
    %15 = tpu.matmul %12, %13, %cst {dimension_numbers = #tpu.dot_dimension_numbers<[1], [1], [0], [0], [0, 0, 1, 0], [], []>} : vector<9x32xbf16>, vector<9x32xbf16>, vector<9x9xf32> -> vector<9x9xf32>
    %cst_8 = arith.constant 0.176776692 : f32
    %16 = vector.broadcast %cst_8 : f32 to vector<9x9xf32>
    %17 = arith.mulf %15, %16 : vector<9x9xf32>
    %cst_9 = arith.constant -1.000000e+30 : f32
    %18 = vector.broadcast %cst_9 : f32 to vector<9x9xf32>
    %19 = arith.select %11, %17, %18 : vector<9x9xi1>, vector<9x9xf32>
    %cst_10 = arith.constant dense<0xFF800000> : vector<9xf32>
    %20 = vector.multi_reduction <maximumf>, %19, %cst_10 [1] : vector<9x9xf32> to vector<9xf32>
    %21 = vector.shape_cast %20 : vector<9xf32> to vector<9x1xf32>
    %22 = vector.broadcast %21 : vector<9x1xf32> to vector<9x9xf32>
    %23 = arith.subf %19, %22 : vector<9x9xf32>
    %24 = math.exp %23 : vector<9x9xf32>
    %cst_11 = arith.constant dense<0.000000e+00> : vector<9xf32>
    %25 = vector.multi_reduction <add>, %24, %cst_11 [1] : vector<9x9xf32> to vector<9xf32>
    %26 = vector.shape_cast %25 : vector<9xf32> to vector<9x1xf32>
    %27 = tpu.reciprocal %26 {approx = true} : vector<9x1xf32> -> vector<9x1xf32>
    %28 = vector.broadcast %27 : vector<9x1xf32> to vector<9x9xf32>
    %29 = arith.mulf %24, %28 : vector<9x9xf32>
    %30 = arith.truncf %29 : vector<9x9xf32> to vector<9x9xbf16>
    %cst_12 = arith.constant dense<0.000000e+00> : vector<9x32xf32>
    %31 = tpu.matmul %30, %14, %cst_12 {dimension_numbers = #tpu.dot_dimension_numbers<[1], [0], [0], [1], [0, 0, 1, 1], [], []>} : vector<9x9xbf16>, vector<9x32xbf16>, vector<9x32xf32> -> vector<9x32xf32>
    %32 = vector.extract_strided_slice %2 {offsets = [0, 32], sizes = [9, 32], strides = [1, 1]} : vector<9x128xbf16> to vector<9x32xbf16>
    %33 = vector.extract_strided_slice %5 {offsets = [0, 32], sizes = [9, 32], strides = [1, 1]} : vector<9x128xbf16> to vector<9x32xbf16>
    %34 = vector.extract_strided_slice %8 {offsets = [0, 32], sizes = [9, 32], strides = [1, 1]} : vector<9x128xbf16> to vector<9x32xbf16>
    %cst_13 = arith.constant dense<0.000000e+00> : vector<9x9xf32>
    %35 = tpu.matmul %32, %33, %cst_13 {dimension_numbers = #tpu.dot_dimension_numbers<[1], [1], [0], [0], [0, 0, 1, 0], [], []>} : vector<9x32xbf16>, vector<9x32xbf16>, vector<9x9xf32> -> vector<9x9xf32>
    %cst_14 = arith.constant 0.176776692 : f32
    %36 = vector.broadcast %cst_14 : f32 to vector<9x9xf32>
    %37 = arith.mulf %35, %36 : vector<9x9xf32>
    %cst_15 = arith.constant -1.000000e+30 : f32
    %38 = vector.broadcast %cst_15 : f32 to vector<9x9xf32>
    %39 = arith.select %11, %37, %38 : vector<9x9xi1>, vector<9x9xf32>
    %cst_16 = arith.constant dense<0xFF800000> : vector<9xf32>
    %40 = vector.multi_reduction <maximumf>, %39, %cst_16 [1] : vector<9x9xf32> to vector<9xf32>
    %41 = vector.shape_cast %40 : vector<9xf32> to vector<9x1xf32>
    %42 = vector.broadcast %41 : vector<9x1xf32> to vector<9x9xf32>
    %43 = arith.subf %39, %42 : vector<9x9xf32>
    %44 = math.exp %43 : vector<9x9xf32>
    %cst_17 = arith.constant dense<0.000000e+00> : vector<9xf32>
    %45 = vector.multi_reduction <add>, %44, %cst_17 [1] : vector<9x9xf32> to vector<9xf32>
    %46 = vector.shape_cast %45 : vector<9xf32> to vector<9x1xf32>
    %47 = tpu.reciprocal %46 {approx = true} : vector<9x1xf32> -> vector<9x1xf32>
    %48 = vector.broadcast %47 : vector<9x1xf32> to vector<9x9xf32>
    %49 = arith.mulf %44, %48 : vector<9x9xf32>
    %50 = arith.truncf %49 : vector<9x9xf32> to vector<9x9xbf16>
    %cst_18 = arith.constant dense<0.000000e+00> : vector<9x32xf32>
    %51 = tpu.matmul %50, %34, %cst_18 {dimension_numbers = #tpu.dot_dimension_numbers<[1], [0], [0], [1], [0, 0, 1, 1], [], []>} : vector<9x9xbf16>, vector<9x32xbf16>, vector<9x32xf32> -> vector<9x32xf32>
    %52 = vector.extract_strided_slice %2 {offsets = [0, 64], sizes = [9, 32], strides = [1, 1]} : vector<9x128xbf16> to vector<9x32xbf16>
    %53 = vector.extract_strided_slice %5 {offsets = [0, 64], sizes = [9, 32], strides = [1, 1]} : vector<9x128xbf16> to vector<9x32xbf16>
    %54 = vector.extract_strided_slice %8 {offsets = [0, 64], sizes = [9, 32], strides = [1, 1]} : vector<9x128xbf16> to vector<9x32xbf16>
    %cst_19 = arith.constant dense<0.000000e+00> : vector<9x9xf32>
    %55 = tpu.matmul %52, %53, %cst_19 {dimension_numbers = #tpu.dot_dimension_numbers<[1], [1], [0], [0], [0, 0, 1, 0], [], []>} : vector<9x32xbf16>, vector<9x32xbf16>, vector<9x9xf32> -> vector<9x9xf32>
    %cst_20 = arith.constant 0.176776692 : f32
    %56 = vector.broadcast %cst_20 : f32 to vector<9x9xf32>
    %57 = arith.mulf %55, %56 : vector<9x9xf32>
    %cst_21 = arith.constant -1.000000e+30 : f32
    %58 = vector.broadcast %cst_21 : f32 to vector<9x9xf32>
    %59 = arith.select %11, %57, %58 : vector<9x9xi1>, vector<9x9xf32>
    %cst_22 = arith.constant dense<0xFF800000> : vector<9xf32>
    %60 = vector.multi_reduction <maximumf>, %59, %cst_22 [1] : vector<9x9xf32> to vector<9xf32>
    %61 = vector.shape_cast %60 : vector<9xf32> to vector<9x1xf32>
    %62 = vector.broadcast %61 : vector<9x1xf32> to vector<9x9xf32>
    %63 = arith.subf %59, %62 : vector<9x9xf32>
    %64 = math.exp %63 : vector<9x9xf32>
    %cst_23 = arith.constant dense<0.000000e+00> : vector<9xf32>
    %65 = vector.multi_reduction <add>, %64, %cst_23 [1] : vector<9x9xf32> to vector<9xf32>
    %66 = vector.shape_cast %65 : vector<9xf32> to vector<9x1xf32>
    %67 = tpu.reciprocal %66 {approx = true} : vector<9x1xf32> -> vector<9x1xf32>
    %68 = vector.broadcast %67 : vector<9x1xf32> to vector<9x9xf32>
    %69 = arith.mulf %64, %68 : vector<9x9xf32>
    %70 = arith.truncf %69 : vector<9x9xf32> to vector<9x9xbf16>
    %cst_24 = arith.constant dense<0.000000e+00> : vector<9x32xf32>
    %71 = tpu.matmul %70, %54, %cst_24 {dimension_numbers = #tpu.dot_dimension_numbers<[1], [0], [0], [1], [0, 0, 1, 1], [], []>} : vector<9x9xbf16>, vector<9x32xbf16>, vector<9x32xf32> -> vector<9x32xf32>
    %72 = vector.extract_strided_slice %2 {offsets = [0, 96], sizes = [9, 32], strides = [1, 1]} : vector<9x128xbf16> to vector<9x32xbf16>
    %73 = vector.extract_strided_slice %5 {offsets = [0, 96], sizes = [9, 32], strides = [1, 1]} : vector<9x128xbf16> to vector<9x32xbf16>
    %74 = vector.extract_strided_slice %8 {offsets = [0, 96], sizes = [9, 32], strides = [1, 1]} : vector<9x128xbf16> to vector<9x32xbf16>
    %cst_25 = arith.constant dense<0.000000e+00> : vector<9x9xf32>
    %75 = tpu.matmul %72, %73, %cst_25 {dimension_numbers = #tpu.dot_dimension_numbers<[1], [1], [0], [0], [0, 0, 1, 0], [], []>} : vector<9x32xbf16>, vector<9x32xbf16>, vector<9x9xf32> -> vector<9x9xf32>
    %cst_26 = arith.constant 0.176776692 : f32
    %76 = vector.broadcast %cst_26 : f32 to vector<9x9xf32>
    %77 = arith.mulf %75, %76 : vector<9x9xf32>
    %cst_27 = arith.constant -1.000000e+30 : f32
    %78 = vector.broadcast %cst_27 : f32 to vector<9x9xf32>
    %79 = arith.select %11, %77, %78 : vector<9x9xi1>, vector<9x9xf32>
    %cst_28 = arith.constant dense<0xFF800000> : vector<9xf32>
    %80 = vector.multi_reduction <maximumf>, %79, %cst_28 [1] : vector<9x9xf32> to vector<9xf32>
    %81 = vector.shape_cast %80 : vector<9xf32> to vector<9x1xf32>
    %82 = vector.broadcast %81 : vector<9x1xf32> to vector<9x9xf32>
    %83 = arith.subf %79, %82 : vector<9x9xf32>
    %84 = math.exp %83 : vector<9x9xf32>
    %cst_29 = arith.constant dense<0.000000e+00> : vector<9xf32>
    %85 = vector.multi_reduction <add>, %84, %cst_29 [1] : vector<9x9xf32> to vector<9xf32>
    %86 = vector.shape_cast %85 : vector<9xf32> to vector<9x1xf32>
    %87 = tpu.reciprocal %86 {approx = true} : vector<9x1xf32> -> vector<9x1xf32>
    %88 = vector.broadcast %87 : vector<9x1xf32> to vector<9x9xf32>
    %89 = arith.mulf %84, %88 : vector<9x9xf32>
    %90 = arith.truncf %89 : vector<9x9xf32> to vector<9x9xbf16>
    %cst_30 = arith.constant dense<0.000000e+00> : vector<9x32xf32>
    %91 = tpu.matmul %90, %74, %cst_30 {dimension_numbers = #tpu.dot_dimension_numbers<[1], [0], [0], [1], [0, 0, 1, 1], [], []>} : vector<9x9xbf16>, vector<9x32xbf16>, vector<9x32xf32> -> vector<9x32xf32>
    %92 = tpu.concatenate %31, %51, %71, %91 in 1 : vector<9x32xf32>, vector<9x32xf32>, vector<9x32xf32>, vector<9x32xf32> -> vector<9x128xf32>
    %c0_31 = arith.constant 0 : index
    %c0_32 = arith.constant 0 : index
    %c0_33 = arith.constant 0 : index
    %93 = vector.load %arg4[%c0_31, %c0_32, %c0_33] : memref<1x9x128xf32, #tpu.memory_space<vmem>>, vector<1x9x128xf32>
    %94 = vector.shape_cast %93 : vector<1x9x128xf32> to vector<9x128xf32>
    %95 = vector.shape_cast %92 : vector<9x128xf32> to vector<1x9x128xf32>
    tpu.vector_store %arg4[%c0_31, %c0_32, %c0_33], %95 {strides = array<i32>} : memref<1x9x128xf32, #tpu.memory_space<vmem>>, vector<1x9x128xf32>,
    return
  }
  func.func @transform_0(%arg0: i32) -> (i32, i32, i32) {
    %c0_i32 = arith.constant 0 : i32
    %c0_i32_0 = arith.constant 0 : i32
    %c0_i32_1 = arith.constant 0 : i32
    return %arg0, %c0_i32, %c0_i32_0 : i32, i32, i32
  }
  func.func @transform_1(%arg0: i32) -> (i32, i32, i32) {
    %c0_i32 = arith.constant 0 : i32
    %c0_i32_0 = arith.constant 0 : i32
    %c0_i32_1 = arith.constant 0 : i32
    return %arg0, %c0_i32, %c0_i32_0 : i32, i32, i32
  }
  func.func @transform_2(%arg0: i32) -> (i32, i32, i32) {
    %c0_i32 = arith.constant 0 : i32
    %c0_i32_0 = arith.constant 0 : i32
    %c0_i32_1 = arith.constant 0 : i32
    return %arg0, %c0_i32, %c0_i32_0 : i32, i32, i32
  }
  func.func @transform_3(%arg0: i32) -> (i32, i32, i32) {
    %c0_i32 = arith.constant 0 : i32
    %c0_i32_0 = arith.constant 0 : i32
    %c0_i32_1 = arith.constant 0 : i32
    return %arg0, %c0_i32, %c0_i32_0 : i32, i32, i32
  }
}

module attributes {stable_mosaic.version = 11 : i64} {
  func.func @_mm_addln_kernel(%arg0: i32, %arg1: i32, %arg2: memref<24x128xf32, #tpu.memory_space<vmem>>, %arg3: memref<128x128xbf16, #tpu.memory_space<vmem>>, %arg4: memref<1x128xf32, #tpu.memory_space<vmem>>, %arg5: memref<24x128xf32, #tpu.memory_space<vmem>>, %arg6: memref<1x128xf32, #tpu.memory_space<vmem>>, %arg7: memref<1x128xf32, #tpu.memory_space<vmem>>, %arg8: memref<24x128xf32, #tpu.memory_space<vmem>>, %arg9: memref<24x128xf32, #tpu.memory_space<vmem>>) attributes {dimension_semantics = [#tpu.dimension_semantics<parallel>, #tpu.dimension_semantics<arbitrary>], iteration_bounds = array<i64: 1, 1>, scalar_prefetch = 0 : i64, scratch_operands = 1 : i64, tpu.core_type = #tpu.core_type<tc>, window_params = [{transform_indices = @transform_0, window_bounds = array<i64: 24, 128>}, {transform_indices = @transform_1, window_bounds = array<i64: 128, 128>}, {pipeline_mode = #tpu.pipeline_mode<synchronous>, transform_indices = @transform_2, window_bounds = array<i64: 1, 128>}, {transform_indices = @transform_3, window_bounds = array<i64: 24, 128>}, {pipeline_mode = #tpu.pipeline_mode<synchronous>, transform_indices = @transform_4, window_bounds = array<i64: 1, 128>}, {pipeline_mode = #tpu.pipeline_mode<synchronous>, transform_indices = @transform_5, window_bounds = array<i64: 1, 128>}, {transform_indices = @transform_6, window_bounds = array<i64: 24, 128>}]} {
    %c0_i32 = arith.constant 0 : i32
    %0 = arith.cmpi eq, %arg1, %c0_i32 : i32
    %1 = arith.extui %0 : i1 to i32
    %c0_i32_0 = arith.constant 0 : i32
    %2 = arith.cmpi ne, %1, %c0_i32_0 : i32
    scf.if %2 {
      %cst_10 = arith.constant 0.000000e+00 : f32
      %13 = vector.broadcast %cst_10 : f32 to vector<24x128xf32>
      %c0_11 = arith.constant 0 : index
      %c0_12 = arith.constant 0 : index
      %14 = vector.load %arg9[%c0_11, %c0_12] : memref<24x128xf32, #tpu.memory_space<vmem>>, vector<24x128xf32>
      tpu.vector_store %arg9[%c0_11, %c0_12], %13 {strides = array<i32>} : memref<24x128xf32, #tpu.memory_space<vmem>>, vector<24x128xf32>,
    } else {
    }
    %c0 = arith.constant 0 : index
    %c0_1 = arith.constant 0 : index
    %3 = vector.load %arg9[%c0, %c0_1] : memref<24x128xf32, #tpu.memory_space<vmem>>, vector<24x128xf32>
    %c0_2 = arith.constant 0 : index
    %c0_3 = arith.constant 0 : index
    %4 = vector.load %arg2[%c0_2, %c0_3] : memref<24x128xf32, #tpu.memory_space<vmem>>, vector<24x128xf32>
    %5 = arith.truncf %4 : vector<24x128xf32> to vector<24x128xbf16>
    %c0_4 = arith.constant 0 : index
    %c0_5 = arith.constant 0 : index
    %6 = vector.load %arg3[%c0_4, %c0_5] : memref<128x128xbf16, #tpu.memory_space<vmem>>, vector<128x128xbf16>
    %cst = arith.constant dense<0.000000e+00> : vector<24x128xf32>
    %7 = tpu.matmul %5, %6, %cst {dimension_numbers = #tpu.dot_dimension_numbers<[1], [0], [0], [1], [0, 0, 1, 1], [], []>} : vector<24x128xbf16>, vector<128x128xbf16>, vector<24x128xf32> -> vector<24x128xf32>
    %8 = arith.addf %3, %7 : vector<24x128xf32>
    %c0_6 = arith.constant 0 : index
    %c0_7 = arith.constant 0 : index
    %9 = vector.load %arg9[%c0_6, %c0_7] : memref<24x128xf32, #tpu.memory_space<vmem>>, vector<24x128xf32>
    tpu.vector_store %arg9[%c0_6, %c0_7], %8 {strides = array<i32>} : memref<24x128xf32, #tpu.memory_space<vmem>>, vector<24x128xf32>,
    %c0_i32_8 = arith.constant 0 : i32
    %10 = arith.cmpi eq, %arg1, %c0_i32_8 : i32
    %11 = arith.extui %10 : i1 to i32
    %c0_i32_9 = arith.constant 0 : i32
    %12 = arith.cmpi ne, %11, %c0_i32_9 : i32
    scf.if %12 {
      %c0_10 = arith.constant 0 : index
      %c0_11 = arith.constant 0 : index
      %13 = vector.load %arg9[%c0_10, %c0_11] : memref<24x128xf32, #tpu.memory_space<vmem>>, vector<24x128xf32>
      %c0_12 = arith.constant 0 : index
      %c0_13 = arith.constant 0 : index
      %14 = vector.load %arg4[%c0_12, %c0_13] : memref<1x128xf32, #tpu.memory_space<vmem>>, vector<1x128xf32>
      %15 = vector.broadcast %14 : vector<1x128xf32> to vector<24x128xf32>
      %16 = arith.addf %13, %15 : vector<24x128xf32>
      %c0_14 = arith.constant 0 : index
      %c0_15 = arith.constant 0 : index
      %17 = vector.load %arg5[%c0_14, %c0_15] : memref<24x128xf32, #tpu.memory_space<vmem>>, vector<24x128xf32>
      %18 = arith.addf %16, %17 : vector<24x128xf32>
      %cst_16 = arith.constant dense<0.000000e+00> : vector<24xf32>
      %19 = vector.multi_reduction <add>, %18, %cst_16 [1] : vector<24x128xf32> to vector<24xf32>
      %20 = vector.shape_cast %19 : vector<24xf32> to vector<24x1xf32>
      %cst_17 = arith.constant 1.280000e+02 : f32
      %21 = vector.broadcast %cst_17 : f32 to vector<24x1xf32>
      %22 = arith.divf %20, %21 : vector<24x1xf32>
      %23 = vector.broadcast %22 : vector<24x1xf32> to vector<24x128xf32>
      %24 = arith.subf %18, %23 : vector<24x128xf32>
      %25 = arith.mulf %24, %24 : vector<24x128xf32>
      %cst_18 = arith.constant dense<0.000000e+00> : vector<24xf32>
      %26 = vector.multi_reduction <add>, %25, %cst_18 [1] : vector<24x128xf32> to vector<24xf32>
      %27 = vector.shape_cast %26 : vector<24xf32> to vector<24x1xf32>
      %cst_19 = arith.constant 1.280000e+02 : f32
      %28 = vector.broadcast %cst_19 : f32 to vector<24x1xf32>
      %29 = arith.divf %27, %28 : vector<24x1xf32>
      %30 = vector.broadcast %22 : vector<24x1xf32> to vector<24x128xf32>
      %31 = arith.subf %18, %30 : vector<24x128xf32>
      %cst_20 = arith.constant 9.99999974E-6 : f32
      %32 = vector.broadcast %cst_20 : f32 to vector<24x1xf32>
      %33 = arith.addf %29, %32 : vector<24x1xf32>
      %34 = math.rsqrt %33 : vector<24x1xf32>
      %35 = vector.broadcast %34 : vector<24x1xf32> to vector<24x128xf32>
      %36 = arith.mulf %31, %35 : vector<24x128xf32>
      %c0_21 = arith.constant 0 : index
      %c0_22 = arith.constant 0 : index
      %37 = vector.load %arg6[%c0_21, %c0_22] : memref<1x128xf32, #tpu.memory_space<vmem>>, vector<1x128xf32>
      %38 = vector.broadcast %37 : vector<1x128xf32> to vector<24x128xf32>
      %39 = arith.mulf %36, %38 : vector<24x128xf32>
      %c0_23 = arith.constant 0 : index
      %c0_24 = arith.constant 0 : index
      %40 = vector.load %arg7[%c0_23, %c0_24] : memref<1x128xf32, #tpu.memory_space<vmem>>, vector<1x128xf32>
      %41 = vector.broadcast %40 : vector<1x128xf32> to vector<24x128xf32>
      %42 = arith.addf %39, %41 : vector<24x128xf32>
      %c0_25 = arith.constant 0 : index
      %c0_26 = arith.constant 0 : index
      %43 = vector.load %arg8[%c0_25, %c0_26] : memref<24x128xf32, #tpu.memory_space<vmem>>, vector<24x128xf32>
      tpu.vector_store %arg8[%c0_25, %c0_26], %42 {strides = array<i32>} : memref<24x128xf32, #tpu.memory_space<vmem>>, vector<24x128xf32>,
    } else {
    }
    return
  }
  func.func @transform_0(%arg0: i32, %arg1: i32) -> (i32, i32) {
    %c0_i32 = arith.constant 0 : i32
    return %arg0, %arg1 : i32, i32
  }
  func.func @transform_1(%arg0: i32, %arg1: i32) -> (i32, i32) {
    %c0_i32 = arith.constant 0 : i32
    %c0_i32_0 = arith.constant 0 : i32
    return %arg1, %c0_i32 : i32, i32
  }
  func.func @transform_2(%arg0: i32, %arg1: i32) -> (i32, i32) {
    %c0_i32 = arith.constant 0 : i32
    %c0_i32_0 = arith.constant 0 : i32
    %c0_i32_1 = arith.constant 0 : i32
    return %c0_i32, %c0_i32_0 : i32, i32
  }
  func.func @transform_3(%arg0: i32, %arg1: i32) -> (i32, i32) {
    %c0_i32 = arith.constant 0 : i32
    %c0_i32_0 = arith.constant 0 : i32
    return %arg0, %c0_i32 : i32, i32
  }
  func.func @transform_4(%arg0: i32, %arg1: i32) -> (i32, i32) {
    %c0_i32 = arith.constant 0 : i32
    %c0_i32_0 = arith.constant 0 : i32
    %c0_i32_1 = arith.constant 0 : i32
    return %c0_i32, %c0_i32_0 : i32, i32
  }
  func.func @transform_5(%arg0: i32, %arg1: i32) -> (i32, i32) {
    %c0_i32 = arith.constant 0 : i32
    %c0_i32_0 = arith.constant 0 : i32
    %c0_i32_1 = arith.constant 0 : i32
    return %c0_i32, %c0_i32_0 : i32, i32
  }
  func.func @transform_6(%arg0: i32, %arg1: i32) -> (i32, i32) {
    %c0_i32 = arith.constant 0 : i32
    %c0_i32_0 = arith.constant 0 : i32
    return %arg0, %c0_i32 : i32, i32
  }
}

module attributes {stable_mosaic.version = 11 : i64} {
  func.func @_mm_kernel(%arg0: i32, %arg1: i32, %arg2: i32, %arg3: memref<24x128xf32, #tpu.memory_space<vmem>>, %arg4: memref<128x128xbf16, #tpu.memory_space<vmem>>, %arg5: memref<1x128xf32, #tpu.memory_space<vmem>>, %arg6: memref<24x128xf32, #tpu.memory_space<vmem>>, %arg7: memref<24x128xf32, #tpu.memory_space<vmem>>) attributes {dimension_semantics = [#tpu.dimension_semantics<parallel>, #tpu.dimension_semantics<parallel>, #tpu.dimension_semantics<arbitrary>], iteration_bounds = array<i64: 1, 1, 1>, scalar_prefetch = 0 : i64, scratch_operands = 1 : i64, tpu.core_type = #tpu.core_type<tc>, window_params = [{transform_indices = @transform_0, window_bounds = array<i64: 24, 128>}, {transform_indices = @transform_1, window_bounds = array<i64: 128, 128>}, {transform_indices = @transform_2, window_bounds = array<i64: 1, 128>}, {transform_indices = @transform_3, window_bounds = array<i64: 24, 128>}]} {
    %c0_i32 = arith.constant 0 : i32
    %0 = arith.cmpi eq, %arg2, %c0_i32 : i32
    %1 = arith.extui %0 : i1 to i32
    %c0_i32_0 = arith.constant 0 : i32
    %2 = arith.cmpi ne, %1, %c0_i32_0 : i32
    scf.if %2 {
      %cst_10 = arith.constant 0.000000e+00 : f32
      %13 = vector.broadcast %cst_10 : f32 to vector<24x128xf32>
      %c0_11 = arith.constant 0 : index
      %c0_12 = arith.constant 0 : index
      %14 = vector.load %arg7[%c0_11, %c0_12] : memref<24x128xf32, #tpu.memory_space<vmem>>, vector<24x128xf32>
      tpu.vector_store %arg7[%c0_11, %c0_12], %13 {strides = array<i32>} : memref<24x128xf32, #tpu.memory_space<vmem>>, vector<24x128xf32>,
    } else {
    }
    %c0 = arith.constant 0 : index
    %c0_1 = arith.constant 0 : index
    %3 = vector.load %arg7[%c0, %c0_1] : memref<24x128xf32, #tpu.memory_space<vmem>>, vector<24x128xf32>
    %c0_2 = arith.constant 0 : index
    %c0_3 = arith.constant 0 : index
    %4 = vector.load %arg3[%c0_2, %c0_3] : memref<24x128xf32, #tpu.memory_space<vmem>>, vector<24x128xf32>
    %5 = arith.truncf %4 : vector<24x128xf32> to vector<24x128xbf16>
    %c0_4 = arith.constant 0 : index
    %c0_5 = arith.constant 0 : index
    %6 = vector.load %arg4[%c0_4, %c0_5] : memref<128x128xbf16, #tpu.memory_space<vmem>>, vector<128x128xbf16>
    %cst = arith.constant dense<0.000000e+00> : vector<24x128xf32>
    %7 = tpu.matmul %5, %6, %cst {dimension_numbers = #tpu.dot_dimension_numbers<[1], [0], [0], [1], [0, 0, 1, 1], [], []>} : vector<24x128xbf16>, vector<128x128xbf16>, vector<24x128xf32> -> vector<24x128xf32>
    %8 = arith.addf %3, %7 : vector<24x128xf32>
    %c0_6 = arith.constant 0 : index
    %c0_7 = arith.constant 0 : index
    %9 = vector.load %arg7[%c0_6, %c0_7] : memref<24x128xf32, #tpu.memory_space<vmem>>, vector<24x128xf32>
    tpu.vector_store %arg7[%c0_6, %c0_7], %8 {strides = array<i32>} : memref<24x128xf32, #tpu.memory_space<vmem>>, vector<24x128xf32>,
    %c0_i32_8 = arith.constant 0 : i32
    %10 = arith.cmpi eq, %arg2, %c0_i32_8 : i32
    %11 = arith.extui %10 : i1 to i32
    %c0_i32_9 = arith.constant 0 : i32
    %12 = arith.cmpi ne, %11, %c0_i32_9 : i32
    scf.if %12 {
      %c0_10 = arith.constant 0 : index
      %c0_11 = arith.constant 0 : index
      %13 = vector.load %arg7[%c0_10, %c0_11] : memref<24x128xf32, #tpu.memory_space<vmem>>, vector<24x128xf32>
      %c0_12 = arith.constant 0 : index
      %c0_13 = arith.constant 0 : index
      %14 = vector.load %arg5[%c0_12, %c0_13] : memref<1x128xf32, #tpu.memory_space<vmem>>, vector<1x128xf32>
      %15 = vector.broadcast %14 : vector<1x128xf32> to vector<24x128xf32>
      %16 = arith.addf %13, %15 : vector<24x128xf32>
      %c0_14 = arith.constant 0 : index
      %c0_15 = arith.constant 0 : index
      %17 = vector.load %arg6[%c0_14, %c0_15] : memref<24x128xf32, #tpu.memory_space<vmem>>, vector<24x128xf32>
      tpu.vector_store %arg6[%c0_14, %c0_15], %16 {strides = array<i32>} : memref<24x128xf32, #tpu.memory_space<vmem>>, vector<24x128xf32>,
    } else {
    }
    return
  }
  func.func @transform_0(%arg0: i32, %arg1: i32, %arg2: i32) -> (i32, i32) {
    %c0_i32 = arith.constant 0 : i32
    return %arg0, %arg2 : i32, i32
  }
  func.func @transform_1(%arg0: i32, %arg1: i32, %arg2: i32) -> (i32, i32) {
    %c0_i32 = arith.constant 0 : i32
    return %arg2, %arg1 : i32, i32
  }
  func.func @transform_2(%arg0: i32, %arg1: i32, %arg2: i32) -> (i32, i32) {
    %c0_i32 = arith.constant 0 : i32
    %c0_i32_0 = arith.constant 0 : i32
    return %c0_i32, %arg1 : i32, i32
  }
  func.func @transform_3(%arg0: i32, %arg1: i32, %arg2: i32) -> (i32, i32) {
    %c0_i32 = arith.constant 0 : i32
    return %arg0, %arg1 : i32, i32
  }
}

module attributes {stable_mosaic.version = 11 : i64} {
  func.func @_mm_kernel(%arg0: i32, %arg1: i32, %arg2: i32, %arg3: memref<16x128xf32, #tpu.memory_space<vmem>>, %arg4: memref<128x128xbf16, #tpu.memory_space<vmem>>, %arg5: memref<1x128xf32, #tpu.memory_space<vmem>>, %arg6: memref<16x128xf32, #tpu.memory_space<vmem>>, %arg7: memref<16x128xf32, #tpu.memory_space<vmem>>) attributes {dimension_semantics = [#tpu.dimension_semantics<parallel>, #tpu.dimension_semantics<parallel>, #tpu.dimension_semantics<arbitrary>], iteration_bounds = array<i64: 1, 3, 1>, scalar_prefetch = 0 : i64, scratch_operands = 1 : i64, tpu.core_type = #tpu.core_type<tc>, window_params = [{transform_indices = @transform_0, window_bounds = array<i64: 16, 128>}, {transform_indices = @transform_1, window_bounds = array<i64: 128, 128>}, {transform_indices = @transform_2, window_bounds = array<i64: 1, 128>}, {transform_indices = @transform_3, window_bounds = array<i64: 16, 128>}]} {
    %c0_i32 = arith.constant 0 : i32
    %0 = arith.cmpi eq, %arg2, %c0_i32 : i32
    %1 = arith.extui %0 : i1 to i32
    %c0_i32_0 = arith.constant 0 : i32
    %2 = arith.cmpi ne, %1, %c0_i32_0 : i32
    scf.if %2 {
      %cst_10 = arith.constant 0.000000e+00 : f32
      %13 = vector.broadcast %cst_10 : f32 to vector<16x128xf32>
      %c0_11 = arith.constant 0 : index
      %c0_12 = arith.constant 0 : index
      %14 = vector.load %arg7[%c0_11, %c0_12] : memref<16x128xf32, #tpu.memory_space<vmem>>, vector<16x128xf32>
      tpu.vector_store %arg7[%c0_11, %c0_12], %13 {strides = array<i32>} : memref<16x128xf32, #tpu.memory_space<vmem>>, vector<16x128xf32>,
    } else {
    }
    %c0 = arith.constant 0 : index
    %c0_1 = arith.constant 0 : index
    %3 = vector.load %arg7[%c0, %c0_1] : memref<16x128xf32, #tpu.memory_space<vmem>>, vector<16x128xf32>
    %c0_2 = arith.constant 0 : index
    %c0_3 = arith.constant 0 : index
    %4 = vector.load %arg3[%c0_2, %c0_3] : memref<16x128xf32, #tpu.memory_space<vmem>>, vector<16x128xf32>
    %5 = arith.truncf %4 : vector<16x128xf32> to vector<16x128xbf16>
    %c0_4 = arith.constant 0 : index
    %c0_5 = arith.constant 0 : index
    %6 = vector.load %arg4[%c0_4, %c0_5] : memref<128x128xbf16, #tpu.memory_space<vmem>>, vector<128x128xbf16>
    %cst = arith.constant dense<0.000000e+00> : vector<16x128xf32>
    %7 = tpu.matmul %5, %6, %cst {dimension_numbers = #tpu.dot_dimension_numbers<[1], [0], [0], [1], [0, 0, 1, 1], [], []>} : vector<16x128xbf16>, vector<128x128xbf16>, vector<16x128xf32> -> vector<16x128xf32>
    %8 = arith.addf %3, %7 : vector<16x128xf32>
    %c0_6 = arith.constant 0 : index
    %c0_7 = arith.constant 0 : index
    %9 = vector.load %arg7[%c0_6, %c0_7] : memref<16x128xf32, #tpu.memory_space<vmem>>, vector<16x128xf32>
    tpu.vector_store %arg7[%c0_6, %c0_7], %8 {strides = array<i32>} : memref<16x128xf32, #tpu.memory_space<vmem>>, vector<16x128xf32>,
    %c0_i32_8 = arith.constant 0 : i32
    %10 = arith.cmpi eq, %arg2, %c0_i32_8 : i32
    %11 = arith.extui %10 : i1 to i32
    %c0_i32_9 = arith.constant 0 : i32
    %12 = arith.cmpi ne, %11, %c0_i32_9 : i32
    scf.if %12 {
      %c0_10 = arith.constant 0 : index
      %c0_11 = arith.constant 0 : index
      %13 = vector.load %arg7[%c0_10, %c0_11] : memref<16x128xf32, #tpu.memory_space<vmem>>, vector<16x128xf32>
      %c0_12 = arith.constant 0 : index
      %c0_13 = arith.constant 0 : index
      %14 = vector.load %arg5[%c0_12, %c0_13] : memref<1x128xf32, #tpu.memory_space<vmem>>, vector<1x128xf32>
      %15 = vector.broadcast %14 : vector<1x128xf32> to vector<16x128xf32>
      %16 = arith.addf %13, %15 : vector<16x128xf32>
      %c0_14 = arith.constant 0 : index
      %c0_15 = arith.constant 0 : index
      %17 = vector.load %arg6[%c0_14, %c0_15] : memref<16x128xf32, #tpu.memory_space<vmem>>, vector<16x128xf32>
      tpu.vector_store %arg6[%c0_14, %c0_15], %16 {strides = array<i32>} : memref<16x128xf32, #tpu.memory_space<vmem>>, vector<16x128xf32>,
    } else {
    }
    return
  }
  func.func @transform_0(%arg0: i32, %arg1: i32, %arg2: i32) -> (i32, i32) {
    %c0_i32 = arith.constant 0 : i32
    return %arg0, %arg2 : i32, i32
  }
  func.func @transform_1(%arg0: i32, %arg1: i32, %arg2: i32) -> (i32, i32) {
    %c0_i32 = arith.constant 0 : i32
    return %arg2, %arg1 : i32, i32
  }
  func.func @transform_2(%arg0: i32, %arg1: i32, %arg2: i32) -> (i32, i32) {
    %c0_i32 = arith.constant 0 : i32
    %c0_i32_0 = arith.constant 0 : i32
    return %c0_i32, %arg1 : i32, i32
  }
  func.func @transform_3(%arg0: i32, %arg1: i32, %arg2: i32) -> (i32, i32) {
    %c0_i32 = arith.constant 0 : i32
    return %arg0, %arg1 : i32, i32
  }
}

module attributes {stable_mosaic.version = 11 : i64} {
  func.func @_mm_addln_kernel(%arg0: i32, %arg1: i32, %arg2: memref<16x128xf32, #tpu.memory_space<vmem>>, %arg3: memref<128x128xbf16, #tpu.memory_space<vmem>>, %arg4: memref<1x128xf32, #tpu.memory_space<vmem>>, %arg5: memref<16x128xf32, #tpu.memory_space<vmem>>, %arg6: memref<1x128xf32, #tpu.memory_space<vmem>>, %arg7: memref<1x128xf32, #tpu.memory_space<vmem>>, %arg8: memref<16x128xf32, #tpu.memory_space<vmem>>, %arg9: memref<16x128xf32, #tpu.memory_space<vmem>>) attributes {dimension_semantics = [#tpu.dimension_semantics<parallel>, #tpu.dimension_semantics<arbitrary>], iteration_bounds = array<i64: 1, 1>, scalar_prefetch = 0 : i64, scratch_operands = 1 : i64, tpu.core_type = #tpu.core_type<tc>, window_params = [{transform_indices = @transform_0, window_bounds = array<i64: 16, 128>}, {transform_indices = @transform_1, window_bounds = array<i64: 128, 128>}, {pipeline_mode = #tpu.pipeline_mode<synchronous>, transform_indices = @transform_2, window_bounds = array<i64: 1, 128>}, {transform_indices = @transform_3, window_bounds = array<i64: 16, 128>}, {pipeline_mode = #tpu.pipeline_mode<synchronous>, transform_indices = @transform_4, window_bounds = array<i64: 1, 128>}, {pipeline_mode = #tpu.pipeline_mode<synchronous>, transform_indices = @transform_5, window_bounds = array<i64: 1, 128>}, {transform_indices = @transform_6, window_bounds = array<i64: 16, 128>}]} {
    %c0_i32 = arith.constant 0 : i32
    %0 = arith.cmpi eq, %arg1, %c0_i32 : i32
    %1 = arith.extui %0 : i1 to i32
    %c0_i32_0 = arith.constant 0 : i32
    %2 = arith.cmpi ne, %1, %c0_i32_0 : i32
    scf.if %2 {
      %cst_10 = arith.constant 0.000000e+00 : f32
      %13 = vector.broadcast %cst_10 : f32 to vector<16x128xf32>
      %c0_11 = arith.constant 0 : index
      %c0_12 = arith.constant 0 : index
      %14 = vector.load %arg9[%c0_11, %c0_12] : memref<16x128xf32, #tpu.memory_space<vmem>>, vector<16x128xf32>
      tpu.vector_store %arg9[%c0_11, %c0_12], %13 {strides = array<i32>} : memref<16x128xf32, #tpu.memory_space<vmem>>, vector<16x128xf32>,
    } else {
    }
    %c0 = arith.constant 0 : index
    %c0_1 = arith.constant 0 : index
    %3 = vector.load %arg9[%c0, %c0_1] : memref<16x128xf32, #tpu.memory_space<vmem>>, vector<16x128xf32>
    %c0_2 = arith.constant 0 : index
    %c0_3 = arith.constant 0 : index
    %4 = vector.load %arg2[%c0_2, %c0_3] : memref<16x128xf32, #tpu.memory_space<vmem>>, vector<16x128xf32>
    %5 = arith.truncf %4 : vector<16x128xf32> to vector<16x128xbf16>
    %c0_4 = arith.constant 0 : index
    %c0_5 = arith.constant 0 : index
    %6 = vector.load %arg3[%c0_4, %c0_5] : memref<128x128xbf16, #tpu.memory_space<vmem>>, vector<128x128xbf16>
    %cst = arith.constant dense<0.000000e+00> : vector<16x128xf32>
    %7 = tpu.matmul %5, %6, %cst {dimension_numbers = #tpu.dot_dimension_numbers<[1], [0], [0], [1], [0, 0, 1, 1], [], []>} : vector<16x128xbf16>, vector<128x128xbf16>, vector<16x128xf32> -> vector<16x128xf32>
    %8 = arith.addf %3, %7 : vector<16x128xf32>
    %c0_6 = arith.constant 0 : index
    %c0_7 = arith.constant 0 : index
    %9 = vector.load %arg9[%c0_6, %c0_7] : memref<16x128xf32, #tpu.memory_space<vmem>>, vector<16x128xf32>
    tpu.vector_store %arg9[%c0_6, %c0_7], %8 {strides = array<i32>} : memref<16x128xf32, #tpu.memory_space<vmem>>, vector<16x128xf32>,
    %c0_i32_8 = arith.constant 0 : i32
    %10 = arith.cmpi eq, %arg1, %c0_i32_8 : i32
    %11 = arith.extui %10 : i1 to i32
    %c0_i32_9 = arith.constant 0 : i32
    %12 = arith.cmpi ne, %11, %c0_i32_9 : i32
    scf.if %12 {
      %c0_10 = arith.constant 0 : index
      %c0_11 = arith.constant 0 : index
      %13 = vector.load %arg9[%c0_10, %c0_11] : memref<16x128xf32, #tpu.memory_space<vmem>>, vector<16x128xf32>
      %c0_12 = arith.constant 0 : index
      %c0_13 = arith.constant 0 : index
      %14 = vector.load %arg4[%c0_12, %c0_13] : memref<1x128xf32, #tpu.memory_space<vmem>>, vector<1x128xf32>
      %15 = vector.broadcast %14 : vector<1x128xf32> to vector<16x128xf32>
      %16 = arith.addf %13, %15 : vector<16x128xf32>
      %c0_14 = arith.constant 0 : index
      %c0_15 = arith.constant 0 : index
      %17 = vector.load %arg5[%c0_14, %c0_15] : memref<16x128xf32, #tpu.memory_space<vmem>>, vector<16x128xf32>
      %18 = arith.addf %16, %17 : vector<16x128xf32>
      %cst_16 = arith.constant dense<0.000000e+00> : vector<16xf32>
      %19 = vector.multi_reduction <add>, %18, %cst_16 [1] : vector<16x128xf32> to vector<16xf32>
      %20 = vector.shape_cast %19 : vector<16xf32> to vector<16x1xf32>
      %cst_17 = arith.constant 1.280000e+02 : f32
      %21 = vector.broadcast %cst_17 : f32 to vector<16x1xf32>
      %22 = arith.divf %20, %21 : vector<16x1xf32>
      %23 = vector.broadcast %22 : vector<16x1xf32> to vector<16x128xf32>
      %24 = arith.subf %18, %23 : vector<16x128xf32>
      %25 = arith.mulf %24, %24 : vector<16x128xf32>
      %cst_18 = arith.constant dense<0.000000e+00> : vector<16xf32>
      %26 = vector.multi_reduction <add>, %25, %cst_18 [1] : vector<16x128xf32> to vector<16xf32>
      %27 = vector.shape_cast %26 : vector<16xf32> to vector<16x1xf32>
      %cst_19 = arith.constant 1.280000e+02 : f32
      %28 = vector.broadcast %cst_19 : f32 to vector<16x1xf32>
      %29 = arith.divf %27, %28 : vector<16x1xf32>
      %30 = vector.broadcast %22 : vector<16x1xf32> to vector<16x128xf32>
      %31 = arith.subf %18, %30 : vector<16x128xf32>
      %cst_20 = arith.constant 9.99999974E-6 : f32
      %32 = vector.broadcast %cst_20 : f32 to vector<16x1xf32>
      %33 = arith.addf %29, %32 : vector<16x1xf32>
      %34 = math.rsqrt %33 : vector<16x1xf32>
      %35 = vector.broadcast %34 : vector<16x1xf32> to vector<16x128xf32>
      %36 = arith.mulf %31, %35 : vector<16x128xf32>
      %c0_21 = arith.constant 0 : index
      %c0_22 = arith.constant 0 : index
      %37 = vector.load %arg6[%c0_21, %c0_22] : memref<1x128xf32, #tpu.memory_space<vmem>>, vector<1x128xf32>
      %38 = vector.broadcast %37 : vector<1x128xf32> to vector<16x128xf32>
      %39 = arith.mulf %36, %38 : vector<16x128xf32>
      %c0_23 = arith.constant 0 : index
      %c0_24 = arith.constant 0 : index
      %40 = vector.load %arg7[%c0_23, %c0_24] : memref<1x128xf32, #tpu.memory_space<vmem>>, vector<1x128xf32>
      %41 = vector.broadcast %40 : vector<1x128xf32> to vector<16x128xf32>
      %42 = arith.addf %39, %41 : vector<16x128xf32>
      %c0_25 = arith.constant 0 : index
      %c0_26 = arith.constant 0 : index
      %43 = vector.load %arg8[%c0_25, %c0_26] : memref<16x128xf32, #tpu.memory_space<vmem>>, vector<16x128xf32>
      tpu.vector_store %arg8[%c0_25, %c0_26], %42 {strides = array<i32>} : memref<16x128xf32, #tpu.memory_space<vmem>>, vector<16x128xf32>,
    } else {
    }
    return
  }
  func.func @transform_0(%arg0: i32, %arg1: i32) -> (i32, i32) {
    %c0_i32 = arith.constant 0 : i32
    return %arg0, %arg1 : i32, i32
  }
  func.func @transform_1(%arg0: i32, %arg1: i32) -> (i32, i32) {
    %c0_i32 = arith.constant 0 : i32
    %c0_i32_0 = arith.constant 0 : i32
    return %arg1, %c0_i32 : i32, i32
  }
  func.func @transform_2(%arg0: i32, %arg1: i32) -> (i32, i32) {
    %c0_i32 = arith.constant 0 : i32
    %c0_i32_0 = arith.constant 0 : i32
    %c0_i32_1 = arith.constant 0 : i32
    return %c0_i32, %c0_i32_0 : i32, i32
  }
  func.func @transform_3(%arg0: i32, %arg1: i32) -> (i32, i32) {
    %c0_i32 = arith.constant 0 : i32
    %c0_i32_0 = arith.constant 0 : i32
    return %arg0, %c0_i32 : i32, i32
  }
  func.func @transform_4(%arg0: i32, %arg1: i32) -> (i32, i32) {
    %c0_i32 = arith.constant 0 : i32
    %c0_i32_0 = arith.constant 0 : i32
    %c0_i32_1 = arith.constant 0 : i32
    return %c0_i32, %c0_i32_0 : i32, i32
  }
  func.func @transform_5(%arg0: i32, %arg1: i32) -> (i32, i32) {
    %c0_i32 = arith.constant 0 : i32
    %c0_i32_0 = arith.constant 0 : i32
    %c0_i32_1 = arith.constant 0 : i32
    return %c0_i32, %c0_i32_0 : i32, i32
  }
  func.func @transform_6(%arg0: i32, %arg1: i32) -> (i32, i32) {
    %c0_i32 = arith.constant 0 : i32
    %c0_i32_0 = arith.constant 0 : i32
    return %arg0, %c0_i32 : i32, i32
  }
}

module attributes {stable_mosaic.version = 11 : i64} {
  func.func @_mha_kernel(%arg0: i32, %arg1: memref<1x8x128xf32, #tpu.memory_space<vmem>>, %arg2: memref<1x8x128xf32, #tpu.memory_space<vmem>>, %arg3: memref<1x8x128xf32, #tpu.memory_space<vmem>>, %arg4: memref<1x8x128xf32, #tpu.memory_space<vmem>>) attributes {dimension_semantics = [#tpu.dimension_semantics<parallel>], iteration_bounds = array<i64: 2>, scalar_prefetch = 0 : i64, scratch_operands = 0 : i64, tpu.core_type = #tpu.core_type<tc>, window_params = [{transform_indices = @transform_0, window_bounds = array<i64: 1, 8, 128>}, {transform_indices = @transform_1, window_bounds = array<i64: 1, 8, 128>}, {transform_indices = @transform_2, window_bounds = array<i64: 1, 8, 128>}, {transform_indices = @transform_3, window_bounds = array<i64: 1, 8, 128>}]} {
    %c0 = arith.constant 0 : index
    %c0_0 = arith.constant 0 : index
    %c0_1 = arith.constant 0 : index
    %0 = vector.load %arg1[%c0, %c0_0, %c0_1] : memref<1x8x128xf32, #tpu.memory_space<vmem>>, vector<1x8x128xf32>
    %1 = vector.shape_cast %0 : vector<1x8x128xf32> to vector<8x128xf32>
    %2 = arith.truncf %1 : vector<8x128xf32> to vector<8x128xbf16>
    %c0_2 = arith.constant 0 : index
    %c0_3 = arith.constant 0 : index
    %c0_4 = arith.constant 0 : index
    %3 = vector.load %arg2[%c0_2, %c0_3, %c0_4] : memref<1x8x128xf32, #tpu.memory_space<vmem>>, vector<1x8x128xf32>
    %4 = vector.shape_cast %3 : vector<1x8x128xf32> to vector<8x128xf32>
    %5 = arith.truncf %4 : vector<8x128xf32> to vector<8x128xbf16>
    %c0_5 = arith.constant 0 : index
    %c0_6 = arith.constant 0 : index
    %c0_7 = arith.constant 0 : index
    %6 = vector.load %arg3[%c0_5, %c0_6, %c0_7] : memref<1x8x128xf32, #tpu.memory_space<vmem>>, vector<1x8x128xf32>
    %7 = vector.shape_cast %6 : vector<1x8x128xf32> to vector<8x128xf32>
    %8 = arith.truncf %7 : vector<8x128xf32> to vector<8x128xbf16>
    %9 = vector.extract_strided_slice %2 {offsets = [0, 0], sizes = [8, 32], strides = [1, 1]} : vector<8x128xbf16> to vector<8x32xbf16>
    %10 = vector.extract_strided_slice %5 {offsets = [0, 0], sizes = [8, 32], strides = [1, 1]} : vector<8x128xbf16> to vector<8x32xbf16>
    %11 = vector.extract_strided_slice %8 {offsets = [0, 0], sizes = [8, 32], strides = [1, 1]} : vector<8x128xbf16> to vector<8x32xbf16>
    %cst = arith.constant dense<0.000000e+00> : vector<8x8xf32>
    %12 = tpu.matmul %9, %10, %cst {dimension_numbers = #tpu.dot_dimension_numbers<[1], [1], [0], [0], [0, 0, 1, 0], [], []>} : vector<8x32xbf16>, vector<8x32xbf16>, vector<8x8xf32> -> vector<8x8xf32>
    %cst_8 = arith.constant 0.176776692 : f32
    %13 = vector.broadcast %cst_8 : f32 to vector<8x8xf32>
    %14 = arith.mulf %12, %13 : vector<8x8xf32>
    %cst_9 = arith.constant dense<0xFF800000> : vector<8xf32>
    %15 = vector.multi_reduction <maximumf>, %14, %cst_9 [1] : vector<8x8xf32> to vector<8xf32>
    %16 = vector.shape_cast %15 : vector<8xf32> to vector<8x1xf32>
    %17 = vector.broadcast %16 : vector<8x1xf32> to vector<8x8xf32>
    %18 = arith.subf %14, %17 : vector<8x8xf32>
    %19 = math.exp %18 : vector<8x8xf32>
    %cst_10 = arith.constant dense<0.000000e+00> : vector<8xf32>
    %20 = vector.multi_reduction <add>, %19, %cst_10 [1] : vector<8x8xf32> to vector<8xf32>
    %21 = vector.shape_cast %20 : vector<8xf32> to vector<8x1xf32>
    %22 = tpu.reciprocal %21 {approx = true} : vector<8x1xf32> -> vector<8x1xf32>
    %23 = vector.broadcast %22 : vector<8x1xf32> to vector<8x8xf32>
    %24 = arith.mulf %19, %23 : vector<8x8xf32>
    %25 = arith.truncf %24 : vector<8x8xf32> to vector<8x8xbf16>
    %cst_11 = arith.constant dense<0.000000e+00> : vector<8x32xf32>
    %26 = tpu.matmul %25, %11, %cst_11 {dimension_numbers = #tpu.dot_dimension_numbers<[1], [0], [0], [1], [0, 0, 1, 1], [], []>} : vector<8x8xbf16>, vector<8x32xbf16>, vector<8x32xf32> -> vector<8x32xf32>
    %27 = vector.extract_strided_slice %2 {offsets = [0, 32], sizes = [8, 32], strides = [1, 1]} : vector<8x128xbf16> to vector<8x32xbf16>
    %28 = vector.extract_strided_slice %5 {offsets = [0, 32], sizes = [8, 32], strides = [1, 1]} : vector<8x128xbf16> to vector<8x32xbf16>
    %29 = vector.extract_strided_slice %8 {offsets = [0, 32], sizes = [8, 32], strides = [1, 1]} : vector<8x128xbf16> to vector<8x32xbf16>
    %cst_12 = arith.constant dense<0.000000e+00> : vector<8x8xf32>
    %30 = tpu.matmul %27, %28, %cst_12 {dimension_numbers = #tpu.dot_dimension_numbers<[1], [1], [0], [0], [0, 0, 1, 0], [], []>} : vector<8x32xbf16>, vector<8x32xbf16>, vector<8x8xf32> -> vector<8x8xf32>
    %cst_13 = arith.constant 0.176776692 : f32
    %31 = vector.broadcast %cst_13 : f32 to vector<8x8xf32>
    %32 = arith.mulf %30, %31 : vector<8x8xf32>
    %cst_14 = arith.constant dense<0xFF800000> : vector<8xf32>
    %33 = vector.multi_reduction <maximumf>, %32, %cst_14 [1] : vector<8x8xf32> to vector<8xf32>
    %34 = vector.shape_cast %33 : vector<8xf32> to vector<8x1xf32>
    %35 = vector.broadcast %34 : vector<8x1xf32> to vector<8x8xf32>
    %36 = arith.subf %32, %35 : vector<8x8xf32>
    %37 = math.exp %36 : vector<8x8xf32>
    %cst_15 = arith.constant dense<0.000000e+00> : vector<8xf32>
    %38 = vector.multi_reduction <add>, %37, %cst_15 [1] : vector<8x8xf32> to vector<8xf32>
    %39 = vector.shape_cast %38 : vector<8xf32> to vector<8x1xf32>
    %40 = tpu.reciprocal %39 {approx = true} : vector<8x1xf32> -> vector<8x1xf32>
    %41 = vector.broadcast %40 : vector<8x1xf32> to vector<8x8xf32>
    %42 = arith.mulf %37, %41 : vector<8x8xf32>
    %43 = arith.truncf %42 : vector<8x8xf32> to vector<8x8xbf16>
    %cst_16 = arith.constant dense<0.000000e+00> : vector<8x32xf32>
    %44 = tpu.matmul %43, %29, %cst_16 {dimension_numbers = #tpu.dot_dimension_numbers<[1], [0], [0], [1], [0, 0, 1, 1], [], []>} : vector<8x8xbf16>, vector<8x32xbf16>, vector<8x32xf32> -> vector<8x32xf32>
    %45 = vector.extract_strided_slice %2 {offsets = [0, 64], sizes = [8, 32], strides = [1, 1]} : vector<8x128xbf16> to vector<8x32xbf16>
    %46 = vector.extract_strided_slice %5 {offsets = [0, 64], sizes = [8, 32], strides = [1, 1]} : vector<8x128xbf16> to vector<8x32xbf16>
    %47 = vector.extract_strided_slice %8 {offsets = [0, 64], sizes = [8, 32], strides = [1, 1]} : vector<8x128xbf16> to vector<8x32xbf16>
    %cst_17 = arith.constant dense<0.000000e+00> : vector<8x8xf32>
    %48 = tpu.matmul %45, %46, %cst_17 {dimension_numbers = #tpu.dot_dimension_numbers<[1], [1], [0], [0], [0, 0, 1, 0], [], []>} : vector<8x32xbf16>, vector<8x32xbf16>, vector<8x8xf32> -> vector<8x8xf32>
    %cst_18 = arith.constant 0.176776692 : f32
    %49 = vector.broadcast %cst_18 : f32 to vector<8x8xf32>
    %50 = arith.mulf %48, %49 : vector<8x8xf32>
    %cst_19 = arith.constant dense<0xFF800000> : vector<8xf32>
    %51 = vector.multi_reduction <maximumf>, %50, %cst_19 [1] : vector<8x8xf32> to vector<8xf32>
    %52 = vector.shape_cast %51 : vector<8xf32> to vector<8x1xf32>
    %53 = vector.broadcast %52 : vector<8x1xf32> to vector<8x8xf32>
    %54 = arith.subf %50, %53 : vector<8x8xf32>
    %55 = math.exp %54 : vector<8x8xf32>
    %cst_20 = arith.constant dense<0.000000e+00> : vector<8xf32>
    %56 = vector.multi_reduction <add>, %55, %cst_20 [1] : vector<8x8xf32> to vector<8xf32>
    %57 = vector.shape_cast %56 : vector<8xf32> to vector<8x1xf32>
    %58 = tpu.reciprocal %57 {approx = true} : vector<8x1xf32> -> vector<8x1xf32>
    %59 = vector.broadcast %58 : vector<8x1xf32> to vector<8x8xf32>
    %60 = arith.mulf %55, %59 : vector<8x8xf32>
    %61 = arith.truncf %60 : vector<8x8xf32> to vector<8x8xbf16>
    %cst_21 = arith.constant dense<0.000000e+00> : vector<8x32xf32>
    %62 = tpu.matmul %61, %47, %cst_21 {dimension_numbers = #tpu.dot_dimension_numbers<[1], [0], [0], [1], [0, 0, 1, 1], [], []>} : vector<8x8xbf16>, vector<8x32xbf16>, vector<8x32xf32> -> vector<8x32xf32>
    %63 = vector.extract_strided_slice %2 {offsets = [0, 96], sizes = [8, 32], strides = [1, 1]} : vector<8x128xbf16> to vector<8x32xbf16>
    %64 = vector.extract_strided_slice %5 {offsets = [0, 96], sizes = [8, 32], strides = [1, 1]} : vector<8x128xbf16> to vector<8x32xbf16>
    %65 = vector.extract_strided_slice %8 {offsets = [0, 96], sizes = [8, 32], strides = [1, 1]} : vector<8x128xbf16> to vector<8x32xbf16>
    %cst_22 = arith.constant dense<0.000000e+00> : vector<8x8xf32>
    %66 = tpu.matmul %63, %64, %cst_22 {dimension_numbers = #tpu.dot_dimension_numbers<[1], [1], [0], [0], [0, 0, 1, 0], [], []>} : vector<8x32xbf16>, vector<8x32xbf16>, vector<8x8xf32> -> vector<8x8xf32>
    %cst_23 = arith.constant 0.176776692 : f32
    %67 = vector.broadcast %cst_23 : f32 to vector<8x8xf32>
    %68 = arith.mulf %66, %67 : vector<8x8xf32>
    %cst_24 = arith.constant dense<0xFF800000> : vector<8xf32>
    %69 = vector.multi_reduction <maximumf>, %68, %cst_24 [1] : vector<8x8xf32> to vector<8xf32>
    %70 = vector.shape_cast %69 : vector<8xf32> to vector<8x1xf32>
    %71 = vector.broadcast %70 : vector<8x1xf32> to vector<8x8xf32>
    %72 = arith.subf %68, %71 : vector<8x8xf32>
    %73 = math.exp %72 : vector<8x8xf32>
    %cst_25 = arith.constant dense<0.000000e+00> : vector<8xf32>
    %74 = vector.multi_reduction <add>, %73, %cst_25 [1] : vector<8x8xf32> to vector<8xf32>
    %75 = vector.shape_cast %74 : vector<8xf32> to vector<8x1xf32>
    %76 = tpu.reciprocal %75 {approx = true} : vector<8x1xf32> -> vector<8x1xf32>
    %77 = vector.broadcast %76 : vector<8x1xf32> to vector<8x8xf32>
    %78 = arith.mulf %73, %77 : vector<8x8xf32>
    %79 = arith.truncf %78 : vector<8x8xf32> to vector<8x8xbf16>
    %cst_26 = arith.constant dense<0.000000e+00> : vector<8x32xf32>
    %80 = tpu.matmul %79, %65, %cst_26 {dimension_numbers = #tpu.dot_dimension_numbers<[1], [0], [0], [1], [0, 0, 1, 1], [], []>} : vector<8x8xbf16>, vector<8x32xbf16>, vector<8x32xf32> -> vector<8x32xf32>
    %81 = tpu.concatenate %26, %44, %62, %80 in 1 : vector<8x32xf32>, vector<8x32xf32>, vector<8x32xf32>, vector<8x32xf32> -> vector<8x128xf32>
    %c0_27 = arith.constant 0 : index
    %c0_28 = arith.constant 0 : index
    %c0_29 = arith.constant 0 : index
    %82 = vector.load %arg4[%c0_27, %c0_28, %c0_29] : memref<1x8x128xf32, #tpu.memory_space<vmem>>, vector<1x8x128xf32>
    %83 = vector.shape_cast %82 : vector<1x8x128xf32> to vector<8x128xf32>
    %84 = vector.shape_cast %81 : vector<8x128xf32> to vector<1x8x128xf32>
    tpu.vector_store %arg4[%c0_27, %c0_28, %c0_29], %84 {strides = array<i32>} : memref<1x8x128xf32, #tpu.memory_space<vmem>>, vector<1x8x128xf32>,
    return
  }
  func.func @transform_0(%arg0: i32) -> (i32, i32, i32) {
    %c0_i32 = arith.constant 0 : i32
    %c0_i32_0 = arith.constant 0 : i32
    %c0_i32_1 = arith.constant 0 : i32
    return %arg0, %c0_i32, %c0_i32_0 : i32, i32, i32
  }
  func.func @transform_1(%arg0: i32) -> (i32, i32, i32) {
    %c0_i32 = arith.constant 0 : i32
    %c0_i32_0 = arith.constant 0 : i32
    %c0_i32_1 = arith.constant 0 : i32
    return %arg0, %c0_i32, %c0_i32_0 : i32, i32, i32
  }
  func.func @transform_2(%arg0: i32) -> (i32, i32, i32) {
    %c0_i32 = arith.constant 0 : i32
    %c0_i32_0 = arith.constant 0 : i32
    %c0_i32_1 = arith.constant 0 : i32
    return %arg0, %c0_i32, %c0_i32_0 : i32, i32, i32
  }
  func.func @transform_3(%arg0: i32) -> (i32, i32, i32) {
    %c0_i32 = arith.constant 0 : i32
    %c0_i32_0 = arith.constant 0 : i32
    %c0_i32_1 = arith.constant 0 : i32
    return %arg0, %c0_i32, %c0_i32_0 : i32, i32, i32
  }
}

module attributes {stable_mosaic.version = 11 : i64} {
  func.func @_mm_addln_kernel(%arg0: i32, %arg1: i32, %arg2: memref<16x256xf32, #tpu.memory_space<vmem>>, %arg3: memref<256x128xbf16, #tpu.memory_space<vmem>>, %arg4: memref<1x128xf32, #tpu.memory_space<vmem>>, %arg5: memref<16x128xf32, #tpu.memory_space<vmem>>, %arg6: memref<1x128xf32, #tpu.memory_space<vmem>>, %arg7: memref<1x128xf32, #tpu.memory_space<vmem>>, %arg8: memref<16x128xf32, #tpu.memory_space<vmem>>, %arg9: memref<16x128xf32, #tpu.memory_space<vmem>>) attributes {dimension_semantics = [#tpu.dimension_semantics<parallel>, #tpu.dimension_semantics<arbitrary>], iteration_bounds = array<i64: 1, 1>, scalar_prefetch = 0 : i64, scratch_operands = 1 : i64, tpu.core_type = #tpu.core_type<tc>, window_params = [{transform_indices = @transform_0, window_bounds = array<i64: 16, 256>}, {transform_indices = @transform_1, window_bounds = array<i64: 256, 128>}, {pipeline_mode = #tpu.pipeline_mode<synchronous>, transform_indices = @transform_2, window_bounds = array<i64: 1, 128>}, {transform_indices = @transform_3, window_bounds = array<i64: 16, 128>}, {pipeline_mode = #tpu.pipeline_mode<synchronous>, transform_indices = @transform_4, window_bounds = array<i64: 1, 128>}, {pipeline_mode = #tpu.pipeline_mode<synchronous>, transform_indices = @transform_5, window_bounds = array<i64: 1, 128>}, {transform_indices = @transform_6, window_bounds = array<i64: 16, 128>}]} {
    %c0_i32 = arith.constant 0 : i32
    %0 = arith.cmpi eq, %arg1, %c0_i32 : i32
    %1 = arith.extui %0 : i1 to i32
    %c0_i32_0 = arith.constant 0 : i32
    %2 = arith.cmpi ne, %1, %c0_i32_0 : i32
    scf.if %2 {
      %cst_10 = arith.constant 0.000000e+00 : f32
      %13 = vector.broadcast %cst_10 : f32 to vector<16x128xf32>
      %c0_11 = arith.constant 0 : index
      %c0_12 = arith.constant 0 : index
      %14 = vector.load %arg9[%c0_11, %c0_12] : memref<16x128xf32, #tpu.memory_space<vmem>>, vector<16x128xf32>
      tpu.vector_store %arg9[%c0_11, %c0_12], %13 {strides = array<i32>} : memref<16x128xf32, #tpu.memory_space<vmem>>, vector<16x128xf32>,
    } else {
    }
    %c0 = arith.constant 0 : index
    %c0_1 = arith.constant 0 : index
    %3 = vector.load %arg9[%c0, %c0_1] : memref<16x128xf32, #tpu.memory_space<vmem>>, vector<16x128xf32>
    %c0_2 = arith.constant 0 : index
    %c0_3 = arith.constant 0 : index
    %4 = vector.load %arg2[%c0_2, %c0_3] : memref<16x256xf32, #tpu.memory_space<vmem>>, vector<16x256xf32>
    %5 = arith.truncf %4 : vector<16x256xf32> to vector<16x256xbf16>
    %c0_4 = arith.constant 0 : index
    %c0_5 = arith.constant 0 : index
    %6 = vector.load %arg3[%c0_4, %c0_5] : memref<256x128xbf16, #tpu.memory_space<vmem>>, vector<256x128xbf16>
    %cst = arith.constant dense<0.000000e+00> : vector<16x128xf32>
    %7 = tpu.matmul %5, %6, %cst {dimension_numbers = #tpu.dot_dimension_numbers<[1], [0], [0], [1], [0, 0, 1, 1], [], []>} : vector<16x256xbf16>, vector<256x128xbf16>, vector<16x128xf32> -> vector<16x128xf32>
    %8 = arith.addf %3, %7 : vector<16x128xf32>
    %c0_6 = arith.constant 0 : index
    %c0_7 = arith.constant 0 : index
    %9 = vector.load %arg9[%c0_6, %c0_7] : memref<16x128xf32, #tpu.memory_space<vmem>>, vector<16x128xf32>
    tpu.vector_store %arg9[%c0_6, %c0_7], %8 {strides = array<i32>} : memref<16x128xf32, #tpu.memory_space<vmem>>, vector<16x128xf32>,
    %c0_i32_8 = arith.constant 0 : i32
    %10 = arith.cmpi eq, %arg1, %c0_i32_8 : i32
    %11 = arith.extui %10 : i1 to i32
    %c0_i32_9 = arith.constant 0 : i32
    %12 = arith.cmpi ne, %11, %c0_i32_9 : i32
    scf.if %12 {
      %c0_10 = arith.constant 0 : index
      %c0_11 = arith.constant 0 : index
      %13 = vector.load %arg9[%c0_10, %c0_11] : memref<16x128xf32, #tpu.memory_space<vmem>>, vector<16x128xf32>
      %c0_12 = arith.constant 0 : index
      %c0_13 = arith.constant 0 : index
      %14 = vector.load %arg4[%c0_12, %c0_13] : memref<1x128xf32, #tpu.memory_space<vmem>>, vector<1x128xf32>
      %15 = vector.broadcast %14 : vector<1x128xf32> to vector<16x128xf32>
      %16 = arith.addf %13, %15 : vector<16x128xf32>
      %c0_14 = arith.constant 0 : index
      %c0_15 = arith.constant 0 : index
      %17 = vector.load %arg5[%c0_14, %c0_15] : memref<16x128xf32, #tpu.memory_space<vmem>>, vector<16x128xf32>
      %18 = arith.addf %16, %17 : vector<16x128xf32>
      %cst_16 = arith.constant dense<0.000000e+00> : vector<16xf32>
      %19 = vector.multi_reduction <add>, %18, %cst_16 [1] : vector<16x128xf32> to vector<16xf32>
      %20 = vector.shape_cast %19 : vector<16xf32> to vector<16x1xf32>
      %cst_17 = arith.constant 1.280000e+02 : f32
      %21 = vector.broadcast %cst_17 : f32 to vector<16x1xf32>
      %22 = arith.divf %20, %21 : vector<16x1xf32>
      %23 = vector.broadcast %22 : vector<16x1xf32> to vector<16x128xf32>
      %24 = arith.subf %18, %23 : vector<16x128xf32>
      %25 = arith.mulf %24, %24 : vector<16x128xf32>
      %cst_18 = arith.constant dense<0.000000e+00> : vector<16xf32>
      %26 = vector.multi_reduction <add>, %25, %cst_18 [1] : vector<16x128xf32> to vector<16xf32>
      %27 = vector.shape_cast %26 : vector<16xf32> to vector<16x1xf32>
      %cst_19 = arith.constant 1.280000e+02 : f32
      %28 = vector.broadcast %cst_19 : f32 to vector<16x1xf32>
      %29 = arith.divf %27, %28 : vector<16x1xf32>
      %30 = vector.broadcast %22 : vector<16x1xf32> to vector<16x128xf32>
      %31 = arith.subf %18, %30 : vector<16x128xf32>
      %cst_20 = arith.constant 9.99999974E-6 : f32
      %32 = vector.broadcast %cst_20 : f32 to vector<16x1xf32>
      %33 = arith.addf %29, %32 : vector<16x1xf32>
      %34 = math.rsqrt %33 : vector<16x1xf32>
      %35 = vector.broadcast %34 : vector<16x1xf32> to vector<16x128xf32>
      %36 = arith.mulf %31, %35 : vector<16x128xf32>
      %c0_21 = arith.constant 0 : index
      %c0_22 = arith.constant 0 : index
      %37 = vector.load %arg6[%c0_21, %c0_22] : memref<1x128xf32, #tpu.memory_space<vmem>>, vector<1x128xf32>
      %38 = vector.broadcast %37 : vector<1x128xf32> to vector<16x128xf32>
      %39 = arith.mulf %36, %38 : vector<16x128xf32>
      %c0_23 = arith.constant 0 : index
      %c0_24 = arith.constant 0 : index
      %40 = vector.load %arg7[%c0_23, %c0_24] : memref<1x128xf32, #tpu.memory_space<vmem>>, vector<1x128xf32>
      %41 = vector.broadcast %40 : vector<1x128xf32> to vector<16x128xf32>
      %42 = arith.addf %39, %41 : vector<16x128xf32>
      %c0_25 = arith.constant 0 : index
      %c0_26 = arith.constant 0 : index
      %43 = vector.load %arg8[%c0_25, %c0_26] : memref<16x128xf32, #tpu.memory_space<vmem>>, vector<16x128xf32>
      tpu.vector_store %arg8[%c0_25, %c0_26], %42 {strides = array<i32>} : memref<16x128xf32, #tpu.memory_space<vmem>>, vector<16x128xf32>,
    } else {
    }
    return
  }
  func.func @transform_0(%arg0: i32, %arg1: i32) -> (i32, i32) {
    %c0_i32 = arith.constant 0 : i32
    return %arg0, %arg1 : i32, i32
  }
  func.func @transform_1(%arg0: i32, %arg1: i32) -> (i32, i32) {
    %c0_i32 = arith.constant 0 : i32
    %c0_i32_0 = arith.constant 0 : i32
    return %arg1, %c0_i32 : i32, i32
  }
  func.func @transform_2(%arg0: i32, %arg1: i32) -> (i32, i32) {
    %c0_i32 = arith.constant 0 : i32
    %c0_i32_0 = arith.constant 0 : i32
    %c0_i32_1 = arith.constant 0 : i32
    return %c0_i32, %c0_i32_0 : i32, i32
  }
  func.func @transform_3(%arg0: i32, %arg1: i32) -> (i32, i32) {
    %c0_i32 = arith.constant 0 : i32
    %c0_i32_0 = arith.constant 0 : i32
    return %arg0, %c0_i32 : i32, i32
  }
  func.func @transform_4(%arg0: i32, %arg1: i32) -> (i32, i32) {
    %c0_i32 = arith.constant 0 : i32
    %c0_i32_0 = arith.constant 0 : i32
    %c0_i32_1 = arith.constant 0 : i32
    return %c0_i32, %c0_i32_0 : i32, i32
  }
  func.func @transform_5(%arg0: i32, %arg1: i32) -> (i32, i32) {
    %c0_i32 = arith.constant 0 : i32
    %c0_i32_0 = arith.constant 0 : i32
    %c0_i32_1 = arith.constant 0 : i32
    return %c0_i32, %c0_i32_0 : i32, i32
  }
  func.func @transform_6(%arg0: i32, %arg1: i32) -> (i32, i32) {
    %c0_i32 = arith.constant 0 : i32
    %c0_i32_0 = arith.constant 0 : i32
    return %arg0, %c0_i32 : i32, i32
  }
}

module attributes {stable_mosaic.version = 11 : i64} {
  func.func @_mm_kernel(%arg0: i32, %arg1: i32, %arg2: i32, %arg3: memref<16x128xf32, #tpu.memory_space<vmem>>, %arg4: memref<128x256xbf16, #tpu.memory_space<vmem>>, %arg5: memref<1x256xf32, #tpu.memory_space<vmem>>, %arg6: memref<16x256xf32, #tpu.memory_space<vmem>>, %arg7: memref<16x256xf32, #tpu.memory_space<vmem>>) attributes {dimension_semantics = [#tpu.dimension_semantics<parallel>, #tpu.dimension_semantics<parallel>, #tpu.dimension_semantics<arbitrary>], iteration_bounds = array<i64: 1, 1, 1>, scalar_prefetch = 0 : i64, scratch_operands = 1 : i64, tpu.core_type = #tpu.core_type<tc>, window_params = [{transform_indices = @transform_0, window_bounds = array<i64: 16, 128>}, {transform_indices = @transform_1, window_bounds = array<i64: 128, 256>}, {transform_indices = @transform_2, window_bounds = array<i64: 1, 256>}, {transform_indices = @transform_3, window_bounds = array<i64: 16, 256>}]} {
    %c0_i32 = arith.constant 0 : i32
    %0 = arith.cmpi eq, %arg2, %c0_i32 : i32
    %1 = arith.extui %0 : i1 to i32
    %c0_i32_0 = arith.constant 0 : i32
    %2 = arith.cmpi ne, %1, %c0_i32_0 : i32
    scf.if %2 {
      %cst_10 = arith.constant 0.000000e+00 : f32
      %13 = vector.broadcast %cst_10 : f32 to vector<16x256xf32>
      %c0_11 = arith.constant 0 : index
      %c0_12 = arith.constant 0 : index
      %14 = vector.load %arg7[%c0_11, %c0_12] : memref<16x256xf32, #tpu.memory_space<vmem>>, vector<16x256xf32>
      tpu.vector_store %arg7[%c0_11, %c0_12], %13 {strides = array<i32>} : memref<16x256xf32, #tpu.memory_space<vmem>>, vector<16x256xf32>,
    } else {
    }
    %c0 = arith.constant 0 : index
    %c0_1 = arith.constant 0 : index
    %3 = vector.load %arg7[%c0, %c0_1] : memref<16x256xf32, #tpu.memory_space<vmem>>, vector<16x256xf32>
    %c0_2 = arith.constant 0 : index
    %c0_3 = arith.constant 0 : index
    %4 = vector.load %arg3[%c0_2, %c0_3] : memref<16x128xf32, #tpu.memory_space<vmem>>, vector<16x128xf32>
    %5 = arith.truncf %4 : vector<16x128xf32> to vector<16x128xbf16>
    %c0_4 = arith.constant 0 : index
    %c0_5 = arith.constant 0 : index
    %6 = vector.load %arg4[%c0_4, %c0_5] : memref<128x256xbf16, #tpu.memory_space<vmem>>, vector<128x256xbf16>
    %cst = arith.constant dense<0.000000e+00> : vector<16x256xf32>
    %7 = tpu.matmul %5, %6, %cst {dimension_numbers = #tpu.dot_dimension_numbers<[1], [0], [0], [1], [0, 0, 1, 1], [], []>} : vector<16x128xbf16>, vector<128x256xbf16>, vector<16x256xf32> -> vector<16x256xf32>
    %8 = arith.addf %3, %7 : vector<16x256xf32>
    %c0_6 = arith.constant 0 : index
    %c0_7 = arith.constant 0 : index
    %9 = vector.load %arg7[%c0_6, %c0_7] : memref<16x256xf32, #tpu.memory_space<vmem>>, vector<16x256xf32>
    tpu.vector_store %arg7[%c0_6, %c0_7], %8 {strides = array<i32>} : memref<16x256xf32, #tpu.memory_space<vmem>>, vector<16x256xf32>,
    %c0_i32_8 = arith.constant 0 : i32
    %10 = arith.cmpi eq, %arg2, %c0_i32_8 : i32
    %11 = arith.extui %10 : i1 to i32
    %c0_i32_9 = arith.constant 0 : i32
    %12 = arith.cmpi ne, %11, %c0_i32_9 : i32
    scf.if %12 {
      %c0_10 = arith.constant 0 : index
      %c0_11 = arith.constant 0 : index
      %13 = vector.load %arg7[%c0_10, %c0_11] : memref<16x256xf32, #tpu.memory_space<vmem>>, vector<16x256xf32>
      %c0_12 = arith.constant 0 : index
      %c0_13 = arith.constant 0 : index
      %14 = vector.load %arg5[%c0_12, %c0_13] : memref<1x256xf32, #tpu.memory_space<vmem>>, vector<1x256xf32>
      %15 = vector.broadcast %14 : vector<1x256xf32> to vector<16x256xf32>
      %16 = arith.addf %13, %15 : vector<16x256xf32>
      %cst_14 = arith.constant 0.000000e+00 : f32
      %17 = vector.broadcast %cst_14 : f32 to vector<16x256xf32>
      %18 = arith.maximumf %16, %17 : vector<16x256xf32>
      %c0_15 = arith.constant 0 : index
      %c0_16 = arith.constant 0 : index
      %19 = vector.load %arg6[%c0_15, %c0_16] : memref<16x256xf32, #tpu.memory_space<vmem>>, vector<16x256xf32>
      tpu.vector_store %arg6[%c0_15, %c0_16], %18 {strides = array<i32>} : memref<16x256xf32, #tpu.memory_space<vmem>>, vector<16x256xf32>,
    } else {
    }
    return
  }
  func.func @transform_0(%arg0: i32, %arg1: i32, %arg2: i32) -> (i32, i32) {
    %c0_i32 = arith.constant 0 : i32
    return %arg0, %arg2 : i32, i32
  }
  func.func @transform_1(%arg0: i32, %arg1: i32, %arg2: i32) -> (i32, i32) {
    %c0_i32 = arith.constant 0 : i32
    return %arg2, %arg1 : i32, i32
  }
  func.func @transform_2(%arg0: i32, %arg1: i32, %arg2: i32) -> (i32, i32) {
    %c0_i32 = arith.constant 0 : i32
    %c0_i32_0 = arith.constant 0 : i32
    return %c0_i32, %arg1 : i32, i32
  }
  func.func @transform_3(%arg0: i32, %arg1: i32, %arg2: i32) -> (i32, i32) {
    %c0_i32 = arith.constant 0 : i32
    return %arg0, %arg1 : i32, i32
  }
}

module attributes {stable_mosaic.version = 11 : i64} {
  func.func @_mm_kernel(%arg0: i32, %arg1: i32, %arg2: i32, %arg3: memref<16x128xf32, #tpu.memory_space<vmem>>, %arg4: memref<128x256xbf16, #tpu.memory_space<vmem>>, %arg5: memref<1x256xf32, #tpu.memory_space<vmem>>, %arg6: memref<16x256xf32, #tpu.memory_space<vmem>>, %arg7: memref<16x256xf32, #tpu.memory_space<vmem>>) attributes {dimension_semantics = [#tpu.dimension_semantics<parallel>, #tpu.dimension_semantics<parallel>, #tpu.dimension_semantics<arbitrary>], iteration_bounds = array<i64: 1, 1, 1>, scalar_prefetch = 0 : i64, scratch_operands = 1 : i64, tpu.core_type = #tpu.core_type<tc>, window_params = [{transform_indices = @transform_0, window_bounds = array<i64: 16, 128>}, {transform_indices = @transform_1, window_bounds = array<i64: 128, 256>}, {transform_indices = @transform_2, window_bounds = array<i64: 1, 256>}, {transform_indices = @transform_3, window_bounds = array<i64: 16, 256>}]} {
    %c0_i32 = arith.constant 0 : i32
    %0 = arith.cmpi eq, %arg2, %c0_i32 : i32
    %1 = arith.extui %0 : i1 to i32
    %c0_i32_0 = arith.constant 0 : i32
    %2 = arith.cmpi ne, %1, %c0_i32_0 : i32
    scf.if %2 {
      %cst_10 = arith.constant 0.000000e+00 : f32
      %13 = vector.broadcast %cst_10 : f32 to vector<16x256xf32>
      %c0_11 = arith.constant 0 : index
      %c0_12 = arith.constant 0 : index
      %14 = vector.load %arg7[%c0_11, %c0_12] : memref<16x256xf32, #tpu.memory_space<vmem>>, vector<16x256xf32>
      tpu.vector_store %arg7[%c0_11, %c0_12], %13 {strides = array<i32>} : memref<16x256xf32, #tpu.memory_space<vmem>>, vector<16x256xf32>,
    } else {
    }
    %c0 = arith.constant 0 : index
    %c0_1 = arith.constant 0 : index
    %3 = vector.load %arg7[%c0, %c0_1] : memref<16x256xf32, #tpu.memory_space<vmem>>, vector<16x256xf32>
    %c0_2 = arith.constant 0 : index
    %c0_3 = arith.constant 0 : index
    %4 = vector.load %arg3[%c0_2, %c0_3] : memref<16x128xf32, #tpu.memory_space<vmem>>, vector<16x128xf32>
    %5 = arith.truncf %4 : vector<16x128xf32> to vector<16x128xbf16>
    %c0_4 = arith.constant 0 : index
    %c0_5 = arith.constant 0 : index
    %6 = vector.load %arg4[%c0_4, %c0_5] : memref<128x256xbf16, #tpu.memory_space<vmem>>, vector<128x256xbf16>
    %cst = arith.constant dense<0.000000e+00> : vector<16x256xf32>
    %7 = tpu.matmul %5, %6, %cst {dimension_numbers = #tpu.dot_dimension_numbers<[1], [0], [0], [1], [0, 0, 1, 1], [], []>} : vector<16x128xbf16>, vector<128x256xbf16>, vector<16x256xf32> -> vector<16x256xf32>
    %8 = arith.addf %3, %7 : vector<16x256xf32>
    %c0_6 = arith.constant 0 : index
    %c0_7 = arith.constant 0 : index
    %9 = vector.load %arg7[%c0_6, %c0_7] : memref<16x256xf32, #tpu.memory_space<vmem>>, vector<16x256xf32>
    tpu.vector_store %arg7[%c0_6, %c0_7], %8 {strides = array<i32>} : memref<16x256xf32, #tpu.memory_space<vmem>>, vector<16x256xf32>,
    %c0_i32_8 = arith.constant 0 : i32
    %10 = arith.cmpi eq, %arg2, %c0_i32_8 : i32
    %11 = arith.extui %10 : i1 to i32
    %c0_i32_9 = arith.constant 0 : i32
    %12 = arith.cmpi ne, %11, %c0_i32_9 : i32
    scf.if %12 {
      %c0_10 = arith.constant 0 : index
      %c0_11 = arith.constant 0 : index
      %13 = vector.load %arg7[%c0_10, %c0_11] : memref<16x256xf32, #tpu.memory_space<vmem>>, vector<16x256xf32>
      %c0_12 = arith.constant 0 : index
      %c0_13 = arith.constant 0 : index
      %14 = vector.load %arg5[%c0_12, %c0_13] : memref<1x256xf32, #tpu.memory_space<vmem>>, vector<1x256xf32>
      %15 = vector.broadcast %14 : vector<1x256xf32> to vector<16x256xf32>
      %16 = arith.addf %13, %15 : vector<16x256xf32>
      %c0_14 = arith.constant 0 : index
      %c0_15 = arith.constant 0 : index
      %17 = vector.load %arg6[%c0_14, %c0_15] : memref<16x256xf32, #tpu.memory_space<vmem>>, vector<16x256xf32>
      tpu.vector_store %arg6[%c0_14, %c0_15], %16 {strides = array<i32>} : memref<16x256xf32, #tpu.memory_space<vmem>>, vector<16x256xf32>,
    } else {
    }
    return
  }
  func.func @transform_0(%arg0: i32, %arg1: i32, %arg2: i32) -> (i32, i32) {
    %c0_i32 = arith.constant 0 : i32
    return %arg0, %arg2 : i32, i32
  }
  func.func @transform_1(%arg0: i32, %arg1: i32, %arg2: i32) -> (i32, i32) {
    %c0_i32 = arith.constant 0 : i32
    return %arg2, %arg1 : i32, i32
  }
  func.func @transform_2(%arg0: i32, %arg1: i32, %arg2: i32) -> (i32, i32) {
    %c0_i32 = arith.constant 0 : i32
    %c0_i32_0 = arith.constant 0 : i32
    return %c0_i32, %arg1 : i32, i32
  }
  func.func @transform_3(%arg0: i32, %arg1: i32, %arg2: i32) -> (i32, i32) {
    %c0_i32 = arith.constant 0 : i32
    return %arg0, %arg1 : i32, i32
  }
}

module attributes {stable_mosaic.version = 11 : i64} {
  func.func @_mha_kernel(%arg0: i32, %arg1: memref<1x9x128xf32, #tpu.memory_space<vmem>>, %arg2: memref<1x8x128xf32, #tpu.memory_space<vmem>>, %arg3: memref<1x8x128xf32, #tpu.memory_space<vmem>>, %arg4: memref<1x9x128xf32, #tpu.memory_space<vmem>>) attributes {dimension_semantics = [#tpu.dimension_semantics<parallel>], iteration_bounds = array<i64: 2>, scalar_prefetch = 0 : i64, scratch_operands = 0 : i64, tpu.core_type = #tpu.core_type<tc>, window_params = [{transform_indices = @transform_0, window_bounds = array<i64: 1, 9, 128>}, {transform_indices = @transform_1, window_bounds = array<i64: 1, 8, 128>}, {transform_indices = @transform_2, window_bounds = array<i64: 1, 8, 128>}, {transform_indices = @transform_3, window_bounds = array<i64: 1, 9, 128>}]} {
    %c0 = arith.constant 0 : index
    %c0_0 = arith.constant 0 : index
    %c0_1 = arith.constant 0 : index
    %0 = vector.load %arg1[%c0, %c0_0, %c0_1] : memref<1x9x128xf32, #tpu.memory_space<vmem>>, vector<1x9x128xf32>
    %1 = vector.shape_cast %0 : vector<1x9x128xf32> to vector<9x128xf32>
    %2 = arith.truncf %1 : vector<9x128xf32> to vector<9x128xbf16>
    %c0_2 = arith.constant 0 : index
    %c0_3 = arith.constant 0 : index
    %c0_4 = arith.constant 0 : index
    %3 = vector.load %arg2[%c0_2, %c0_3, %c0_4] : memref<1x8x128xf32, #tpu.memory_space<vmem>>, vector<1x8x128xf32>
    %4 = vector.shape_cast %3 : vector<1x8x128xf32> to vector<8x128xf32>
    %5 = arith.truncf %4 : vector<8x128xf32> to vector<8x128xbf16>
    %c0_5 = arith.constant 0 : index
    %c0_6 = arith.constant 0 : index
    %c0_7 = arith.constant 0 : index
    %6 = vector.load %arg3[%c0_5, %c0_6, %c0_7] : memref<1x8x128xf32, #tpu.memory_space<vmem>>, vector<1x8x128xf32>
    %7 = vector.shape_cast %6 : vector<1x8x128xf32> to vector<8x128xf32>
    %8 = arith.truncf %7 : vector<8x128xf32> to vector<8x128xbf16>
    %9 = vector.extract_strided_slice %2 {offsets = [0, 0], sizes = [9, 32], strides = [1, 1]} : vector<9x128xbf16> to vector<9x32xbf16>
    %10 = vector.extract_strided_slice %5 {offsets = [0, 0], sizes = [8, 32], strides = [1, 1]} : vector<8x128xbf16> to vector<8x32xbf16>
    %11 = vector.extract_strided_slice %8 {offsets = [0, 0], sizes = [8, 32], strides = [1, 1]} : vector<8x128xbf16> to vector<8x32xbf16>
    %cst = arith.constant dense<0.000000e+00> : vector<9x8xf32>
    %12 = tpu.matmul %9, %10, %cst {dimension_numbers = #tpu.dot_dimension_numbers<[1], [1], [0], [0], [0, 0, 1, 0], [], []>} : vector<9x32xbf16>, vector<8x32xbf16>, vector<9x8xf32> -> vector<9x8xf32>
    %cst_8 = arith.constant 0.176776692 : f32
    %13 = vector.broadcast %cst_8 : f32 to vector<9x8xf32>
    %14 = arith.mulf %12, %13 : vector<9x8xf32>
    %cst_9 = arith.constant dense<0xFF800000> : vector<9xf32>
    %15 = vector.multi_reduction <maximumf>, %14, %cst_9 [1] : vector<9x8xf32> to vector<9xf32>
    %16 = vector.shape_cast %15 : vector<9xf32> to vector<9x1xf32>
    %17 = vector.broadcast %16 : vector<9x1xf32> to vector<9x8xf32>
    %18 = arith.subf %14, %17 : vector<9x8xf32>
    %19 = math.exp %18 : vector<9x8xf32>
    %cst_10 = arith.constant dense<0.000000e+00> : vector<9xf32>
    %20 = vector.multi_reduction <add>, %19, %cst_10 [1] : vector<9x8xf32> to vector<9xf32>
    %21 = vector.shape_cast %20 : vector<9xf32> to vector<9x1xf32>
    %22 = tpu.reciprocal %21 {approx = true} : vector<9x1xf32> -> vector<9x1xf32>
    %23 = vector.broadcast %22 : vector<9x1xf32> to vector<9x8xf32>
    %24 = arith.mulf %19, %23 : vector<9x8xf32>
    %25 = arith.truncf %24 : vector<9x8xf32> to vector<9x8xbf16>
    %cst_11 = arith.constant dense<0.000000e+00> : vector<9x32xf32>
    %26 = tpu.matmul %25, %11, %cst_11 {dimension_numbers = #tpu.dot_dimension_numbers<[1], [0], [0], [1], [0, 0, 1, 1], [], []>} : vector<9x8xbf16>, vector<8x32xbf16>, vector<9x32xf32> -> vector<9x32xf32>
    %27 = vector.extract_strided_slice %2 {offsets = [0, 32], sizes = [9, 32], strides = [1, 1]} : vector<9x128xbf16> to vector<9x32xbf16>
    %28 = vector.extract_strided_slice %5 {offsets = [0, 32], sizes = [8, 32], strides = [1, 1]} : vector<8x128xbf16> to vector<8x32xbf16>
    %29 = vector.extract_strided_slice %8 {offsets = [0, 32], sizes = [8, 32], strides = [1, 1]} : vector<8x128xbf16> to vector<8x32xbf16>
    %cst_12 = arith.constant dense<0.000000e+00> : vector<9x8xf32>
    %30 = tpu.matmul %27, %28, %cst_12 {dimension_numbers = #tpu.dot_dimension_numbers<[1], [1], [0], [0], [0, 0, 1, 0], [], []>} : vector<9x32xbf16>, vector<8x32xbf16>, vector<9x8xf32> -> vector<9x8xf32>
    %cst_13 = arith.constant 0.176776692 : f32
    %31 = vector.broadcast %cst_13 : f32 to vector<9x8xf32>
    %32 = arith.mulf %30, %31 : vector<9x8xf32>
    %cst_14 = arith.constant dense<0xFF800000> : vector<9xf32>
    %33 = vector.multi_reduction <maximumf>, %32, %cst_14 [1] : vector<9x8xf32> to vector<9xf32>
    %34 = vector.shape_cast %33 : vector<9xf32> to vector<9x1xf32>
    %35 = vector.broadcast %34 : vector<9x1xf32> to vector<9x8xf32>
    %36 = arith.subf %32, %35 : vector<9x8xf32>
    %37 = math.exp %36 : vector<9x8xf32>
    %cst_15 = arith.constant dense<0.000000e+00> : vector<9xf32>
    %38 = vector.multi_reduction <add>, %37, %cst_15 [1] : vector<9x8xf32> to vector<9xf32>
    %39 = vector.shape_cast %38 : vector<9xf32> to vector<9x1xf32>
    %40 = tpu.reciprocal %39 {approx = true} : vector<9x1xf32> -> vector<9x1xf32>
    %41 = vector.broadcast %40 : vector<9x1xf32> to vector<9x8xf32>
    %42 = arith.mulf %37, %41 : vector<9x8xf32>
    %43 = arith.truncf %42 : vector<9x8xf32> to vector<9x8xbf16>
    %cst_16 = arith.constant dense<0.000000e+00> : vector<9x32xf32>
    %44 = tpu.matmul %43, %29, %cst_16 {dimension_numbers = #tpu.dot_dimension_numbers<[1], [0], [0], [1], [0, 0, 1, 1], [], []>} : vector<9x8xbf16>, vector<8x32xbf16>, vector<9x32xf32> -> vector<9x32xf32>
    %45 = vector.extract_strided_slice %2 {offsets = [0, 64], sizes = [9, 32], strides = [1, 1]} : vector<9x128xbf16> to vector<9x32xbf16>
    %46 = vector.extract_strided_slice %5 {offsets = [0, 64], sizes = [8, 32], strides = [1, 1]} : vector<8x128xbf16> to vector<8x32xbf16>
    %47 = vector.extract_strided_slice %8 {offsets = [0, 64], sizes = [8, 32], strides = [1, 1]} : vector<8x128xbf16> to vector<8x32xbf16>
    %cst_17 = arith.constant dense<0.000000e+00> : vector<9x8xf32>
    %48 = tpu.matmul %45, %46, %cst_17 {dimension_numbers = #tpu.dot_dimension_numbers<[1], [1], [0], [0], [0, 0, 1, 0], [], []>} : vector<9x32xbf16>, vector<8x32xbf16>, vector<9x8xf32> -> vector<9x8xf32>
    %cst_18 = arith.constant 0.176776692 : f32
    %49 = vector.broadcast %cst_18 : f32 to vector<9x8xf32>
    %50 = arith.mulf %48, %49 : vector<9x8xf32>
    %cst_19 = arith.constant dense<0xFF800000> : vector<9xf32>
    %51 = vector.multi_reduction <maximumf>, %50, %cst_19 [1] : vector<9x8xf32> to vector<9xf32>
    %52 = vector.shape_cast %51 : vector<9xf32> to vector<9x1xf32>
    %53 = vector.broadcast %52 : vector<9x1xf32> to vector<9x8xf32>
    %54 = arith.subf %50, %53 : vector<9x8xf32>
    %55 = math.exp %54 : vector<9x8xf32>
    %cst_20 = arith.constant dense<0.000000e+00> : vector<9xf32>
    %56 = vector.multi_reduction <add>, %55, %cst_20 [1] : vector<9x8xf32> to vector<9xf32>
    %57 = vector.shape_cast %56 : vector<9xf32> to vector<9x1xf32>
    %58 = tpu.reciprocal %57 {approx = true} : vector<9x1xf32> -> vector<9x1xf32>
    %59 = vector.broadcast %58 : vector<9x1xf32> to vector<9x8xf32>
    %60 = arith.mulf %55, %59 : vector<9x8xf32>
    %61 = arith.truncf %60 : vector<9x8xf32> to vector<9x8xbf16>
    %cst_21 = arith.constant dense<0.000000e+00> : vector<9x32xf32>
    %62 = tpu.matmul %61, %47, %cst_21 {dimension_numbers = #tpu.dot_dimension_numbers<[1], [0], [0], [1], [0, 0, 1, 1], [], []>} : vector<9x8xbf16>, vector<8x32xbf16>, vector<9x32xf32> -> vector<9x32xf32>
    %63 = vector.extract_strided_slice %2 {offsets = [0, 96], sizes = [9, 32], strides = [1, 1]} : vector<9x128xbf16> to vector<9x32xbf16>
    %64 = vector.extract_strided_slice %5 {offsets = [0, 96], sizes = [8, 32], strides = [1, 1]} : vector<8x128xbf16> to vector<8x32xbf16>
    %65 = vector.extract_strided_slice %8 {offsets = [0, 96], sizes = [8, 32], strides = [1, 1]} : vector<8x128xbf16> to vector<8x32xbf16>
    %cst_22 = arith.constant dense<0.000000e+00> : vector<9x8xf32>
    %66 = tpu.matmul %63, %64, %cst_22 {dimension_numbers = #tpu.dot_dimension_numbers<[1], [1], [0], [0], [0, 0, 1, 0], [], []>} : vector<9x32xbf16>, vector<8x32xbf16>, vector<9x8xf32> -> vector<9x8xf32>
    %cst_23 = arith.constant 0.176776692 : f32
    %67 = vector.broadcast %cst_23 : f32 to vector<9x8xf32>
    %68 = arith.mulf %66, %67 : vector<9x8xf32>
    %cst_24 = arith.constant dense<0xFF800000> : vector<9xf32>
    %69 = vector.multi_reduction <maximumf>, %68, %cst_24 [1] : vector<9x8xf32> to vector<9xf32>
    %70 = vector.shape_cast %69 : vector<9xf32> to vector<9x1xf32>
    %71 = vector.broadcast %70 : vector<9x1xf32> to vector<9x8xf32>
    %72 = arith.subf %68, %71 : vector<9x8xf32>
    %73 = math.exp %72 : vector<9x8xf32>
    %cst_25 = arith.constant dense<0.000000e+00> : vector<9xf32>
    %74 = vector.multi_reduction <add>, %73, %cst_25 [1] : vector<9x8xf32> to vector<9xf32>
    %75 = vector.shape_cast %74 : vector<9xf32> to vector<9x1xf32>
    %76 = tpu.reciprocal %75 {approx = true} : vector<9x1xf32> -> vector<9x1xf32>
    %77 = vector.broadcast %76 : vector<9x1xf32> to vector<9x8xf32>
    %78 = arith.mulf %73, %77 : vector<9x8xf32>
    %79 = arith.truncf %78 : vector<9x8xf32> to vector<9x8xbf16>
    %cst_26 = arith.constant dense<0.000000e+00> : vector<9x32xf32>
    %80 = tpu.matmul %79, %65, %cst_26 {dimension_numbers = #tpu.dot_dimension_numbers<[1], [0], [0], [1], [0, 0, 1, 1], [], []>} : vector<9x8xbf16>, vector<8x32xbf16>, vector<9x32xf32> -> vector<9x32xf32>
    %81 = tpu.concatenate %26, %44, %62, %80 in 1 : vector<9x32xf32>, vector<9x32xf32>, vector<9x32xf32>, vector<9x32xf32> -> vector<9x128xf32>
    %c0_27 = arith.constant 0 : index
    %c0_28 = arith.constant 0 : index
    %c0_29 = arith.constant 0 : index
    %82 = vector.load %arg4[%c0_27, %c0_28, %c0_29] : memref<1x9x128xf32, #tpu.memory_space<vmem>>, vector<1x9x128xf32>
    %83 = vector.shape_cast %82 : vector<1x9x128xf32> to vector<9x128xf32>
    %84 = vector.shape_cast %81 : vector<9x128xf32> to vector<1x9x128xf32>
    tpu.vector_store %arg4[%c0_27, %c0_28, %c0_29], %84 {strides = array<i32>} : memref<1x9x128xf32, #tpu.memory_space<vmem>>, vector<1x9x128xf32>,
    return
  }
  func.func @transform_0(%arg0: i32) -> (i32, i32, i32) {
    %c0_i32 = arith.constant 0 : i32
    %c0_i32_0 = arith.constant 0 : i32
    %c0_i32_1 = arith.constant 0 : i32
    return %arg0, %c0_i32, %c0_i32_0 : i32, i32, i32
  }
  func.func @transform_1(%arg0: i32) -> (i32, i32, i32) {
    %c0_i32 = arith.constant 0 : i32
    %c0_i32_0 = arith.constant 0 : i32
    %c0_i32_1 = arith.constant 0 : i32
    return %arg0, %c0_i32, %c0_i32_0 : i32, i32, i32
  }
  func.func @transform_2(%arg0: i32) -> (i32, i32, i32) {
    %c0_i32 = arith.constant 0 : i32
    %c0_i32_0 = arith.constant 0 : i32
    %c0_i32_1 = arith.constant 0 : i32
    return %arg0, %c0_i32, %c0_i32_0 : i32, i32, i32
  }
  func.func @transform_3(%arg0: i32) -> (i32, i32, i32) {
    %c0_i32 = arith.constant 0 : i32
    %c0_i32_0 = arith.constant 0 : i32
    %c0_i32_1 = arith.constant 0 : i32
    return %arg0, %c0_i32, %c0_i32_0 : i32, i32, i32
  }
}

module attributes {stable_mosaic.version = 11 : i64} {
  func.func @_mm_kernel(%arg0: i32, %arg1: i32, %arg2: i32, %arg3: memref<24x128xf32, #tpu.memory_space<vmem>>, %arg4: memref<128x256xbf16, #tpu.memory_space<vmem>>, %arg5: memref<1x256xf32, #tpu.memory_space<vmem>>, %arg6: memref<24x256xf32, #tpu.memory_space<vmem>>, %arg7: memref<24x256xf32, #tpu.memory_space<vmem>>) attributes {dimension_semantics = [#tpu.dimension_semantics<parallel>, #tpu.dimension_semantics<parallel>, #tpu.dimension_semantics<arbitrary>], iteration_bounds = array<i64: 1, 1, 1>, scalar_prefetch = 0 : i64, scratch_operands = 1 : i64, tpu.core_type = #tpu.core_type<tc>, window_params = [{transform_indices = @transform_0, window_bounds = array<i64: 24, 128>}, {transform_indices = @transform_1, window_bounds = array<i64: 128, 256>}, {transform_indices = @transform_2, window_bounds = array<i64: 1, 256>}, {transform_indices = @transform_3, window_bounds = array<i64: 24, 256>}]} {
    %c0_i32 = arith.constant 0 : i32
    %0 = arith.cmpi eq, %arg2, %c0_i32 : i32
    %1 = arith.extui %0 : i1 to i32
    %c0_i32_0 = arith.constant 0 : i32
    %2 = arith.cmpi ne, %1, %c0_i32_0 : i32
    scf.if %2 {
      %cst_10 = arith.constant 0.000000e+00 : f32
      %13 = vector.broadcast %cst_10 : f32 to vector<24x256xf32>
      %c0_11 = arith.constant 0 : index
      %c0_12 = arith.constant 0 : index
      %14 = vector.load %arg7[%c0_11, %c0_12] : memref<24x256xf32, #tpu.memory_space<vmem>>, vector<24x256xf32>
      tpu.vector_store %arg7[%c0_11, %c0_12], %13 {strides = array<i32>} : memref<24x256xf32, #tpu.memory_space<vmem>>, vector<24x256xf32>,
    } else {
    }
    %c0 = arith.constant 0 : index
    %c0_1 = arith.constant 0 : index
    %3 = vector.load %arg7[%c0, %c0_1] : memref<24x256xf32, #tpu.memory_space<vmem>>, vector<24x256xf32>
    %c0_2 = arith.constant 0 : index
    %c0_3 = arith.constant 0 : index
    %4 = vector.load %arg3[%c0_2, %c0_3] : memref<24x128xf32, #tpu.memory_space<vmem>>, vector<24x128xf32>
    %5 = arith.truncf %4 : vector<24x128xf32> to vector<24x128xbf16>
    %c0_4 = arith.constant 0 : index
    %c0_5 = arith.constant 0 : index
    %6 = vector.load %arg4[%c0_4, %c0_5] : memref<128x256xbf16, #tpu.memory_space<vmem>>, vector<128x256xbf16>
    %cst = arith.constant dense<0.000000e+00> : vector<24x256xf32>
    %7 = tpu.matmul %5, %6, %cst {dimension_numbers = #tpu.dot_dimension_numbers<[1], [0], [0], [1], [0, 0, 1, 1], [], []>} : vector<24x128xbf16>, vector<128x256xbf16>, vector<24x256xf32> -> vector<24x256xf32>
    %8 = arith.addf %3, %7 : vector<24x256xf32>
    %c0_6 = arith.constant 0 : index
    %c0_7 = arith.constant 0 : index
    %9 = vector.load %arg7[%c0_6, %c0_7] : memref<24x256xf32, #tpu.memory_space<vmem>>, vector<24x256xf32>
    tpu.vector_store %arg7[%c0_6, %c0_7], %8 {strides = array<i32>} : memref<24x256xf32, #tpu.memory_space<vmem>>, vector<24x256xf32>,
    %c0_i32_8 = arith.constant 0 : i32
    %10 = arith.cmpi eq, %arg2, %c0_i32_8 : i32
    %11 = arith.extui %10 : i1 to i32
    %c0_i32_9 = arith.constant 0 : i32
    %12 = arith.cmpi ne, %11, %c0_i32_9 : i32
    scf.if %12 {
      %c0_10 = arith.constant 0 : index
      %c0_11 = arith.constant 0 : index
      %13 = vector.load %arg7[%c0_10, %c0_11] : memref<24x256xf32, #tpu.memory_space<vmem>>, vector<24x256xf32>
      %c0_12 = arith.constant 0 : index
      %c0_13 = arith.constant 0 : index
      %14 = vector.load %arg5[%c0_12, %c0_13] : memref<1x256xf32, #tpu.memory_space<vmem>>, vector<1x256xf32>
      %15 = vector.broadcast %14 : vector<1x256xf32> to vector<24x256xf32>
      %16 = arith.addf %13, %15 : vector<24x256xf32>
      %cst_14 = arith.constant 0.000000e+00 : f32
      %17 = vector.broadcast %cst_14 : f32 to vector<24x256xf32>
      %18 = arith.maximumf %16, %17 : vector<24x256xf32>
      %c0_15 = arith.constant 0 : index
      %c0_16 = arith.constant 0 : index
      %19 = vector.load %arg6[%c0_15, %c0_16] : memref<24x256xf32, #tpu.memory_space<vmem>>, vector<24x256xf32>
      tpu.vector_store %arg6[%c0_15, %c0_16], %18 {strides = array<i32>} : memref<24x256xf32, #tpu.memory_space<vmem>>, vector<24x256xf32>,
    } else {
    }
    return
  }
  func.func @transform_0(%arg0: i32, %arg1: i32, %arg2: i32) -> (i32, i32) {
    %c0_i32 = arith.constant 0 : i32
    return %arg0, %arg2 : i32, i32
  }
  func.func @transform_1(%arg0: i32, %arg1: i32, %arg2: i32) -> (i32, i32) {
    %c0_i32 = arith.constant 0 : i32
    return %arg2, %arg1 : i32, i32
  }
  func.func @transform_2(%arg0: i32, %arg1: i32, %arg2: i32) -> (i32, i32) {
    %c0_i32 = arith.constant 0 : i32
    %c0_i32_0 = arith.constant 0 : i32
    return %c0_i32, %arg1 : i32, i32
  }
  func.func @transform_3(%arg0: i32, %arg1: i32, %arg2: i32) -> (i32, i32) {
    %c0_i32 = arith.constant 0 : i32
    return %arg0, %arg1 : i32, i32
  }
}

module attributes {stable_mosaic.version = 11 : i64} {
  func.func @_mm_addln_kernel(%arg0: i32, %arg1: i32, %arg2: memref<24x256xf32, #tpu.memory_space<vmem>>, %arg3: memref<256x128xbf16, #tpu.memory_space<vmem>>, %arg4: memref<1x128xf32, #tpu.memory_space<vmem>>, %arg5: memref<24x128xf32, #tpu.memory_space<vmem>>, %arg6: memref<1x128xf32, #tpu.memory_space<vmem>>, %arg7: memref<1x128xf32, #tpu.memory_space<vmem>>, %arg8: memref<24x128xf32, #tpu.memory_space<vmem>>, %arg9: memref<24x128xf32, #tpu.memory_space<vmem>>) attributes {dimension_semantics = [#tpu.dimension_semantics<parallel>, #tpu.dimension_semantics<arbitrary>], iteration_bounds = array<i64: 1, 1>, scalar_prefetch = 0 : i64, scratch_operands = 1 : i64, tpu.core_type = #tpu.core_type<tc>, window_params = [{transform_indices = @transform_0, window_bounds = array<i64: 24, 256>}, {transform_indices = @transform_1, window_bounds = array<i64: 256, 128>}, {pipeline_mode = #tpu.pipeline_mode<synchronous>, transform_indices = @transform_2, window_bounds = array<i64: 1, 128>}, {transform_indices = @transform_3, window_bounds = array<i64: 24, 128>}, {pipeline_mode = #tpu.pipeline_mode<synchronous>, transform_indices = @transform_4, window_bounds = array<i64: 1, 128>}, {pipeline_mode = #tpu.pipeline_mode<synchronous>, transform_indices = @transform_5, window_bounds = array<i64: 1, 128>}, {transform_indices = @transform_6, window_bounds = array<i64: 24, 128>}]} {
    %c0_i32 = arith.constant 0 : i32
    %0 = arith.cmpi eq, %arg1, %c0_i32 : i32
    %1 = arith.extui %0 : i1 to i32
    %c0_i32_0 = arith.constant 0 : i32
    %2 = arith.cmpi ne, %1, %c0_i32_0 : i32
    scf.if %2 {
      %cst_10 = arith.constant 0.000000e+00 : f32
      %13 = vector.broadcast %cst_10 : f32 to vector<24x128xf32>
      %c0_11 = arith.constant 0 : index
      %c0_12 = arith.constant 0 : index
      %14 = vector.load %arg9[%c0_11, %c0_12] : memref<24x128xf32, #tpu.memory_space<vmem>>, vector<24x128xf32>
      tpu.vector_store %arg9[%c0_11, %c0_12], %13 {strides = array<i32>} : memref<24x128xf32, #tpu.memory_space<vmem>>, vector<24x128xf32>,
    } else {
    }
    %c0 = arith.constant 0 : index
    %c0_1 = arith.constant 0 : index
    %3 = vector.load %arg9[%c0, %c0_1] : memref<24x128xf32, #tpu.memory_space<vmem>>, vector<24x128xf32>
    %c0_2 = arith.constant 0 : index
    %c0_3 = arith.constant 0 : index
    %4 = vector.load %arg2[%c0_2, %c0_3] : memref<24x256xf32, #tpu.memory_space<vmem>>, vector<24x256xf32>
    %5 = arith.truncf %4 : vector<24x256xf32> to vector<24x256xbf16>
    %c0_4 = arith.constant 0 : index
    %c0_5 = arith.constant 0 : index
    %6 = vector.load %arg3[%c0_4, %c0_5] : memref<256x128xbf16, #tpu.memory_space<vmem>>, vector<256x128xbf16>
    %cst = arith.constant dense<0.000000e+00> : vector<24x128xf32>
    %7 = tpu.matmul %5, %6, %cst {dimension_numbers = #tpu.dot_dimension_numbers<[1], [0], [0], [1], [0, 0, 1, 1], [], []>} : vector<24x256xbf16>, vector<256x128xbf16>, vector<24x128xf32> -> vector<24x128xf32>
    %8 = arith.addf %3, %7 : vector<24x128xf32>
    %c0_6 = arith.constant 0 : index
    %c0_7 = arith.constant 0 : index
    %9 = vector.load %arg9[%c0_6, %c0_7] : memref<24x128xf32, #tpu.memory_space<vmem>>, vector<24x128xf32>
    tpu.vector_store %arg9[%c0_6, %c0_7], %8 {strides = array<i32>} : memref<24x128xf32, #tpu.memory_space<vmem>>, vector<24x128xf32>,
    %c0_i32_8 = arith.constant 0 : i32
    %10 = arith.cmpi eq, %arg1, %c0_i32_8 : i32
    %11 = arith.extui %10 : i1 to i32
    %c0_i32_9 = arith.constant 0 : i32
    %12 = arith.cmpi ne, %11, %c0_i32_9 : i32
    scf.if %12 {
      %c0_10 = arith.constant 0 : index
      %c0_11 = arith.constant 0 : index
      %13 = vector.load %arg9[%c0_10, %c0_11] : memref<24x128xf32, #tpu.memory_space<vmem>>, vector<24x128xf32>
      %c0_12 = arith.constant 0 : index
      %c0_13 = arith.constant 0 : index
      %14 = vector.load %arg4[%c0_12, %c0_13] : memref<1x128xf32, #tpu.memory_space<vmem>>, vector<1x128xf32>
      %15 = vector.broadcast %14 : vector<1x128xf32> to vector<24x128xf32>
      %16 = arith.addf %13, %15 : vector<24x128xf32>
      %c0_14 = arith.constant 0 : index
      %c0_15 = arith.constant 0 : index
      %17 = vector.load %arg5[%c0_14, %c0_15] : memref<24x128xf32, #tpu.memory_space<vmem>>, vector<24x128xf32>
      %18 = arith.addf %16, %17 : vector<24x128xf32>
      %cst_16 = arith.constant dense<0.000000e+00> : vector<24xf32>
      %19 = vector.multi_reduction <add>, %18, %cst_16 [1] : vector<24x128xf32> to vector<24xf32>
      %20 = vector.shape_cast %19 : vector<24xf32> to vector<24x1xf32>
      %cst_17 = arith.constant 1.280000e+02 : f32
      %21 = vector.broadcast %cst_17 : f32 to vector<24x1xf32>
      %22 = arith.divf %20, %21 : vector<24x1xf32>
      %23 = vector.broadcast %22 : vector<24x1xf32> to vector<24x128xf32>
      %24 = arith.subf %18, %23 : vector<24x128xf32>
      %25 = arith.mulf %24, %24 : vector<24x128xf32>
      %cst_18 = arith.constant dense<0.000000e+00> : vector<24xf32>
      %26 = vector.multi_reduction <add>, %25, %cst_18 [1] : vector<24x128xf32> to vector<24xf32>
      %27 = vector.shape_cast %26 : vector<24xf32> to vector<24x1xf32>
      %cst_19 = arith.constant 1.280000e+02 : f32
      %28 = vector.broadcast %cst_19 : f32 to vector<24x1xf32>
      %29 = arith.divf %27, %28 : vector<24x1xf32>
      %30 = vector.broadcast %22 : vector<24x1xf32> to vector<24x128xf32>
      %31 = arith.subf %18, %30 : vector<24x128xf32>
      %cst_20 = arith.constant 9.99999974E-6 : f32
      %32 = vector.broadcast %cst_20 : f32 to vector<24x1xf32>
      %33 = arith.addf %29, %32 : vector<24x1xf32>
      %34 = math.rsqrt %33 : vector<24x1xf32>
      %35 = vector.broadcast %34 : vector<24x1xf32> to vector<24x128xf32>
      %36 = arith.mulf %31, %35 : vector<24x128xf32>
      %c0_21 = arith.constant 0 : index
      %c0_22 = arith.constant 0 : index
      %37 = vector.load %arg6[%c0_21, %c0_22] : memref<1x128xf32, #tpu.memory_space<vmem>>, vector<1x128xf32>
      %38 = vector.broadcast %37 : vector<1x128xf32> to vector<24x128xf32>
      %39 = arith.mulf %36, %38 : vector<24x128xf32>
      %c0_23 = arith.constant 0 : index
      %c0_24 = arith.constant 0 : index
      %40 = vector.load %arg7[%c0_23, %c0_24] : memref<1x128xf32, #tpu.memory_space<vmem>>, vector<1x128xf32>
      %41 = vector.broadcast %40 : vector<1x128xf32> to vector<24x128xf32>
      %42 = arith.addf %39, %41 : vector<24x128xf32>
      %c0_25 = arith.constant 0 : index
      %c0_26 = arith.constant 0 : index
      %43 = vector.load %arg8[%c0_25, %c0_26] : memref<24x128xf32, #tpu.memory_space<vmem>>, vector<24x128xf32>
      tpu.vector_store %arg8[%c0_25, %c0_26], %42 {strides = array<i32>} : memref<24x128xf32, #tpu.memory_space<vmem>>, vector<24x128xf32>,
    } else {
    }
    return
  }
  func.func @transform_0(%arg0: i32, %arg1: i32) -> (i32, i32) {
    %c0_i32 = arith.constant 0 : i32
    return %arg0, %arg1 : i32, i32
  }
  func.func @transform_1(%arg0: i32, %arg1: i32) -> (i32, i32) {
    %c0_i32 = arith.constant 0 : i32
    %c0_i32_0 = arith.constant 0 : i32
    return %arg1, %c0_i32 : i32, i32
  }
  func.func @transform_2(%arg0: i32, %arg1: i32) -> (i32, i32) {
    %c0_i32 = arith.constant 0 : i32
    %c0_i32_0 = arith.constant 0 : i32
    %c0_i32_1 = arith.constant 0 : i32
    return %c0_i32, %c0_i32_0 : i32, i32
  }
  func.func @transform_3(%arg0: i32, %arg1: i32) -> (i32, i32) {
    %c0_i32 = arith.constant 0 : i32
    %c0_i32_0 = arith.constant 0 : i32
    return %arg0, %c0_i32 : i32, i32
  }
  func.func @transform_4(%arg0: i32, %arg1: i32) -> (i32, i32) {
    %c0_i32 = arith.constant 0 : i32
    %c0_i32_0 = arith.constant 0 : i32
    %c0_i32_1 = arith.constant 0 : i32
    return %c0_i32, %c0_i32_0 : i32, i32
  }
  func.func @transform_5(%arg0: i32, %arg1: i32) -> (i32, i32) {
    %c0_i32 = arith.constant 0 : i32
    %c0_i32_0 = arith.constant 0 : i32
    %c0_i32_1 = arith.constant 0 : i32
    return %c0_i32, %c0_i32_0 : i32, i32
  }
  func.func @transform_6(%arg0: i32, %arg1: i32) -> (i32, i32) {
    %c0_i32 = arith.constant 0 : i32
    %c0_i32_0 = arith.constant 0 : i32
    return %arg0, %c0_i32 : i32, i32
  }
}

</mosaic_0001>

<bundles_post_ra>
// kernel: _lambda_.39
= control target key start
LH: loop header
LB: loop body
LE: loop exit
PB: predicated region body
PF: predicated region fallthrough
CT: control target
= control target key end

     0   :  { %s805_s12 = smov 0   ;;  %s807_s13 = smov 0   ;;  %s913_s0 = inlined_call_operand.vmem [shape: f32[24,128], index: 0, kind: input, shape index: {}]   ;;  %s914_s1 = inlined_call_operand.vmem [shape: bf16[128,384], index: 1, kind: input, shape index: {}]   ;;  %s915_s2 = inlined_call_operand.vmem [shape: f32[1,384], index: 2, kind: input, shape index: {}]   ;;  %s916_s3 = inlined_call_operand.vmem [shape: f32[24,384], index: 3, kind: output, shape index: {}]  }
   0x1   :  { %s809_s14 = smov 0   ;;  %s811_s15 = smov 0  }
   0x2   :  { %s813_s16 = smov 0  }
   0x3 LB: > { %s28_s17 = sadd.s32 1, %s779_s15  ;;  %s645_s18 = sadd.s32 4294967295, %s783_s16   ;;  %s783_s16 = sphi %s813_s16, %s13_s16   ;;  %s779_s15 = sphi %s811_s15, %s921_s15   ;;  %s775_s14 = sphi %s809_s14, %s920_s14   ;;  %s771_s13 = sphi %s807_s13, %s919_s13   ;;  %s767_s12 = sphi %s805_s12, %s918_s12  }
   0x4   : > { %p30_p0 = scmp.ge.s32.totalorder %s28_s17, 3  ;;  %p76_p1 = scmp.ne.s32.totalorder %s771_s13, %s767_s12 }
   0x5   : > { %p77_p2 = scmp.eq.s32.totalorder %s783_s16, 0  ;;  %p134_p4 = scmp.eq.s32.totalorder %s645_s18, 2 }
   0x6   : > { %s923_s17 = smov (%p30_p0, %s28_s17), 0  ;;  %s69_s20 = sadd.s32 1, %s771_s13 }
   0x7   : > { %p78_p3 = por %p77_p2, %p76_p1  ;;  %s65_s19 = ssub.s32 %s779_s15, %s923_s17 }
   0x8   : > { %p67_p5 = scmp.eq.s32.totalorder %s65_s19, 0  ;;  %p840_p6 = por %p134_p4, %p76_p1 }
   0x9   : > { %p649_p7 = scmp.ge.s32.totalorder %s783_s16, 3 }
   0xa   : > { %s845_s22 = scalar_select %p67_p5, %s771_s13, %s69_s20  }
   0xb   : > { %168 = sbr.rel (%p649_p7) target bundleno = 32 (0x20), region = 20 }
  0x12   : > { %171 = sbr.rel (!%p78_p3) target bundleno = 32 (0x20), region = 24  ;;  %s173_s23 = sand.u32 (%p78_p3), 1, %s771_s13  }
  0x13   : > { %s651_s24 = sshll.u32 (%p78_p3), %s779_s15, 2  ;;  %s650_s25 = sshll.u32 (%p78_p3), %s173_s23, 6 }
  0x14   : > { %s853_s28 = scalar_lea.vmem (%p78_p3), %s914_s1, %s651_s24  ;;  %s175_s29 = scalar_lea.vmem (%p78_p3), [#allocation3], %s650_s25 }
  0x15   : > { %v196_v0 = vld [vmem:[%s853_s28] sm:$0xf] (%p78_p3)  ;;  %v198_v1 = vld [vmem:[%s853_s28 + $0xc] sm:$0xf] (%p78_p3)  ;;  %v200_v2 = vld [vmem:[%s853_s28 + $0x18] sm:$0xf] (%p78_p3) }
  0x16   : > { %197 = vst [vmem:[%s175_s29] sm:$0xf] (%p78_p3), %v196_v0  ;;  %199 = vst [vmem:[%s175_s29 + $0x4] sm:$0xf] (%p78_p3), %v198_v1  ;;  %v202_v3 = vld [vmem:[%s853_s28 + $0x24] sm:$0xf] (%p78_p3) }
  0x17   : > { %v204_v4 = vld [vmem:[%s853_s28 + $0x30] sm:$0xf] (%p78_p3)  ;;  %201 = vst [vmem:[%s175_s29 + $0x8] sm:$0xf] (%p78_p3), %v200_v2  ;;  %203 = vst [vmem:[%s175_s29 + $0xc] sm:$0xf] (%p78_p3), %v202_v3 }
  0x18   : > { %205 = vst [vmem:[%s175_s29 + $0x10] sm:$0xf] (%p78_p3), %v204_v4  ;;  %v206_v5 = vld [vmem:[%s853_s28 + $0x3c] sm:$0xf] (%p78_p3)  ;;  %v208_v6 = vld [vmem:[%s853_s28 + $0x48] sm:$0xf] (%p78_p3) }
  0x19   : > { %v210_v7 = vld [vmem:[%s853_s28 + $0x54] sm:$0xf]  ;;  %207 = vst [vmem:[%s175_s29 + $0x14] sm:$0xf] %v206_v5  ;;  %209 = vst [vmem:[%s175_s29 + $0x18] sm:$0xf] %v208_v6 }
  0x1a   : > { %211 = vst [vmem:[%s175_s29 + $0x1c] sm:$0xf] %v210_v7  ;;  %v212_v8 = vld [vmem:[%s853_s28 + $0x60] sm:$0xf]  ;;  %v214_v9 = vld [vmem:[%s853_s28 + $0x6c] sm:$0xf] }
  0x1b   : > { %v216_v10 = vld [vmem:[%s853_s28 + $0x78] sm:$0xf]  ;;  %213 = vst [vmem:[%s175_s29 + $0x20] sm:$0xf] %v212_v8  ;;  %215 = vst [vmem:[%s175_s29 + $0x24] sm:$0xf] %v214_v9 }
  0x1c   : > { %217 = vst [vmem:[%s175_s29 + $0x28] sm:$0xf] %v216_v10  ;;  %v218_v11 = vld [vmem:[%s853_s28 + $0x84] sm:$0xf]  ;;  %v220_v12 = vld [vmem:[%s853_s28 + $0x90] sm:$0xf] }
  0x1d   : > { %v222_v13 = vld [vmem:[%s853_s28 + $0x9c] sm:$0xf]  ;;  %219 = vst [vmem:[%s175_s29 + $0x2c] sm:$0xf] %v218_v11  ;;  %221 = vst [vmem:[%s175_s29 + $0x30] sm:$0xf] %v220_v12 }
  0x1e   : > { %223 = vst [vmem:[%s175_s29 + $0x34] sm:$0xf] %v222_v13  ;;  %v224_v14 = vld [vmem:[%s853_s28 + $0xa8] sm:$0xf]  ;;  %v226_v15 = vld [vmem:[%s853_s28 + $0xb4] sm:$0xf] }
  0x1f   : > { %225 = vst [vmem:[%s175_s29 + $0x38] sm:$0xf] %v224_v14  ;;  %227 = vst [vmem:[%s175_s29 + $0x3c] sm:$0xf] %v226_v15 }
  0x20 PF: > { %p652_p8 = scmp.ge.s32.totalorder %s783_s16, 1  ;;  %p287_p9 = scmp.lt.s32.totalorder %s783_s16, 4 }
  0x22   : > { %p288_p10 = pnand %p652_p8, %p287_p9 }
  0x23   : > { %s294_s30 = sand.u32 (!%p288_p10), 1, %s767_s12   ;;  %v352_v16 = vld [vmem:[%s913_s0] sm:$0xff] (!%p288_p10)  ;;  %v353_v17 = vld [vmem:[%s913_s0 + $0x8] sm:$0xff] (!%p288_p10)  ;;  %v354_v27 = vld [vmem:[%s913_s0 + $0x10] sm:$0xff] (!%p288_p10)  ;;  %p337_p11 = scmp.lt.s32.totalorder (!%p288_p10), %s775_s14, 2 }
  0x24   : > { %291 = sbr.rel (%p288_p10) target bundleno = 297 (0x129), region = 69  ;;  %s653_s8 = sshll.u32 (!%p288_p10), %s294_s30, 6  ;;  %v355_v18 = vpack.c.bf16 (!%p288_p10), %v353_v17, %v352_v16  ;;  %v356_v28 = vpack.c.bf16 (!%p288_p10), %v354_v27, %v354_v27 }
  0x25   : > { %s296_s9 = scalar_lea.vmem (!%p288_p10), [#allocation3], %s653_s8  ;;  %s696_s24 = smul.u32 (!%p288_p10), 24, %s294_s30 }
  0x26   : > { %v737_v19 = vld [vmem:[%s296_s9] sm:$0xff] (!%p288_p10)   ;;  %692 = vmatprep.mubr.bf16.mxu0 (!%p288_p10), %v355_v18  ;;  %v738_v20 = vld [vmem:[%s296_s9 + $0x8] sm:$0xff] (!%p288_p10)   ;;  %v739_v21 = vld [vmem:[%s296_s9 + $0x10] sm:$0xff] (!%p288_p10)  }
  0x27   : > { %676 = vmatprep.subr.bf16.mxu0 (!%p288_p10), %v737_v19  ;;  %v740_v22 = vld [vmem:[%s296_s9 + $0x18] sm:$0xff] (!%p288_p10)   ;;  %v741_v23 = vld [vmem:[%s296_s9 + $0x20] sm:$0xff] (!%p288_p10)   ;;  %v742_v24 = vld [vmem:[%s296_s9 + $0x28] sm:$0xff] (!%p288_p10)   ;;  %s326_s25 = scalar_lea.vmem (!%p288_p10), [#allocation4], %s696_s24 }
  0x28   : > { %677 = vmatpush3.bf16.msra.mxu0 (!%p288_p10), %v737_v19  ;;  %v743_v25 = vld [vmem:[%s296_s9 + $0x30] sm:$0xff] (!%p288_p10)   ;;  %v744_v26 = vld [vmem:[%s296_s9 + $0x38] sm:$0xff] (!%p288_p10)  }
  0x29   : > { %678 = vmatprep.subr.bf16.mxu0 (!%p288_p10), %v738_v20 }
  0x2b   : > { %s338_s18 = scalar_select %p337_p11, %s775_s14, 2 }
  0x2c   : > { %679 = vmatpush3.bf16.msra.mxu0 %v738_v20  ;;  %s663_s26 = sshll.u32 (%p840_p6), %s775_s14, 3 }
  0x2d   : > { %680 = vmatprep.subr.bf16.mxu0 %v739_v21  ;;  %s339_s23 = scalar_lea.vmem %s915_s2, %s338_s18  ;;  %s505_s28 = scalar_lea.vmem (%p840_p6), %s916_s3, %s663_s26 }
  0x2e   : > { %v662_v29 = vld [vmem:[%s339_s23] ss:$0 sm:$0xff] }
  0x30   : > { %681 = vmatpush3.bf16.msra.mxu0 %v739_v21 }
  0x31   : > { %682 = vmatprep.subr.bf16.mxu0 %v740_v22 }
  0x34   : > { %683 = vmatpush3.bf16.msra.mxu0 %v740_v22 }
  0x35   : > { %684 = vmatprep.subr.bf16.mxu0 %v741_v23 }
  0x38   : > { %685 = vmatpush3.bf16.msra.mxu0 %v741_v23 }
  0x39   : > { %686 = vmatprep.subr.bf16.mxu0 %v742_v24 }
  0x3c   : > { %687 = vmatpush3.bf16.msra.mxu0 %v742_v24 }
  0x3d   : > { %688 = vmatprep.subr.bf16.mxu0 %v743_v25 }
  0x40   : > { %689 = vmatpush3.bf16.msra.mxu0 %v743_v25 }
  0x41   : > { %690 = vmatprep.subr.bf16.mxu0 %v744_v26 }
  0x44   : > { %691 = vmatpush3.bf16.msra.mxu0 %v744_v26 }
  0x47   : > { %693 = vmatmul.mubr.bf16.vlgmr.msra.gmra.mrb[0].mxu0 %v356_v28 }
 0x11a   : > { %v694_v30 = vpop.f32.mrb[0].mxu0  ;;  %500 = sbr.rel (!%p840_p6) target bundleno = 297 (0x129), region = 85 }
 0x11b   : > { %v490_v31 = vadd.f32 %v694_v30, %v662_v29  ;;  %v455_v32 = vpop.f32.mrb[1].mxu0 }
 0x11c   : > { %v488_v33 = vadd.f32 %v662_v29, %v455_v32  ;;  %v695_v34 = vpop.f32.mrb[2].mxu0 }
 0x11d   : > { %493 = vst [vmem:[%s326_s25 + $0x10] sm:$0xff] %v490_v31  ;;  %v458_v35 = vpop.f32.mrb[3].mxu0 }
 0x11e   : > { %491 = vst [vmem:[%s326_s25] sm:$0xff] %v488_v33  ;;  %v489_v36 = vadd.f32 %v662_v29, %v458_v35 }
 0x120   : > { %492 = vst [vmem:[%s326_s25 + $0x8] sm:$0xff] %v489_v36 }
 0x124   : > { %v541_v39 = vld [vmem:[%s326_s25 + $0x10] sm:$0xff] }
 0x125   : > { %v537_v37 = vld [vmem:[%s326_s25] sm:$0xff]  ;;  %542 = vst [vmem:[%s505_s28 + $0x30] sm:$0xff] %v541_v39 }
 0x126   : > { %538 = vst [vmem:[%s505_s28] sm:$0xff] %v537_v37 }
 0x127   : > { %v539_v38 = vld [vmem:[%s326_s25 + $0x8] sm:$0xff] }
 0x128   : > { %540 = vst [vmem:[%s505_s28 + $0x18] sm:$0xff] %v539_v38 }
 0x129 PF: > { %s13_s16 = sadd.s32 1, %s783_s16   ;;  %s918_s12 = smov %s771_s13 }
 0x12a   : > { %p10_p12 = scmp.ge.s32.totalorder %s13_s16, 5   ;;  %s919_s13 = smov %s845_s22 }
 0x12b   : > { %s920_s14 = smov %s779_s15  ;;  %s921_s15 = smov %s923_s17 }
 0x12c   :  { %12 = sbr.rel (!%p10_p12) target bundleno = 3 (0x3), region = 160 }

// kernel: _lambda_.40
= control target key start
LH: loop header
LB: loop body
LE: loop exit
PB: predicated region body
PF: predicated region fallthrough
CT: control target
= control target key end

     0   :  { %s1024_s12 = smov 0   ;;  %s1175_s0 = inlined_call_operand.vmem [shape: f32[2,9,128], index: 0, kind: input, shape index: {}]   ;;  %s1176_s1 = inlined_call_operand.vmem [shape: f32[2,9,128], index: 1, kind: input, shape index: {}]   ;;  %s1177_s2 = inlined_call_operand.vmem [shape: f32[2,9,128], index: 2, kind: input, shape index: {}]   ;;  %s1178_s3 = inlined_call_operand.vmem [shape: f32[2,9,128], index: 3, kind: output, shape index: {}]  }
   0x1 LB: > { %s853_s13 = sadd.s32 4294967295, %s996_s12   ;;  %p857_p0 = scmp.ge.s32.totalorder %s996_s12, 1  ;;  %s996_s12 = sphi %s1024_s12, %s13_s12  }
   0x2   : > { %p157_p1 = scmp.lt.s32.totalorder %s996_s12, 3 }
   0x4   : > { %p158_p2 = pnand %p857_p0, %p157_p1 }
   0x5   : > { %p191_p3 = scmp.lt.s32.totalorder (!%p158_p2), %s853_s13, 1  ;;  %v998_v0 = vmov (!%p158_p2), 0.0   ;;  %vm999_vm0 = vmmov (!%p158_p2), 0   ;;  %vm228_vm1 = vcmask (!%p158_p2), 261120   ;;  %v221_v8 = vlaneseq (!%p158_p2)  ;;  %s1000_s21 = smov (!%p158_p2), 96  }
   0x6   : > { %161 = sbr.rel (%p158_p2) target bundleno = 1497 (0x5d9), region = 32  ;;  %896 = vmatprep.subr.bf16.mxu0 (!%p158_p2), %v998_v0  ;;  %898 = vmatprep.mubr.msk.bf16.mxu0 (!%p158_p2), %vm999_vm0, %v998_v0  ;;  %vm280_vm3 = vcmask (!%p158_p2), 72704   ;;  %vm284_vm5 = vcmask (!%p158_p2), 65536   ;;  %s1001_s22 = smov (!%p158_p2), 32   ;;  %vm308_vm6 = vcmask (!%p158_p2), 1043456   ;;  %vm309_vm7 = vcmask (!%p158_p2), 1044480  }
   0x7   : > { %902 = vmatprep.subr.bf16.mxu1 (!%p158_p2), %v998_v0  ;;  %904 = vmatprep.mubr.msk.bf16.mxu1 (!%p158_p2), %vm999_vm0, %v998_v0  ;;  %v1053_v9 = vshrl.u32 (!%p158_p2), %v221_v8, 7  ;;  %v1055_v10 = vand.u32 (!%p158_p2), 127, %v221_v8  ;;  %v1002_v34 = vmov (!%p158_p2), 65535   ;;  %s1003_s26 = smov (!%p158_p2), 64   ;;  %vm766_vm8 = vcmask (!%p158_p2), 523264  }
   0x8   : > { %v310_v35 = vsel (!%p158_p2), %vm308_vm6, 4294967295, %v1002_v34  ;;  %vm769_vm9 = vcmask (!%p158_p2), 785408  }
   0x9   : > { %v1058_v11 = vadd.s32 (!%p158_p2), 8, %v1053_v9  ;;  %vm226_vm2 = vcmp.le.s32.totalorder (!%p158_p2), %v1055_v10, %v1053_v9  ;;  %v1082_v37 = vsel (!%p158_p2), %vm309_vm7, %v310_v35, 0 }
   0xb   : > { %vm227_vm4 = vcmp.le.s32.totalorder (!%p158_p2), %v1055_v10, %v1058_v11 }
   0xd   : > { %s1180_s13 = smov (!%p191_p3, %s853_s13), 1 }
   0xe   : > { %s1038_s14 = sshll.u32 %s1180_s13, 4 }
   0xf   : > { %s200_s17 = scalar_lea.vmem %s1176_s1, %s1038_s14  ;;  %s195_s20 = scalar_lea.vmem %s1175_s0, %s1038_s14 }
  0x10   : > { %v215_v1 = vld [vmem:[%s200_s17] sm:$0xff]  ;;  %v216_v2 = vld [vmem:[%s200_s17 + $0x8] sm:$0x1]  ;;  %s205_s25 = scalar_lea.vmem %s1177_s2, %s1038_s14  ;;  %s210_s29 = scalar_lea.vmem %s1178_s3, %s1038_s14 }
  0x11   : > { %v217_v3 = vpack.c.bf16 %v216_v2, %v215_v1  ;;  %v212_v5 = vld [vmem:[%s195_s20] sm:$0xff]  ;;  %v213_v6 = vld [vmem:[%s195_s20 + $0x8] sm:$0x1] }
  0x12   : > { %v214_v7 = vpack.c.bf16 %v213_v6, %v212_v5  ;;  %v218_v32 = vld [vmem:[%s205_s25] sm:$0xff]  ;;  %v219_v33 = vld [vmem:[%s205_s25 + $0x8] sm:$0x1] }
  0x13   : > { %v233_v4 = vsel %vm228_vm1, %v217_v3, 0  ;;  %v1080_v36 = vpack.c.bf16 %v219_v33, %v218_v32 }
  0x14   : > { %897 = vmatpush3.bf16.xpose.msra.mxu0 %v233_v4 }
  0x15   : > { %914 = vmatprep.subr.bf16.mxu0 %v998_v0  ;;  %v313_v38 = vand.u32 %v1082_v37, %v1080_v36 }
  0x17   : > { %903 = vmatpush3.bf16.msra.mxu1 %v313_v38 }
  0x18   : > { %908 = vmatprep.subr.bf16.mxu1 %v998_v0 }
  0x1b   : > { %899 = vmatmul.mubr.msk.bf16.vlgmr.msra.gmra.mrb[0].mxu0 %vm228_vm1, %v214_v7 }
  0x1c   : > { %916 = vmatprep.mubr.msk.bf16.mxu0 %vm999_vm0, %v998_v0 }
  0xee   : > { %v269_v12 = vpop.f32.mrb[0].mxu0 }
  0xef   : > { %v276_v13 = vmul.f32 0.17677669, %v269_v12  ;;  %v900_v14 = vpop.f32.mrb[1].mxu0 }
  0xf0   : > { %v272_v15 = vpop.f32.mrb[2].mxu0 }
  0xf1   : > { %v277_v16 = vmul.f32 0.17677669, %v272_v15  ;;  %v901_v17 = vpop.f32.mrb[3].mxu0  ;;  %v278_v18 = vsel %vm226_vm2, %v276_v13, -1e+30 }
  0xf2   : > { %v281_v19 = vsel %vm280_vm3, %v278_v18, -inf }
  0xf3   : > { %282 = vmax.xlane.f32.xlu0 %v281_v19  ;;  %v279_v20 = vsel %vm227_vm4, %v277_v16, -1e+30 }
  0xf4   : > { %v285_v21 = vsel %vm284_vm5, %v279_v20, -inf }
  0xf7   : > { %286 = vmax.xlane.f32.xlu0 %v285_v21 }
 0x10d   : > { %360 = vrot.lane.b32.xlu0 %v217_v3, %s1000_s21 }
 0x111   : > { %615 = vrot.lane.b32.xlu0 %v217_v3, %s1001_s22 }
 0x180   : > { %v283_v22 = vpop.xlane.xlu0 %282 }
 0x181   : > { %v288_v23 = vsub.f32 %v278_v18, %v283_v22 }
 0x183   : > { %v290_v24 = vmul.f32 1.442695, %v288_v23 }
 0x184   : > { %v287_v25 = vpop.xlane.xlu0 %286 }
 0x185   : > { %958 = vpow2.f32 %v290_v24  ;;  %v289_v26 = vsub.f32 %v279_v20, %v287_v25 }
 0x187   : > { %v292_v27 = vmul.f32 1.442695, %v289_v26 }
 0x188   : > { %v361_v43 = vpop.permute.xlu0 %360 }
 0x189   : > { %960 = vpow2.f32 %v292_v27  ;;  %v366_v47 = vsel %vm228_vm1, %v361_v43, 0 }
 0x18c   : > { %v616_v51 = vpop.permute.xlu0 %615 }
 0x18d   : > { %v621_v53 = vsel %vm228_vm1, %v616_v51, 0 }
 0x18f   : > { %v959_v28 = vpop.eup %958 }
 0x190   : > { %v294_v29 = vsel %vm280_vm3, %v959_v28, 0.0 }
 0x191   : > { %295 = vadd.xlane.f32.xlu1 %v294_v29 }
 0x193   : > { %v961_v30 = vpop.eup %960 }
 0x194   : > { %v297_v31 = vsel %vm284_vm5, %v961_v30, 0.0 }
 0x195   : > { %298 = vadd.xlane.f32.xlu1 %v297_v31 }
 0x1a6   : > { %357 = vrot.lane.b32.xlu1 %v214_v7, %s1000_s21 }
 0x1aa   : > { %488 = vrot.lane.b32.xlu1 %v217_v3, %s1003_s26 }
 0x1ae   : > { %486 = vrot.lane.b32.xlu1 %v214_v7, %s1003_s26 }
 0x1b2   : > { %613 = vrot.lane.b32.xlu1 %v214_v7, %s1001_s22 }
 0x21e   : > { %v296_v39 = vpop.xlane.xlu1 %295 }
 0x21f   : > { %962 = vrcp.f32 %v296_v39 }
 0x222   : > { %v299_v40 = vpop.xlane.xlu1 %298 }
 0x223   : > { %964 = vrcp.f32 %v299_v40 }
 0x226   : > { %v358_v46 = vpop.permute.xlu1 %357 }
 0x229   : > { %v963_v41 = vpop.eup %962 }
 0x22a   : > { %v302_v44 = vmul.f32 %v963_v41, %v959_v28  ;;  %v489_v49 = vpop.permute.xlu1 %488 }
 0x22b   : > { %v494_v50 = vsel %vm228_vm1, %v489_v49, 0 }
 0x22d   : > { %v965_v42 = vpop.eup %964 }
 0x22e   : > { %v303_v45 = vmul.f32 %v965_v42, %v961_v30  ;;  %v487_v52 = vpop.permute.xlu1 %486 }
 0x230   : > { %v304_v48 = vpack.c.bf16 %v303_v45, %v302_v44 }
 0x232   : > { %905 = vmatmul.mubr.msk.bf16.vlgmr.msra.gmra.mrb[0].mxu1 %vm280_vm3, %v304_v48  ;;  %v614_v54 = vpop.permute.xlu1 %613 }
 0x233   : > { %909 = vmatpush3.bf16.xpose.msra.mxu1 %v366_v47  ;;  %910 = vmatprep.mubr.msk.bf16.mxu1 %vm999_vm0, %v998_v0 }
 0x234   : > { %920 = vmatprep.subr.bf16.mxu1 %v998_v0 }
 0x23a   : > { %911 = vmatmul.mubr.msk.bf16.vlgmr.msra.gmra.mrb[4].mxu1 %vm228_vm1, %v358_v46 }
 0x23b   : > { %921 = vmatpush3.bf16.xpose.msra.mxu1 %v494_v50  ;;  %922 = vmatprep.mubr.msk.bf16.mxu1 %vm999_vm0, %v998_v0 }
 0x23c   : > { %932 = vmatprep.subr.bf16.mxu1 %v998_v0 }
 0x242   : > { %923 = vmatmul.mubr.msk.bf16.vlgmr.msra.gmra.mrb[8].mxu1 %vm228_vm1, %v487_v52 }
 0x243   : > { %933 = vmatpush3.bf16.xpose.msra.mxu1 %v621_v53  ;;  %934 = vmatprep.mubr.msk.bf16.mxu1 %vm999_vm0, %v998_v0 }
 0x24a   : > { %935 = vmatmul.mubr.msk.bf16.vlgmr.msra.gmra.mrb[12].mxu1 %vm228_vm1, %v614_v54 }
 0x305   : > { %v1106_v55 = vpop.f32.mrb[0].mxu1 }
 0x306   : > { %v906_v56 = vpop.f32.mrb[1].mxu1 }
 0x307   : > { %v1108_v57 = vpop.f32.mrb[2].mxu1 }
 0x308   : > { %v907_v58 = vpop.f32.mrb[3].mxu1 }
 0x30d   : > { %v402_v59 = vpop.f32.mrb[4].mxu1 }
 0x30e   : > { %v409_v60 = vmul.f32 0.17677669, %v402_v59  ;;  %v912_v61 = vpop.f32.mrb[5].mxu1 }
 0x30f   : > { %v405_v62 = vpop.f32.mrb[6].mxu1 }
 0x310   : > { %v410_v63 = vmul.f32 0.17677669, %v405_v62  ;;  %v913_v1 = vpop.f32.mrb[7].mxu1  ;;  %v411_v2 = vsel %vm226_vm2, %v409_v60, -1e+30 }
 0x311   : > { %v413_v3 = vsel %vm280_vm3, %v411_v2, -inf }
 0x312   : > { %414 = vmax.xlane.f32.xlu0 %v413_v3  ;;  %v412_v4 = vsel %vm227_vm4, %v410_v63, -1e+30 }
 0x313   : > { %v416_v5 = vsel %vm284_vm5, %v412_v4, -inf }
 0x314   : > { %417 = vmax.xlane.f32.xlu1 %v416_v5 }
 0x315   : > { %v530_v6 = vpop.f32.mrb[8].mxu1 }
 0x316   : > { %v537_v7 = vmul.f32 0.17677669, %v530_v6  ;;  %v924_v8 = vpop.f32.mrb[9].mxu1 }
 0x317   : > { %v533_v12 = vpop.f32.mrb[10].mxu1 }
 0x318   : > { %v538_v13 = vmul.f32 0.17677669, %v533_v12  ;;  %v925_v14 = vpop.f32.mrb[11].mxu1  ;;  %v539_v15 = vsel %vm226_vm2, %v537_v7, -1e+30 }
 0x319   : > { %v541_v16 = vsel %vm280_vm3, %v539_v15, -inf }
 0x31a   : > { %542 = vmax.xlane.f32.xlu0 %v541_v16  ;;  %v540_v17 = vsel %vm227_vm4, %v538_v13, -1e+30 }
 0x31b   : > { %v544_v19 = vsel %vm284_vm5, %v540_v17, -inf }
 0x31d   : > { %v657_v18 = vpop.f32.mrb[12].mxu1 }
 0x31e   : > { %v664_v20 = vmul.f32 0.17677669, %v657_v18  ;;  %545 = vmax.xlane.f32.xlu0 %v544_v19  ;;  %v936_v21 = vpop.f32.mrb[13].mxu1 }
 0x31f   : > { %v660_v22 = vpop.f32.mrb[14].mxu1 }
 0x320   : > { %v665_v23 = vmul.f32 0.17677669, %v660_v22  ;;  %v666_v24 = vsel %vm226_vm2, %v664_v20, -1e+30  ;;  %v937_v25 = vpop.f32.mrb[15].mxu1 }
 0x321   : > { %v668_v26 = vsel %vm280_vm3, %v666_v24, -inf }
 0x322   : > { %669 = vmax.xlane.f32.xlu0 %v668_v26  ;;  %v667_v27 = vsel %vm227_vm4, %v665_v23, -1e+30 }
 0x323   : > { %v671_v28 = vsel %vm284_vm5, %v667_v27, -inf }
 0x324   : > { %672 = vmax.xlane.f32.xlu1 %v671_v28 }
 0x39f   : > { %v415_v29 = vpop.xlane.xlu0 %414 }
 0x3a0   : > { %v419_v30 = vsub.f32 %v411_v2, %v415_v29 }
 0x3a1   : > { %v418_v31 = vpop.xlane.xlu1 %417 }
 0x3a2   : > { %v421_v32 = vmul.f32 1.442695, %v419_v30  ;;  %v420_v33 = vsub.f32 %v412_v4, %v418_v31 }
 0x3a4   : > { %966 = vpow2.f32 %v421_v32  ;;  %v423_v34 = vmul.f32 1.442695, %v420_v33 }
 0x3a6   : > { %968 = vpow2.f32 %v423_v34 }
 0x3a7   : > { %v543_v9 = vpop.xlane.xlu0 %542 }
 0x3a8   : > { %v547_v35 = vsub.f32 %v539_v15, %v543_v9 }
 0x3aa   : > { %v549_v38 = vmul.f32 1.442695, %v547_v35 }
 0x3ab   : > { %v546_v39 = vpop.xlane.xlu0 %545 }
 0x3ac   : > { %970 = vpow2.f32 %v549_v38  ;;  %v548_v40 = vsub.f32 %v540_v17, %v546_v39 }
 0x3ae   : > { %v967_v41 = vpop.eup %966  ;;  %v551_v10 = vmul.f32 1.442695, %v548_v40 }
 0x3af   : > { %v670_v11 = vpop.xlane.xlu0 %669  ;;  %v425_v42 = vsel %vm280_vm3, %v967_v41, 0.0 }
 0x3b0   : > { %v969_v43 = vpop.eup %968  ;;  %972 = vpow2.f32 %v551_v10  ;;  %v674_v44 = vsub.f32 %v666_v24, %v670_v11  ;;  %426 = vadd.xlane.f32.xlu0 %v425_v42 }
 0x3b1   : > { %v428_v45 = vsel %vm284_vm5, %v969_v43, 0.0  ;;  %v673_v53 = vpop.xlane.xlu1 %672 }
 0x3b2   : > { %v676_v46 = vmul.f32 1.442695, %v674_v44  ;;  %429 = vadd.xlane.f32.xlu1 %v428_v45  ;;  %v675_v54 = vsub.f32 %v667_v27, %v673_v53 }
 0x3b4   : > { %974 = vpow2.f32 %v676_v46  ;;  %v678_v56 = vmul.f32 1.442695, %v675_v54 }
 0x3b6   : > { %v971_v47 = vpop.eup %970  ;;  %976 = vpow2.f32 %v678_v56 }
 0x3b7   : > { %v553_v48 = vsel %vm280_vm3, %v971_v47, 0.0 }
 0x3b8   : > { %554 = vadd.xlane.f32.xlu0 %v553_v48 }
 0x3ba   : > { %v973_v49 = vpop.eup %972 }
 0x3bb   : > { %v556_v50 = vsel %vm284_vm5, %v973_v49, 0.0 }
 0x3bc   : > { %557 = vadd.xlane.f32.xlu1 %v556_v50 }
 0x3be   : > { %v975_v51 = vpop.eup %974 }
 0x3bf   : > { %v680_v52 = vsel %vm280_vm3, %v975_v51, 0.0 }
 0x3c0   : > { %681 = vadd.xlane.f32.xlu0 %v680_v52  ;;  %v977_v58 = vpop.eup %976 }
 0x3c1   : > { %v683_v59 = vsel %vm284_vm5, %v977_v58, 0.0 }
 0x3cd   : > { %564 = vrot.lane.b32.xlu1 %v1080_v36, %s1003_s26 }
 0x3d6   : > { %437 = vrot.lane.b32.xlu0 %v1080_v36, %s1000_s21 }
 0x3f1   : > { %684 = vadd.xlane.f32.xlu1 %v683_v59 }
 0x402   : > { %691 = vrot.lane.b32.xlu1 %v1080_v36, %s1001_s22 }
 0x43d   : > { %v427_v61 = vpop.xlane.xlu0 %426 }
 0x43f   : > { %v430_v60 = vpop.xlane.xlu1 %429 }
 0x440   : > { %978 = vrcp.f32 %v430_v60 }
 0x441   : > { %980 = vrcp.f32 %v427_v61 }
 0x445   : > { %v555_v62 = vpop.xlane.xlu0 %554 }
 0x449   : > { %v558_v63 = vpop.xlane.xlu1 %557 }
 0x44a   : > { %982 = vrcp.f32 %v558_v63  ;;  %v979_v2 = vpop.eup %978 }
 0x44b   : > { %984 = vrcp.f32 %v555_v62  ;;  %v981_v3 = vpop.eup %980  ;;  %v434_v4 = vmul.f32 %v979_v2, %v969_v43 }
 0x44c   : > { %v433_v7 = vmul.f32 %v981_v3, %v967_v41 }
 0x44d   : > { %v682_v1 = vpop.xlane.xlu0 %681  ;;  %v565_v8 = vpop.permute.xlu1 %564 }
 0x44e   : > { %v435_v12 = vpack.c.bf16 %v434_v4, %v433_v7  ;;  %v570_v13 = vand.u32 %v565_v8, %v1082_v37  ;;  %986 = vrcp.f32 %v682_v1 }
 0x451   : > { %v438_v5 = vpop.permute.xlu0 %437 }
 0x452   : > { %v443_v6 = vand.u32 %v438_v5, %v1082_v37 }
 0x454   : > { %915 = vmatpush3.bf16.msra.mxu0 %v443_v6  ;;  %v983_v36 = vpop.eup %982 }
 0x455   : > { %926 = vmatprep.subr.bf16.mxu0 %v998_v0  ;;  %v985_v14 = vpop.eup %984  ;;  %v562_v15 = vmul.f32 %v983_v36, %v973_v49 }
 0x456   : > { %v561_v16 = vmul.f32 %v985_v14, %v971_v47 }
 0x457   : > { %917 = vmatmul.mubr.msk.bf16.vlgmr.msra.gmra.mrb[4].mxu0 %vm280_vm3, %v435_v12 }
 0x458   : > { %927 = vmatpush3.bf16.msra.mxu0 %v570_v13  ;;  %928 = vmatprep.mubr.msk.bf16.mxu0 %vm999_vm0, %v998_v0  ;;  %v563_v17 = vpack.c.bf16 %v562_v15, %v561_v16  ;;  %v987_v21 = vpop.eup %986 }
 0x459   : > { %938 = vmatprep.subr.bf16.mxu0 %v998_v0  ;;  %v688_v23 = vmul.f32 %v987_v21, %v975_v51 }
 0x45f   : > { %929 = vmatmul.mubr.msk.bf16.vlgmr.msra.gmra.mrb[8].mxu0 %vm280_vm3, %v563_v17 }
 0x460   : > { %940 = vmatprep.mubr.msk.bf16.mxu0 %vm999_vm0, %v998_v0 }
 0x47e   : > { %v685_v18 = vpop.xlane.xlu1 %684 }
 0x47f   : > { %988 = vrcp.f32 %v685_v18 }
 0x482   : > { %v692_v19 = vpop.permute.xlu1 %691 }
 0x483   : > { %v697_v20 = vand.u32 %v692_v19, %v1082_v37 }
 0x485   : > { %939 = vmatpush3.bf16.msra.mxu0 %v697_v20 }
 0x489   : > { %v989_v22 = vpop.eup %988 }
 0x48a   : > { %v689_v24 = vmul.f32 %v989_v22, %v977_v58 }
 0x48c   : > { %v690_v25 = vpack.c.bf16 %v689_v24, %v688_v23 }
 0x48e   : > { %941 = vmatmul.mubr.msk.bf16.vlgmr.msra.gmra.mrb[12].mxu0 %vm280_vm3, %v690_v25 }
 0x52a   : > { %v479_v26 = vpop.f32.mrb[4].mxu0 }
 0x52b   : > { %742 = vrot.lane.b32.xlu1 %v479_v26, %s1001_s22  ;;  %v918_v27 = vpop.f32.mrb[5].mxu0 }
 0x52c   : > { %v482_v28 = vpop.f32.mrb[6].mxu0 }
 0x52d   : > { %744 = vrot.lane.b32.xlu0 %v482_v28, %s1001_s22  ;;  %v919_v0 = vpop.f32.mrb[7].mxu0 }
 0x532   : > { %v606_v29 = vpop.f32.mrb[8].mxu0 }
 0x533   : > { %750 = vrot.lane.b32.xlu1 %v606_v29, %s1003_s26  ;;  %v930_v37 = vpop.f32.mrb[9].mxu0 }
 0x534   : > { %v609_v30 = vpop.f32.mrb[10].mxu0 }
 0x535   : > { %752 = vrot.lane.b32.xlu0 %v609_v30, %s1003_s26  ;;  %v931_v31 = vpop.f32.mrb[11].mxu0 }
 0x561   : > { %v733_v32 = vpop.f32.mrb[12].mxu0 }
 0x562   : > { %758 = vrot.lane.b32.xlu1 %v733_v32, %s1000_s21  ;;  %v942_v33 = vpop.f32.mrb[13].mxu0 }
 0x563   : > { %v736_v34 = vpop.f32.mrb[14].mxu0 }
 0x564   : > { %760 = vrot.lane.b32.xlu0 %v736_v34, %s1000_s21  ;;  %v943_v9 = vpop.f32.mrb[15].mxu0 }
 0x59d   : > { %v743_v35 = vpop.permute.xlu1 %742 }
 0x59e   : > { %v764_v41 = vsel %vm228_vm1, %v1106_v55, %v743_v35 }
 0x59f   : > { %v745_v38 = vpop.permute.xlu0 %744 }
 0x5a0   : > { %v765_v42 = vsel %vm228_vm1, %v1108_v57, %v745_v38 }
 0x5a5   : > { %v751_v39 = vpop.permute.xlu1 %750 }
 0x5a6   : > { %v767_v10 = vsel %vm766_vm8, %v764_v41, %v751_v39 }
 0x5a7   : > { %v753_v40 = vpop.permute.xlu0 %752 }
 0x5a8   : > { %v768_v44 = vsel %vm766_vm8, %v765_v42, %v753_v40 }
 0x5d4   : > { %v759_v11 = vpop.permute.xlu1 %758 }
 0x5d5   : > { %v770_v43 = vsel %vm769_vm9, %v767_v10, %v759_v11 }
 0x5d6   : > { %772 = vst [vmem:[%s210_s29] sm:$0xff] %v770_v43  ;;  %v761_v45 = vpop.permute.xlu0 %760 }
 0x5d7   : > { %v771_v46 = vsel %vm769_vm9, %v768_v44, %v761_v45 }
 0x5d8   : > { %773 = vst [vmem:[%s210_s29 + $0x8] sm:$0x1] %v771_v46 }
 0x5d9 PF: > { %s13_s12 = sadd.s32 1, %s996_s12  }
 0x5da   : > { %p10_p4 = scmp.ge.s32.totalorder %s13_s12, 4  }
 0x5dc   :  { %12 = sbr.rel (!%p10_p4) target bundleno = 1 (0x1), region = 68 }

// kernel: _lambda_.41
= control target key start
LH: loop header
LB: loop body
LE: loop exit
PB: predicated region body
PF: predicated region fallthrough
CT: control target
= control target key end

     0   :  { %s390_s1 = inlined_call_operand.vmem [shape: bf16[128,128], index: 1, kind: input, shape index: {}]   ;;  %s391_s0 = inlined_call_operand.vmem [shape: f32[24,128], index: 0, kind: input, shape index: {}]   ;;  %s392_s2 = inlined_call_operand.vmem [shape: f32[1,128], index: 2, kind: input, shape index: {}, may-alias: {2,5}]   ;;  %s393_s3 = inlined_call_operand.vmem [shape: f32[24,128], index: 3, kind: input, shape index: {}]   ;;  %s394_s4 = inlined_call_operand.vmem [shape: f32[1,128], index: 4, kind: input, shape index: {}]   ;;  %s395_s5 = inlined_call_operand.vmem [shape: f32[1,128], index: 5, kind: input, shape index: {}, may-alias: {2,5}]   ;;  %s396_s6 = inlined_call_operand.vmem [shape: f32[24,128], index: 6, kind: output, shape index: {}]  }
   0x1   :  { %v281_v0 = vld [vmem:[%s390_s1] sm:$0xff]   ;;  %v282_v1 = vld [vmem:[%s390_s1 + $0x8] sm:$0xff]   ;;  %v283_v2 = vld [vmem:[%s390_s1 + $0x10] sm:$0xff]  }
   0x2   :  { %261 = vmatprep.subr.bf16.mxu0 %v281_v0  ;;  %v284_v3 = vld [vmem:[%s390_s1 + $0x18] sm:$0xff]   ;;  %v34_v4 = vld [vmem:[%s391_s0] sm:$0xff]  ;;  %v35_v5 = vld [vmem:[%s391_s0 + $0x8] sm:$0xff] }
   0x3   :  { %262 = vmatpush3.bf16.msra.mxu0 %v281_v0  ;;  %v37_v6 = vpack.c.bf16 %v35_v5, %v34_v4  ;;  %v285_v7 = vld [vmem:[%s390_s1 + $0x20] sm:$0xff]   ;;  %v286_v8 = vld [vmem:[%s390_s1 + $0x28] sm:$0xff]   ;;  %v287_v9 = vld [vmem:[%s390_s1 + $0x30] sm:$0xff]  }
   0x4   :  { %263 = vmatprep.subr.bf16.mxu0 %v282_v1  ;;  %v288_v10 = vld [vmem:[%s390_s1 + $0x38] sm:$0xff]   ;;  %v36_v11 = vld [vmem:[%s391_s0 + $0x10] sm:$0xff]  ;;  %v248_v13 = vld [vmem:[%s392_s2] ss:$0 sm:$0xff] }
   0x5   :  { %277 = vmatprep.mubr.bf16.mxu0 %v37_v6  ;;  %v38_v12 = vpack.c.bf16 %v36_v11, %v36_v11  ;;  %v175_v15 = vld [vmem:[%s393_s3 + $0x10] sm:$0xff]  ;;  %v173_v18 = vld [vmem:[%s393_s3] sm:$0xff]  ;;  %v174_v25 = vld [vmem:[%s393_s3 + $0x8] sm:$0xff] }
   0x6   :  { %v249_v49 = vld [vmem:[%s394_s4] ss:$0 sm:$0xff] }
   0x7   :  { %264 = vmatpush3.bf16.msra.mxu0 %v282_v1  ;;  %v250_v51 = vld [vmem:[%s395_s5] ss:$0 sm:$0xff] }
   0x8   :  { %265 = vmatprep.subr.bf16.mxu0 %v283_v2 }
   0xb   :  { %266 = vmatpush3.bf16.msra.mxu0 %v283_v2 }
   0xc   :  { %267 = vmatprep.subr.bf16.mxu0 %v284_v3 }
   0xf   :  { %268 = vmatpush3.bf16.msra.mxu0 %v284_v3 }
  0x10   :  { %269 = vmatprep.subr.bf16.mxu0 %v285_v7 }
  0x13   :  { %270 = vmatpush3.bf16.msra.mxu0 %v285_v7 }
  0x14   :  { %271 = vmatprep.subr.bf16.mxu0 %v286_v8 }
  0x17   :  { %272 = vmatpush3.bf16.msra.mxu0 %v286_v8 }
  0x18   :  { %273 = vmatprep.subr.bf16.mxu0 %v287_v9 }
  0x1b   :  { %274 = vmatpush3.bf16.msra.mxu0 %v287_v9 }
  0x1c   :  { %275 = vmatprep.subr.bf16.mxu0 %v288_v10 }
  0x1f   :  { %276 = vmatpush3.bf16.msra.mxu0 %v288_v10 }
  0x22   :  { %278 = vmatmul.mubr.bf16.vlgmr.msra.gmra.mrb[0].mxu0 %v38_v12 }
  0xf5   :  { %v279_v14 = vpop.f32.mrb[0].mxu0 }
  0xf6   :  { %v172_v16 = vadd.f32 %v279_v14, %v248_v13  ;;  %v137_v17 = vpop.f32.mrb[1].mxu0 }
  0xf7   :  { %v170_v19 = vadd.f32 %v248_v13, %v137_v17  ;;  %v280_v20 = vpop.f32.mrb[2].mxu0 }
  0xf8   :  { %v140_v21 = vpop.f32.mrb[3].mxu0  ;;  %v178_v22 = vadd.f32 %v175_v15, %v172_v16 }
  0xf9   :  { %v171_v23 = vadd.f32 %v248_v13, %v140_v21  ;;  %v176_v24 = vadd.f32 %v173_v18, %v170_v19 }
  0xfa   :  { %183 = vadd.xlane.f32.xlu1 %v178_v22 }
  0xfb   :  { %179 = vadd.xlane.f32.xlu0 %v176_v24  ;;  %v177_v26 = vadd.f32 %v174_v25, %v171_v23 }
  0xff   :  { %181 = vadd.xlane.f32.xlu0 %v177_v26 }
 0x187   :  { %v184_v27 = vpop.xlane.xlu1 %183 }
 0x188   :  { %v180_v28 = vpop.xlane.xlu0 %179  ;;  %v188_v29 = vmul.f32 0.0078125, %v184_v27 }
 0x189   :  { %v186_v30 = vmul.f32 0.0078125, %v180_v28 }
 0x18a   :  { %v191_v33 = vsub.f32 %v178_v22, %v188_v29 }
 0x18b   :  { %v189_v31 = vsub.f32 %v176_v24, %v186_v30 }
 0x18c   :  { %v182_v32 = vpop.xlane.xlu0 %181  ;;  %v194_v37 = vmul.f32 %v191_v33, %v191_v33 }
 0x18d   :  { %v187_v34 = vmul.f32 0.0078125, %v182_v32  ;;  %v192_v35 = vmul.f32 %v189_v31, %v189_v31 }
 0x18f   :  { %v190_v36 = vsub.f32 %v177_v26, %v187_v34  ;;  %195 = vadd.xlane.f32.xlu1 %v192_v35 }
 0x191   :  { %v193_v38 = vmul.f32 %v190_v36, %v190_v36 }
 0x193   :  { %199 = vadd.xlane.f32.xlu1 %v194_v37  ;;  %197 = vadd.xlane.f32.xlu0 %v193_v38 }
 0x21c   :  { %v196_v39 = vpop.xlane.xlu1 %195 }
 0x21d   :  { %v201_v40 = vmul.f32 0.0078125, %v196_v39 }
 0x21f   :  { %v204_v41 = vadd.f32 1e-05, %v201_v40 }
 0x220   :  { %v200_v42 = vpop.xlane.xlu1 %199  ;;  %v198_v43 = vpop.xlane.xlu0 %197 }
 0x221   :  { %289 = vrsqrt.f32 %v204_v41  ;;  %v203_v44 = vmul.f32 0.0078125, %v200_v42  ;;  %v202_v45 = vmul.f32 0.0078125, %v198_v43 }
 0x223   :  { %v206_v46 = vadd.f32 1e-05, %v203_v44  ;;  %v205_v47 = vadd.f32 1e-05, %v202_v45 }
 0x225   :  { %291 = vrsqrt.f32 %v206_v46 }
 0x226   :  { %293 = vrsqrt.f32 %v205_v47 }
 0x22b   :  { %v290_v48 = vpop.eup %289 }
 0x22c   :  { %v210_v50 = vmul.f32 %v290_v48, %v189_v31 }
 0x22e   :  { %v220_v52 = vmul.f32 %v249_v49, %v210_v50 }
 0x22f   :  { %v292_v53 = vpop.eup %291 }
 0x230   :  { %v294_v54 = vpop.eup %293  ;;  %v230_v55 = vadd.f32 %v250_v51, %v220_v52  ;;  %v212_v56 = vmul.f32 %v292_v53, %v191_v33 }
 0x231   :  { %v211_v57 = vmul.f32 %v294_v54, %v190_v36 }
 0x232   :  { %233 = vst [vmem:[%s396_s6] sm:$0xff] %v230_v55  ;;  %v222_v58 = vmul.f32 %v249_v49, %v212_v56 }
 0x233   :  { %v221_v59 = vmul.f32 %v249_v49, %v211_v57 }
 0x234   :  { %v232_v60 = vadd.f32 %v250_v51, %v222_v58 }
 0x235   :  { %v231_v61 = vadd.f32 %v250_v51, %v221_v59 }
 0x236   :  { %235 = vst [vmem:[%s396_s6 + $0x10] sm:$0xff] %v232_v60 }
 0x237   :  { %234 = vst [vmem:[%s396_s6 + $0x8] sm:$0xff] %v231_v61 }

// kernel: _lambda_.42
= control target key start
LH: loop header
LB: loop body
LE: loop exit
PB: predicated region body
PF: predicated region fallthrough
CT: control target
= control target key end

     0   :  { %s283_s1 = inlined_call_operand.vmem [shape: bf16[128,128], index: 1, kind: input, shape index: {}]   ;;  %s284_s0 = inlined_call_operand.vmem [shape: f32[24,128], index: 0, kind: input, shape index: {}]   ;;  %s285_s2 = inlined_call_operand.vmem [shape: f32[1,128], index: 2, kind: input, shape index: {}]   ;;  %s286_s3 = inlined_call_operand.vmem [shape: f32[24,128], index: 3, kind: output, shape index: {}]  }
   0x1   :  { %v210_v0 = vld [vmem:[%s283_s1] sm:$0xff]   ;;  %v211_v1 = vld [vmem:[%s283_s1 + $0x8] sm:$0xff]   ;;  %v212_v2 = vld [vmem:[%s283_s1 + $0x10] sm:$0xff]  }
   0x2   :  { %190 = vmatprep.subr.bf16.mxu0 %v210_v0  ;;  %v213_v3 = vld [vmem:[%s283_s1 + $0x18] sm:$0xff]   ;;  %v25_v4 = vld [vmem:[%s284_s0] sm:$0xff]  ;;  %v26_v5 = vld [vmem:[%s284_s0 + $0x8] sm:$0xff] }
   0x3   :  { %191 = vmatpush3.bf16.msra.mxu0 %v210_v0  ;;  %v28_v6 = vpack.c.bf16 %v26_v5, %v25_v4  ;;  %v214_v7 = vld [vmem:[%s283_s1 + $0x20] sm:$0xff]   ;;  %v215_v8 = vld [vmem:[%s283_s1 + $0x28] sm:$0xff]   ;;  %v216_v9 = vld [vmem:[%s283_s1 + $0x30] sm:$0xff]  }
   0x4   :  { %192 = vmatprep.subr.bf16.mxu0 %v211_v1  ;;  %v217_v10 = vld [vmem:[%s283_s1 + $0x38] sm:$0xff]   ;;  %v27_v11 = vld [vmem:[%s284_s0 + $0x10] sm:$0xff]  ;;  %v179_v13 = vld [vmem:[%s285_s2] ss:$0 sm:$0xff] }
   0x5   :  { %206 = vmatprep.mubr.bf16.mxu0 %v28_v6  ;;  %v29_v12 = vpack.c.bf16 %v27_v11, %v27_v11 }
   0x7   :  { %193 = vmatpush3.bf16.msra.mxu0 %v211_v1 }
   0x8   :  { %194 = vmatprep.subr.bf16.mxu0 %v212_v2 }
   0xb   :  { %195 = vmatpush3.bf16.msra.mxu0 %v212_v2 }
   0xc   :  { %196 = vmatprep.subr.bf16.mxu0 %v213_v3 }
   0xf   :  { %197 = vmatpush3.bf16.msra.mxu0 %v213_v3 }
  0x10   :  { %198 = vmatprep.subr.bf16.mxu0 %v214_v7 }
  0x13   :  { %199 = vmatpush3.bf16.msra.mxu0 %v214_v7 }
  0x14   :  { %200 = vmatprep.subr.bf16.mxu0 %v215_v8 }
  0x17   :  { %201 = vmatpush3.bf16.msra.mxu0 %v215_v8 }
  0x18   :  { %202 = vmatprep.subr.bf16.mxu0 %v216_v9 }
  0x1b   :  { %203 = vmatpush3.bf16.msra.mxu0 %v216_v9 }
  0x1c   :  { %204 = vmatprep.subr.bf16.mxu0 %v217_v10 }
  0x1f   :  { %205 = vmatpush3.bf16.msra.mxu0 %v217_v10 }
  0x22   :  { %207 = vmatmul.mubr.bf16.vlgmr.msra.gmra.mrb[0].mxu0 %v29_v12 }
  0xf5   :  { %v208_v14 = vpop.f32.mrb[0].mxu0 }
  0xf6   :  { %v163_v15 = vadd.f32 %v208_v14, %v179_v13  ;;  %v128_v16 = vpop.f32.mrb[1].mxu0 }
  0xf7   :  { %v161_v17 = vadd.f32 %v179_v13, %v128_v16  ;;  %v209_v18 = vpop.f32.mrb[2].mxu0 }
  0xf8   :  { %166 = vst [vmem:[%s286_s3 + $0x10] sm:$0xff] %v163_v15  ;;  %v131_v19 = vpop.f32.mrb[3].mxu0 }
  0xf9   :  { %164 = vst [vmem:[%s286_s3] sm:$0xff] %v161_v17  ;;  %v162_v20 = vadd.f32 %v179_v13, %v131_v19 }
  0xfb   :  { %165 = vst [vmem:[%s286_s3 + $0x8] sm:$0xff] %v162_v20 }

// kernel: _lambda_.29
= control target key start
LH: loop header
LB: loop body
LE: loop exit
PB: predicated region body
PF: predicated region fallthrough
CT: control target
= control target key end

     0   :  { %s789_s12 = smov 0   ;;  %s791_s13 = smov 0   ;;  %s894_s0 = inlined_call_operand.vmem [shape: f32[16,128], index: 0, kind: input, shape index: {}]   ;;  %s895_s1 = inlined_call_operand.vmem [shape: bf16[128,384], index: 1, kind: input, shape index: {}]   ;;  %s896_s2 = inlined_call_operand.vmem [shape: f32[1,384], index: 2, kind: input, shape index: {}]   ;;  %s897_s3 = inlined_call_operand.vmem [shape: f32[16,384], index: 3, kind: output, shape index: {}]  }
   0x1   :  { %s793_s14 = smov 0   ;;  %s795_s15 = smov 0  }
   0x2   :  { %s797_s16 = smov 0  }
   0x3 LB: > { %s28_s17 = sadd.s32 1, %s761_s15  ;;  %s625_s18 = sadd.s32 4294967295, %s765_s16   ;;  %s765_s16 = sphi %s797_s16, %s13_s16   ;;  %s761_s15 = sphi %s795_s15, %s902_s15   ;;  %s757_s14 = sphi %s793_s14, %s901_s14   ;;  %s753_s13 = sphi %s791_s13, %s900_s13   ;;  %s749_s12 = sphi %s789_s12, %s899_s12  }
   0x4   : > { %p30_p0 = scmp.ge.s32.totalorder %s28_s17, 3  ;;  %p76_p1 = scmp.ne.s32.totalorder %s753_s13, %s749_s12 }
   0x5   : > { %p77_p2 = scmp.eq.s32.totalorder %s765_s16, 0  ;;  %p134_p4 = scmp.eq.s32.totalorder %s625_s18, 2 }
   0x6   : > { %s904_s17 = smov (%p30_p0, %s28_s17), 0  ;;  %s69_s20 = sadd.s32 1, %s753_s13 }
   0x7   : > { %p78_p3 = por %p77_p2, %p76_p1  ;;  %s65_s19 = ssub.s32 %s761_s15, %s904_s17 }
   0x8   : > { %p67_p5 = scmp.eq.s32.totalorder %s65_s19, 0  ;;  %p824_p6 = por %p134_p4, %p76_p1 }
   0x9   : > { %p629_p7 = scmp.ge.s32.totalorder %s765_s16, 3 }
   0xa   : > { %s829_s22 = scalar_select %p67_p5, %s753_s13, %s69_s20  }
   0xb   : > { %168 = sbr.rel (%p629_p7) target bundleno = 32 (0x20), region = 20 }
  0x12   : > { %171 = sbr.rel (!%p78_p3) target bundleno = 32 (0x20), region = 24  ;;  %s173_s23 = sand.u32 (%p78_p3), 1, %s753_s13  }
  0x13   : > { %s631_s24 = sshll.u32 (%p78_p3), %s761_s15, 2  ;;  %s630_s25 = sshll.u32 (%p78_p3), %s173_s23, 6 }
  0x14   : > { %s837_s28 = scalar_lea.vmem (%p78_p3), %s895_s1, %s631_s24  ;;  %s175_s29 = scalar_lea.vmem (%p78_p3), [#allocation3], %s630_s25 }
  0x15   : > { %v196_v0 = vld [vmem:[%s837_s28] sm:$0xf] (%p78_p3)  ;;  %v198_v1 = vld [vmem:[%s837_s28 + $0xc] sm:$0xf] (%p78_p3)  ;;  %v200_v2 = vld [vmem:[%s837_s28 + $0x18] sm:$0xf] (%p78_p3) }
  0x16   : > { %197 = vst [vmem:[%s175_s29] sm:$0xf] (%p78_p3), %v196_v0  ;;  %199 = vst [vmem:[%s175_s29 + $0x4] sm:$0xf] (%p78_p3), %v198_v1  ;;  %v202_v3 = vld [vmem:[%s837_s28 + $0x24] sm:$0xf] (%p78_p3) }
  0x17   : > { %v204_v4 = vld [vmem:[%s837_s28 + $0x30] sm:$0xf] (%p78_p3)  ;;  %201 = vst [vmem:[%s175_s29 + $0x8] sm:$0xf] (%p78_p3), %v200_v2  ;;  %203 = vst [vmem:[%s175_s29 + $0xc] sm:$0xf] (%p78_p3), %v202_v3 }
  0x18   : > { %205 = vst [vmem:[%s175_s29 + $0x10] sm:$0xf] (%p78_p3), %v204_v4  ;;  %v206_v5 = vld [vmem:[%s837_s28 + $0x3c] sm:$0xf] (%p78_p3)  ;;  %v208_v6 = vld [vmem:[%s837_s28 + $0x48] sm:$0xf] (%p78_p3) }
  0x19   : > { %v210_v7 = vld [vmem:[%s837_s28 + $0x54] sm:$0xf]  ;;  %207 = vst [vmem:[%s175_s29 + $0x14] sm:$0xf] %v206_v5  ;;  %209 = vst [vmem:[%s175_s29 + $0x18] sm:$0xf] %v208_v6 }
  0x1a   : > { %211 = vst [vmem:[%s175_s29 + $0x1c] sm:$0xf] %v210_v7  ;;  %v212_v8 = vld [vmem:[%s837_s28 + $0x60] sm:$0xf]  ;;  %v214_v9 = vld [vmem:[%s837_s28 + $0x6c] sm:$0xf] }
  0x1b   : > { %v216_v10 = vld [vmem:[%s837_s28 + $0x78] sm:$0xf]  ;;  %213 = vst [vmem:[%s175_s29 + $0x20] sm:$0xf] %v212_v8  ;;  %215 = vst [vmem:[%s175_s29 + $0x24] sm:$0xf] %v214_v9 }
  0x1c   : > { %217 = vst [vmem:[%s175_s29 + $0x28] sm:$0xf] %v216_v10  ;;  %v218_v11 = vld [vmem:[%s837_s28 + $0x84] sm:$0xf]  ;;  %v220_v12 = vld [vmem:[%s837_s28 + $0x90] sm:$0xf] }
  0x1d   : > { %v222_v13 = vld [vmem:[%s837_s28 + $0x9c] sm:$0xf]  ;;  %219 = vst [vmem:[%s175_s29 + $0x2c] sm:$0xf] %v218_v11  ;;  %221 = vst [vmem:[%s175_s29 + $0x30] sm:$0xf] %v220_v12 }
  0x1e   : > { %223 = vst [vmem:[%s175_s29 + $0x34] sm:$0xf] %v222_v13  ;;  %v224_v14 = vld [vmem:[%s837_s28 + $0xa8] sm:$0xf]  ;;  %v226_v15 = vld [vmem:[%s837_s28 + $0xb4] sm:$0xf] }
  0x1f   : > { %225 = vst [vmem:[%s175_s29 + $0x38] sm:$0xf] %v224_v14  ;;  %227 = vst [vmem:[%s175_s29 + $0x3c] sm:$0xf] %v226_v15 }
  0x20 PF: > { %p632_p8 = scmp.ge.s32.totalorder %s765_s16, 1  ;;  %p287_p9 = scmp.lt.s32.totalorder %s765_s16, 4 }
  0x22   : > { %p288_p10 = pnand %p632_p8, %p287_p9 }
  0x23   : > { %s294_s30 = sand.u32 (!%p288_p10), 1, %s749_s12   ;;  %v767_v16 = vmov (!%p288_p10), 0.0   ;;  %vm768_vm0 = vmmov (!%p288_p10), 0   ;;  %v350_v25 = vld [vmem:[%s894_s0] sm:$0xff] (!%p288_p10)  ;;  %v351_v26 = vld [vmem:[%s894_s0 + $0x8] sm:$0xff] (!%p288_p10)  ;;  %p337_p11 = scmp.lt.s32.totalorder (!%p288_p10), %s757_s14, 2 }
  0x24   : > { %291 = sbr.rel (%p288_p10) target bundleno = 295 (0x127), region = 69  ;;  %657 = vmatprep.subr.bf16.mxu0 (!%p288_p10), %v767_v16  ;;  %s633_s4 = sshll.u32 (!%p288_p10), %s294_s30, 6  ;;  %673 = vmatprep.mubr.msk.bf16.mxu0 (!%p288_p10), %vm768_vm0, %v767_v16  ;;  %v352_v27 = vpack.c.bf16 (!%p288_p10), %v351_v26, %v350_v25 }
  0x25   : > { %s296_s5 = scalar_lea.vmem (!%p288_p10), [#allocation3], %s633_s4  ;;  %s634_s20 = sshll.u32 (!%p288_p10), %s294_s30, 4 }
  0x26   : > { %v719_v17 = vld [vmem:[%s296_s5] sm:$0xff] (!%p288_p10)   ;;  %v720_v18 = vld [vmem:[%s296_s5 + $0x8] sm:$0xff] (!%p288_p10)   ;;  %v721_v19 = vld [vmem:[%s296_s5 + $0x10] sm:$0xff] (!%p288_p10)   ;;  %s326_s23 = scalar_lea.vmem (!%p288_p10), [#allocation4], %s634_s20 }
  0x27   : > { %658 = vmatpush3.bf16.msra.mxu0 (!%p288_p10), %v719_v17  ;;  %v722_v20 = vld [vmem:[%s296_s5 + $0x18] sm:$0xff] (!%p288_p10)   ;;  %v723_v21 = vld [vmem:[%s296_s5 + $0x20] sm:$0xff] (!%p288_p10)   ;;  %v724_v22 = vld [vmem:[%s296_s5 + $0x28] sm:$0xff] (!%p288_p10)  }
  0x28   : > { %659 = vmatprep.subr.bf16.mxu0 (!%p288_p10), %v767_v16  ;;  %v725_v23 = vld [vmem:[%s296_s5 + $0x30] sm:$0xff] (!%p288_p10)   ;;  %v726_v24 = vld [vmem:[%s296_s5 + $0x38] sm:$0xff] (!%p288_p10)  }
  0x2b   : > { %660 = vmatpush3.bf16.msra.mxu0 %v720_v18  ;;  %s338_s10 = scalar_select %p337_p11, %s757_s14, 2 }
  0x2c   : > { %661 = vmatprep.subr.bf16.mxu0 %v767_v16  ;;  %s645_s24 = sshll.u32 (%p824_p6), %s757_s14, 3 }
  0x2d   : > { %s339_s19 = scalar_lea.vmem %s896_s2, %s338_s10  ;;  %s489_s26 = scalar_lea.vmem (%p824_p6), %s897_s3, %s645_s24 }
  0x2e   : > { %v643_v28 = vld [vmem:[%s339_s19] ss:$0 sm:$0xff] }
  0x2f   : > { %662 = vmatpush3.bf16.msra.mxu0 %v721_v19 }
  0x30   : > { %663 = vmatprep.subr.bf16.mxu0 %v767_v16 }
  0x33   : > { %664 = vmatpush3.bf16.msra.mxu0 %v722_v20 }
  0x34   : > { %665 = vmatprep.subr.bf16.mxu0 %v767_v16 }
  0x37   : > { %666 = vmatpush3.bf16.msra.mxu0 %v723_v21 }
  0x38   : > { %667 = vmatprep.subr.bf16.mxu0 %v767_v16 }
  0x3b   : > { %668 = vmatpush3.bf16.msra.mxu0 %v724_v22 }
  0x3c   : > { %669 = vmatprep.subr.bf16.mxu0 %v767_v16 }
  0x3f   : > { %670 = vmatpush3.bf16.msra.mxu0 %v725_v23 }
  0x40   : > { %671 = vmatprep.subr.bf16.mxu0 %v767_v16 }
  0x43   : > { %672 = vmatpush3.bf16.msra.mxu0 %v726_v24 }
  0x46   : > { %674 = vmatmul.mubr.bf16.vlgmr.msra.gmra.mrb[0].mxu0 %v352_v27 }
 0x118   : > { %484 = sbr.rel (!%p824_p6) target bundleno = 295 (0x127), region = 85 }
 0x119   : > { %v451_v29 = vpop.f32.mrb[0].mxu0 }
 0x11a   : > { %v474_v30 = vadd.f32 %v643_v28, %v451_v29  ;;  %v675_v31 = vpop.f32.mrb[1].mxu0 }
 0x11b   : > { %v454_v32 = vpop.f32.mrb[2].mxu0 }
 0x11c   : > { %476 = vst [vmem:[%s326_s23] sm:$0xff] %v474_v30  ;;  %v475_v33 = vadd.f32 %v643_v28, %v454_v32  ;;  %v676_v34 = vpop.f32.mrb[3].mxu0 }
 0x11e   : > { %477 = vst [vmem:[%s326_s23 + $0x8] sm:$0xff] %v475_v33 }
 0x123   : > { %v519_v35 = vld [vmem:[%s326_s23] sm:$0xff] }
 0x124   : > { %520 = vst [vmem:[%s489_s26] sm:$0xff] %v519_v35 }
 0x125   : > { %v521_v36 = vld [vmem:[%s326_s23 + $0x8] sm:$0xff] }
 0x126   : > { %522 = vst [vmem:[%s489_s26 + $0x18] sm:$0xff] %v521_v36 }
 0x127 PF: > { %s13_s16 = sadd.s32 1, %s765_s16   ;;  %s899_s12 = smov %s753_s13 }
 0x128   : > { %p10_p12 = scmp.ge.s32.totalorder %s13_s16, 5   ;;  %s900_s13 = smov %s829_s22 }
 0x129   : > { %s901_s14 = smov %s761_s15  ;;  %s902_s15 = smov %s904_s17 }
 0x12a   :  { %12 = sbr.rel (!%p10_p12) target bundleno = 3 (0x3), region = 160 }

// kernel: _lambda_.31
= control target key start
LH: loop header
LB: loop body
LE: loop exit
PB: predicated region body
PF: predicated region fallthrough
CT: control target
= control target key end

     0   :  { %v263_v0 = vmov 0.0   ;;  %vm264_vm0 = vmmov 0   ;;  %s351_s1 = inlined_call_operand.vmem [shape: bf16[128,128], index: 1, kind: input, shape index: {}]   ;;  %s352_s0 = inlined_call_operand.vmem [shape: f32[16,128], index: 0, kind: input, shape index: {}]   ;;  %s353_s2 = inlined_call_operand.vmem [shape: f32[1,128], index: 2, kind: input, shape index: {}, may-alias: {2,5}]   ;;  %s354_s3 = inlined_call_operand.vmem [shape: f32[16,128], index: 3, kind: input, shape index: {}]   ;;  %s355_s4 = inlined_call_operand.vmem [shape: f32[1,128], index: 4, kind: input, shape index: {}]   ;;  %s356_s5 = inlined_call_operand.vmem [shape: f32[1,128], index: 5, kind: input, shape index: {}, may-alias: {2,5}]   ;;  %s357_s6 = inlined_call_operand.vmem [shape: f32[16,128], index: 6, kind: output, shape index: {}]  }
   0x1   :  { %229 = vmatprep.subr.bf16.mxu0 %v263_v0  ;;  %v251_v1 = vld [vmem:[%s351_s1] sm:$0xff]   ;;  %245 = vmatprep.mubr.msk.bf16.mxu0 %vm264_vm0, %v263_v0  ;;  %v252_v2 = vld [vmem:[%s351_s1 + $0x8] sm:$0xff]   ;;  %v253_v3 = vld [vmem:[%s351_s1 + $0x10] sm:$0xff]  }
   0x2   :  { %230 = vmatpush3.bf16.msra.mxu0 %v251_v1  ;;  %v254_v4 = vld [vmem:[%s351_s1 + $0x18] sm:$0xff]   ;;  %v255_v5 = vld [vmem:[%s351_s1 + $0x20] sm:$0xff]   ;;  %v256_v6 = vld [vmem:[%s351_s1 + $0x28] sm:$0xff]  }
   0x3   :  { %231 = vmatprep.subr.bf16.mxu0 %v263_v0  ;;  %v257_v7 = vld [vmem:[%s351_s1 + $0x30] sm:$0xff]   ;;  %v258_v8 = vld [vmem:[%s351_s1 + $0x38] sm:$0xff]   ;;  %v32_v9 = vld [vmem:[%s352_s0] sm:$0xff] }
   0x4   :  { %v33_v10 = vld [vmem:[%s352_s0 + $0x8] sm:$0xff]  ;;  %v217_v12 = vld [vmem:[%s353_s2] ss:$0 sm:$0xff] }
   0x5   :  { %v34_v11 = vpack.c.bf16 %v33_v10, %v32_v9  ;;  %v158_v14 = vld [vmem:[%s354_s3] sm:$0xff]  ;;  %v159_v21 = vld [vmem:[%s354_s3 + $0x8] sm:$0xff] }
   0x6   :  { %232 = vmatpush3.bf16.msra.mxu0 %v252_v2  ;;  %v218_v38 = vld [vmem:[%s355_s4] ss:$0 sm:$0xff] }
   0x7   :  { %233 = vmatprep.subr.bf16.mxu0 %v263_v0  ;;  %v219_v40 = vld [vmem:[%s356_s5] ss:$0 sm:$0xff] }
   0xa   :  { %234 = vmatpush3.bf16.msra.mxu0 %v253_v3 }
   0xb   :  { %235 = vmatprep.subr.bf16.mxu0 %v263_v0 }
   0xe   :  { %236 = vmatpush3.bf16.msra.mxu0 %v254_v4 }
   0xf   :  { %237 = vmatprep.subr.bf16.mxu0 %v263_v0 }
  0x12   :  { %238 = vmatpush3.bf16.msra.mxu0 %v255_v5 }
  0x13   :  { %239 = vmatprep.subr.bf16.mxu0 %v263_v0 }
  0x16   :  { %240 = vmatpush3.bf16.msra.mxu0 %v256_v6 }
  0x17   :  { %241 = vmatprep.subr.bf16.mxu0 %v263_v0 }
  0x1a   :  { %242 = vmatpush3.bf16.msra.mxu0 %v257_v7 }
  0x1b   :  { %243 = vmatprep.subr.bf16.mxu0 %v263_v0 }
  0x1e   :  { %244 = vmatpush3.bf16.msra.mxu0 %v258_v8 }
  0x21   :  { %246 = vmatmul.mubr.bf16.vlgmr.msra.gmra.mrb[0].mxu0 %v34_v11 }
  0xf4   :  { %v133_v13 = vpop.f32.mrb[0].mxu0 }
  0xf5   :  { %v156_v15 = vadd.f32 %v217_v12, %v133_v13  ;;  %v247_v16 = vpop.f32.mrb[1].mxu0 }
  0xf6   :  { %v136_v17 = vpop.f32.mrb[2].mxu0 }
  0xf7   :  { %v157_v18 = vadd.f32 %v217_v12, %v136_v17  ;;  %v248_v19 = vpop.f32.mrb[3].mxu0  ;;  %v160_v20 = vadd.f32 %v158_v14, %v156_v15 }
  0xf9   :  { %162 = vadd.xlane.f32.xlu0 %v160_v20  ;;  %v161_v22 = vadd.f32 %v159_v21, %v157_v18 }
  0xfd   :  { %164 = vadd.xlane.f32.xlu0 %v161_v22 }
 0x186   :  { %v163_v23 = vpop.xlane.xlu0 %162 }
 0x187   :  { %v167_v24 = vmul.f32 0.0078125, %v163_v23 }
 0x189   :  { %v169_v25 = vsub.f32 %v160_v20, %v167_v24 }
 0x18a   :  { %v165_v26 = vpop.xlane.xlu0 %164 }
 0x18b   :  { %v168_v27 = vmul.f32 0.0078125, %v165_v26  ;;  %v171_v28 = vmul.f32 %v169_v25, %v169_v25 }
 0x18d   :  { %v170_v29 = vsub.f32 %v161_v22, %v168_v27  ;;  %173 = vadd.xlane.f32.xlu1 %v171_v28 }
 0x18f   :  { %v172_v30 = vmul.f32 %v170_v29, %v170_v29 }
 0x191   :  { %175 = vadd.xlane.f32.xlu1 %v172_v30 }
 0x21a   :  { %v174_v31 = vpop.xlane.xlu1 %173 }
 0x21b   :  { %v177_v32 = vmul.f32 0.0078125, %v174_v31 }
 0x21d   :  { %v179_v33 = vadd.f32 1e-05, %v177_v32 }
 0x21e   :  { %v176_v34 = vpop.xlane.xlu1 %175 }
 0x21f   :  { %259 = vrsqrt.f32 %v179_v33  ;;  %v178_v35 = vmul.f32 0.0078125, %v176_v34 }
 0x221   :  { %v180_v36 = vadd.f32 1e-05, %v178_v35 }
 0x223   :  { %261 = vrsqrt.f32 %v180_v36 }
 0x229   :  { %v260_v37 = vpop.eup %259 }
 0x22a   :  { %v183_v39 = vmul.f32 %v260_v37, %v169_v25 }
 0x22c   :  { %v192_v41 = vmul.f32 %v218_v38, %v183_v39 }
 0x22d   :  { %v262_v42 = vpop.eup %261 }
 0x22e   :  { %v201_v43 = vadd.f32 %v219_v40, %v192_v41  ;;  %v184_v44 = vmul.f32 %v262_v42, %v170_v29 }
 0x230   :  { %203 = vst [vmem:[%s357_s6] sm:$0xff] %v201_v43  ;;  %v193_v45 = vmul.f32 %v218_v38, %v184_v44 }
 0x232   :  { %v202_v46 = vadd.f32 %v219_v40, %v193_v45 }
 0x234   :  { %204 = vst [vmem:[%s357_s6 + $0x8] sm:$0xff] %v202_v46 }

// kernel: _lambda_.30
= control target key start
LH: loop header
LB: loop body
LE: loop exit
PB: predicated region body
PF: predicated region fallthrough
CT: control target
= control target key end

     0   :  { %s891_s12 = smov 0   ;;  %s990_s0 = inlined_call_operand.vmem [shape: f32[2,8,128], index: 0, kind: input, shape index: {}]   ;;  %s991_s1 = inlined_call_operand.vmem [shape: f32[2,8,128], index: 1, kind: input, shape index: {}]   ;;  %s992_s2 = inlined_call_operand.vmem [shape: f32[2,8,128], index: 2, kind: input, shape index: {}]   ;;  %s993_s3 = inlined_call_operand.vmem [shape: f32[2,8,128], index: 3, kind: output, shape index: {}]  }
   0x1 LB: > { %s746_s13 = sadd.s32 4294967295, %s864_s12   ;;  %p750_p0 = scmp.ge.s32.totalorder %s864_s12, 1  ;;  %s864_s12 = sphi %s891_s12, %s13_s12  }
   0x2   : > { %p154_p1 = scmp.lt.s32.totalorder %s864_s12, 3 }
   0x4   : > { %p155_p2 = pnand %p750_p0, %p154_p1 }
   0x5   : > { %p184_p3 = scmp.lt.s32.totalorder (!%p155_p2), %s746_s13, 1  ;;  %v866_v0 = vmov (!%p155_p2), 0.0   ;;  %vm867_vm0 = vmmov (!%p155_p2), 0   ;;  %vm207_vm1 = vcmask (!%p155_p2), 261120   ;;  %vm255_vm2 = vcmask (!%p155_p2), 64512   ;;  %s868_s21 = smov (!%p155_p2), 96  }
   0x6   : > { %158 = sbr.rel (%p155_p2) target bundleno = 1477 (0x5c5), region = 32  ;;  %781 = vmatprep.subr.bf16.mxu0 (!%p155_p2), %v866_v0  ;;  %783 = vmatprep.mubr.msk.bf16.mxu0 (!%p155_p2), %vm867_vm0, %v866_v0  ;;  %s869_s22 = smov (!%p155_p2), 64   ;;  %vm271_vm3 = vcmask (!%p155_p2), 1043456   ;;  %vm664_vm4 = vcmask (!%p155_p2), 523264   ;;  %vm666_vm5 = vcmask (!%p155_p2), 785408  }
   0x7   : > { %787 = vmatprep.subr.bf16.mxu1 (!%p155_p2), %v866_v0  ;;  %789 = vmatprep.mubr.msk.bf16.mxu1 (!%p155_p2), %vm867_vm0, %v866_v0  ;;  %s870_s23 = smov (!%p155_p2), 32  }
   0xd   : > { %s995_s13 = smov (!%p184_p3, %s746_s13), 1 }
   0xe   : > { %s905_s14 = sshll.u32 %s995_s13, 3 }
   0xf   : > { %s191_s17 = scalar_lea.vmem %s991_s1, %s905_s14  ;;  %s187_s20 = scalar_lea.vmem %s990_s0, %s905_s14 }
  0x10   : > { %v203_v1 = vld [vmem:[%s191_s17] sm:$0xff]  ;;  %s195_s26 = scalar_lea.vmem %s992_s2, %s905_s14  ;;  %s199_s29 = scalar_lea.vmem %s993_s3, %s905_s14 }
  0x11   : > { %v204_v2 = vpack.c.bf16 %v203_v1, %v203_v1  ;;  %v201_v4 = vld [vmem:[%s187_s20] sm:$0xff] }
  0x12   : > { %v202_v5 = vpack.c.bf16 %v201_v4, %v201_v4  ;;  %v205_v17 = vld [vmem:[%s195_s26] sm:$0xff] }
  0x13   : > { %v212_v3 = vsel %vm207_vm1, %v204_v2, 0  ;;  %319 = vrot.lane.b32.xlu1 %v204_v2, %s868_s21  ;;  %v931_v18 = vpack.c.bf16 %v205_v17, %v205_v17 }
  0x14   : > { %782 = vmatpush3.bf16.xpose.msra.mxu0 %v212_v3 }
  0x15   : > { %799 = vmatprep.subr.bf16.mxu0 %v866_v0  ;;  %v273_v19 = vsel %vm271_vm3, %v931_v18, 0 }
  0x16   : > { %788 = vmatpush3.bf16.msra.mxu1 %v273_v19 }
  0x17   : > { %316 = vrot.lane.b32.xlu1 %v202_v5, %s868_s21  ;;  %793 = vmatprep.subr.bf16.mxu1 %v866_v0 }
  0x1b   : > { %784 = vmatmul.mubr.msk.bf16.vlgmr.msra.gmra.mrb[0].mxu0 %vm207_vm1, %v202_v5  ;;  %429 = vrot.lane.b32.xlu1 %v202_v5, %s869_s22 }
  0x1c   : > { %801 = vmatprep.mubr.msk.bf16.mxu0 %vm867_vm0, %v866_v0 }
  0x1f   : > { %542 = vrot.lane.b32.xlu1 %v204_v2, %s870_s23 }
  0x23   : > { %540 = vrot.lane.b32.xlu1 %v202_v5, %s870_s23 }
  0x85   : > { %v320_v22 = vpop.permute.xlu1 %319 }
  0x86   : > { %v325_v24 = vsel %vm207_vm1, %v320_v22, 0 }
  0x89   : > { %v317_v26 = vpop.permute.xlu1 %316 }
  0x8d   : > { %v430_v28 = vpop.permute.xlu1 %429 }
  0x91   : > { %v543_v30 = vpop.permute.xlu1 %542 }
  0x92   : > { %v548_v31 = vsel %vm207_vm1, %v543_v30, 0 }
  0x95   : > { %v541_v32 = vpop.permute.xlu1 %540 }
  0xee   : > { %v248_v6 = vpop.f32.mrb[0].mxu0 }
  0xef   : > { %v254_v7 = vmul.f32 0.17677669, %v248_v6  ;;  %v785_v8 = vpop.f32.mrb[1].mxu0 }
  0xf0   : > { %v251_v9 = vpop.f32.mrb[2].mxu0 }
  0xf1   : > { %v786_v10 = vpop.f32.mrb[3].mxu0  ;;  %v256_v11 = vsel %vm255_vm2, %v254_v7, -inf }
  0xf2   : > { %257 = vmax.xlane.f32.xlu0 %v256_v11 }
 0x17f   : > { %v258_v12 = vpop.xlane.xlu0 %257 }
 0x180   : > { %v259_v13 = vsub.f32 %v254_v7, %v258_v12 }
 0x182   : > { %v260_v14 = vmul.f32 1.442695, %v259_v13 }
 0x184   : > { %842 = vpow2.f32 %v260_v14 }
 0x18e   : > { %v843_v15 = vpop.eup %842 }
 0x18f   : > { %v262_v16 = vsel %vm255_vm2, %v843_v15, 0.0 }
 0x190   : > { %263 = vadd.xlane.f32.xlu0 %v262_v16 }
 0x1a6   : > { %431 = vrot.lane.b32.xlu0 %v204_v2, %s869_s22 }
 0x21d   : > { %v264_v20 = vpop.xlane.xlu0 %263 }
 0x21e   : > { %844 = vrcp.f32 %v264_v20 }
 0x221   : > { %v432_v27 = vpop.permute.xlu0 %431 }
 0x222   : > { %v437_v29 = vsel %vm207_vm1, %v432_v27, 0 }
 0x228   : > { %v845_v21 = vpop.eup %844 }
 0x229   : > { %v266_v23 = vmul.f32 %v845_v21, %v843_v15 }
 0x22b   : > { %v267_v25 = vpack.c.bf16 %v266_v23, %v266_v23 }
 0x22d   : > { %790 = vmatmul.mubr.msk.bf16.vlgmr.msra.gmra.mrb[0].mxu1 %vm255_vm2, %v267_v25 }
 0x22e   : > { %794 = vmatpush3.bf16.xpose.msra.mxu1 %v325_v24  ;;  %795 = vmatprep.mubr.msk.bf16.mxu1 %vm867_vm0, %v866_v0 }
 0x22f   : > { %805 = vmatprep.subr.bf16.mxu1 %v866_v0 }
 0x235   : > { %796 = vmatmul.mubr.msk.bf16.vlgmr.msra.gmra.mrb[4].mxu1 %vm207_vm1, %v317_v26 }
 0x236   : > { %806 = vmatpush3.bf16.xpose.msra.mxu1 %v437_v29  ;;  %807 = vmatprep.mubr.msk.bf16.mxu1 %vm867_vm0, %v866_v0 }
 0x237   : > { %817 = vmatprep.subr.bf16.mxu1 %v866_v0 }
 0x23d   : > { %808 = vmatmul.mubr.msk.bf16.vlgmr.msra.gmra.mrb[8].mxu1 %vm207_vm1, %v430_v28 }
 0x23e   : > { %818 = vmatpush3.bf16.xpose.msra.mxu1 %v548_v31  ;;  %819 = vmatprep.mubr.msk.bf16.mxu1 %vm867_vm0, %v866_v0 }
 0x245   : > { %820 = vmatmul.mubr.msk.bf16.vlgmr.msra.gmra.mrb[12].mxu1 %vm207_vm1, %v541_v32 }
 0x300   : > { %v952_v33 = vpop.f32.mrb[0].mxu1 }
 0x301   : > { %v791_v34 = vpop.f32.mrb[1].mxu1 }
 0x302   : > { %v312_v35 = vpop.f32.mrb[2].mxu1 }
 0x303   : > { %v792_v36 = vpop.f32.mrb[3].mxu1 }
 0x308   : > { %v361_v37 = vpop.f32.mrb[4].mxu1 }
 0x309   : > { %v367_v38 = vmul.f32 0.17677669, %v361_v37  ;;  %v797_v39 = vpop.f32.mrb[5].mxu1 }
 0x30a   : > { %v364_v40 = vpop.f32.mrb[6].mxu1 }
 0x30b   : > { %v798_v41 = vpop.f32.mrb[7].mxu1  ;;  %v368_v42 = vsel %vm255_vm2, %v367_v38, -inf }
 0x30c   : > { %369 = vmax.xlane.f32.xlu1 %v368_v42 }
 0x310   : > { %v473_v43 = vpop.f32.mrb[8].mxu1 }
 0x311   : > { %v479_v44 = vmul.f32 0.17677669, %v473_v43  ;;  %v809_v45 = vpop.f32.mrb[9].mxu1 }
 0x312   : > { %v476_v46 = vpop.f32.mrb[10].mxu1 }
 0x313   : > { %v480_v47 = vsel %vm255_vm2, %v479_v44, -inf  ;;  %v810_v48 = vpop.f32.mrb[11].mxu1 }
 0x314   : > { %481 = vmax.xlane.f32.xlu0 %v480_v47 }
 0x318   : > { %v584_v49 = vpop.f32.mrb[12].mxu1 }
 0x319   : > { %v590_v50 = vmul.f32 0.17677669, %v584_v49  ;;  %v821_v51 = vpop.f32.mrb[13].mxu1 }
 0x31a   : > { %v587_v52 = vpop.f32.mrb[14].mxu1 }
 0x31b   : > { %v591_v53 = vsel %vm255_vm2, %v590_v50, -inf  ;;  %v822_v54 = vpop.f32.mrb[15].mxu1 }
 0x31c   : > { %592 = vmax.xlane.f32.xlu1 %v591_v53 }
 0x399   : > { %v370_v55 = vpop.xlane.xlu1 %369 }
 0x39a   : > { %v371_v56 = vsub.f32 %v367_v38, %v370_v55 }
 0x39c   : > { %v372_v57 = vmul.f32 1.442695, %v371_v56 }
 0x39e   : > { %846 = vpow2.f32 %v372_v57 }
 0x3a1   : > { %v482_v58 = vpop.xlane.xlu0 %481 }
 0x3a2   : > { %v483_v59 = vsub.f32 %v479_v44, %v482_v58 }
 0x3a4   : > { %v484_v60 = vmul.f32 1.442695, %v483_v59 }
 0x3a6   : > { %848 = vpow2.f32 %v484_v60 }
 0x3a8   : > { %v847_v61 = vpop.eup %846 }
 0x3a9   : > { %v374_v62 = vsel %vm255_vm2, %v847_v61, 0.0  ;;  %v593_v2 = vpop.xlane.xlu1 %592 }
 0x3aa   : > { %375 = vadd.xlane.f32.xlu1 %v374_v62  ;;  %v594_v3 = vsub.f32 %v590_v50, %v593_v2 }
 0x3ac   : > { %v595_v4 = vmul.f32 1.442695, %v594_v3 }
 0x3ae   : > { %850 = vpow2.f32 %v595_v4 }
 0x3b0   : > { %v849_v63 = vpop.eup %848 }
 0x3b1   : > { %v486_v1 = vsel %vm255_vm2, %v849_v63, 0.0 }
 0x3b2   : > { %487 = vadd.xlane.f32.xlu0 %v486_v1 }
 0x3b8   : > { %v851_v5 = vpop.eup %850 }
 0x3b9   : > { %v597_v6 = vsel %vm255_vm2, %v851_v5, 0.0 }
 0x3bb   : > { %492 = vrot.lane.b32.xlu1 %v931_v18, %s869_s22 }
 0x3c8   : > { %381 = vrot.lane.b32.xlu0 %v931_v18, %s868_s21 }
 0x3df   : > { %598 = vadd.xlane.f32.xlu1 %v597_v6 }
 0x3f0   : > { %603 = vrot.lane.b32.xlu1 %v931_v18, %s870_s23 }
 0x437   : > { %v376_v7 = vpop.xlane.xlu1 %375 }
 0x438   : > { %852 = vrcp.f32 %v376_v7 }
 0x43b   : > { %v493_v13 = vpop.permute.xlu1 %492 }
 0x43c   : > { %v498_v15 = vsel %vm271_vm3, %v493_v13, 0 }
 0x43f   : > { %v488_v8 = vpop.xlane.xlu0 %487 }
 0x440   : > { %854 = vrcp.f32 %v488_v8 }
 0x442   : > { %v853_v9 = vpop.eup %852 }
 0x443   : > { %v378_v10 = vmul.f32 %v853_v9, %v847_v61  ;;  %v382_v11 = vpop.permute.xlu0 %381 }
 0x444   : > { %v387_v12 = vsel %vm271_vm3, %v382_v11, 0 }
 0x445   : > { %800 = vmatpush3.bf16.msra.mxu0 %v387_v12  ;;  %v379_v14 = vpack.c.bf16 %v378_v10, %v378_v10 }
 0x446   : > { %811 = vmatprep.subr.bf16.mxu0 %v866_v0 }
 0x448   : > { %802 = vmatmul.mubr.msk.bf16.vlgmr.msra.gmra.mrb[4].mxu0 %vm255_vm2, %v379_v14 }
 0x449   : > { %812 = vmatpush3.bf16.msra.mxu0 %v498_v15  ;;  %813 = vmatprep.mubr.msk.bf16.mxu0 %vm867_vm0, %v866_v0 }
 0x44a   : > { %v855_v16 = vpop.eup %854  ;;  %823 = vmatprep.subr.bf16.mxu0 %v866_v0 }
 0x44b   : > { %v490_v17 = vmul.f32 %v855_v16, %v849_v63 }
 0x44d   : > { %v491_v18 = vpack.c.bf16 %v490_v17, %v490_v17 }
 0x450   : > { %814 = vmatmul.mubr.msk.bf16.vlgmr.msra.gmra.mrb[8].mxu0 %vm255_vm2, %v491_v18 }
 0x451   : > { %825 = vmatprep.mubr.msk.bf16.mxu0 %vm867_vm0, %v866_v0 }
 0x46c   : > { %v599_v19 = vpop.xlane.xlu1 %598 }
 0x46d   : > { %856 = vrcp.f32 %v599_v19 }
 0x470   : > { %v604_v20 = vpop.permute.xlu1 %603 }
 0x471   : > { %v609_v21 = vsel %vm271_vm3, %v604_v20, 0 }
 0x472   : > { %824 = vmatpush3.bf16.msra.mxu0 %v609_v21 }
 0x477   : > { %v857_v22 = vpop.eup %856 }
 0x478   : > { %v601_v23 = vmul.f32 %v857_v22, %v851_v5 }
 0x47a   : > { %v602_v24 = vpack.c.bf16 %v601_v23, %v601_v23 }
 0x47c   : > { %826 = vmatmul.mubr.msk.bf16.vlgmr.msra.gmra.mrb[12].mxu0 %vm255_vm2, %v602_v24 }
 0x51b   : > { %v423_v25 = vpop.f32.mrb[4].mxu0 }
 0x51c   : > { %652 = vrot.lane.b32.xlu0 %v423_v25, %s870_s23  ;;  %v803_v26 = vpop.f32.mrb[5].mxu0 }
 0x51d   : > { %v426_v27 = vpop.f32.mrb[6].mxu0 }
 0x51e   : > { %v804_v28 = vpop.f32.mrb[7].mxu0 }
 0x523   : > { %v534_v29 = vpop.f32.mrb[8].mxu0 }
 0x524   : > { %656 = vrot.lane.b32.xlu1 %v534_v29, %s869_s22  ;;  %v815_v0 = vpop.f32.mrb[9].mxu0 }
 0x525   : > { %v537_v30 = vpop.f32.mrb[10].mxu0 }
 0x526   : > { %v816_v31 = vpop.f32.mrb[11].mxu0 }
 0x54f   : > { %v645_v32 = vpop.f32.mrb[12].mxu0 }
 0x550   : > { %660 = vrot.lane.b32.xlu0 %v645_v32, %s868_s21  ;;  %v827_v34 = vpop.f32.mrb[13].mxu0 }
 0x551   : > { %v648_v35 = vpop.f32.mrb[14].mxu0 }
 0x552   : > { %v828_v36 = vpop.f32.mrb[15].mxu0 }
 0x58e   : > { %v653_v37 = vpop.permute.xlu0 %652 }
 0x58f   : > { %v663_v39 = vsel %vm207_vm1, %v952_v33, %v653_v37 }
 0x596   : > { %v657_v38 = vpop.permute.xlu1 %656 }
 0x597   : > { %v665_v40 = vsel %vm664_vm4, %v663_v39, %v657_v38 }
 0x5c2   : > { %v661_v41 = vpop.permute.xlu0 %660 }
 0x5c3   : > { %v667_v42 = vsel %vm666_vm5, %v665_v40, %v661_v41 }
 0x5c4   : > { %668 = vst [vmem:[%s199_s29] sm:$0xff] %v667_v42 }
 0x5c5 PF: > { %s13_s12 = sadd.s32 1, %s864_s12  }
 0x5c6   : > { %p10_p4 = scmp.ge.s32.totalorder %s13_s12, 4  }
 0x5c8   :  { %12 = sbr.rel (!%p10_p4) target bundleno = 1 (0x1), region = 68 }

// kernel: _lambda_.33
= control target key start
LH: loop header
LB: loop body
LE: loop exit
PB: predicated region body
PF: predicated region fallthrough
CT: control target
= control target key end

     0   :  { %s453_s1 = inlined_call_operand.vmem [shape: bf16[256,128], index: 1, kind: input, shape index: {}]   ;;  %s454_s0 = inlined_call_operand.vmem [shape: f32[16,256], index: 0, kind: input, shape index: {}]   ;;  %s455_s2 = inlined_call_operand.vmem [shape: f32[1,128], index: 2, kind: input, shape index: {}, may-alias: {2,5}]   ;;  %s456_s3 = inlined_call_operand.vmem [shape: f32[16,128], index: 3, kind: input, shape index: {}]   ;;  %s457_s4 = inlined_call_operand.vmem [shape: f32[1,128], index: 4, kind: input, shape index: {}]   ;;  %s458_s5 = inlined_call_operand.vmem [shape: f32[1,128], index: 5, kind: input, shape index: {}, may-alias: {2,5}]   ;;  %s459_s6 = inlined_call_operand.vmem [shape: f32[16,128], index: 6, kind: output, shape index: {}]  }
   0x1   :  { %v317_v0 = vld [vmem:[%s453_s1 + $0x40] sm:$0xff]   ;;  %v319_v2 = vld [vmem:[%s453_s1 + $0x48] sm:$0xff]   ;;  %v321_v4 = vld [vmem:[%s453_s1 + $0x50] sm:$0xff]  }
   0x2   :  { %v318_v1 = vld [vmem:[%s453_s1] sm:$0xff]   ;;  %295 = vmatprep.subr.bf16.mxu0 %v317_v0  ;;  %v320_v3 = vld [vmem:[%s453_s1 + $0x8] sm:$0xff]   ;;  %v322_v5 = vld [vmem:[%s453_s1 + $0x10] sm:$0xff]  }
   0x3   :  { %296 = vmatpush3.bf16.msra.mxu0 %v318_v1  ;;  %v323_v6 = vld [vmem:[%s453_s1 + $0x58] sm:$0xff]   ;;  %v325_v8 = vld [vmem:[%s453_s1 + $0x60] sm:$0xff]   ;;  %v327_v10 = vld [vmem:[%s453_s1 + $0x68] sm:$0xff]  }
   0x4   :  { %297 = vmatprep.subr.bf16.mxu0 %v319_v2  ;;  %v324_v7 = vld [vmem:[%s453_s1 + $0x18] sm:$0xff]   ;;  %v326_v9 = vld [vmem:[%s453_s1 + $0x20] sm:$0xff]   ;;  %v33_v11 = vld [vmem:[%s454_s0 + $0x8] sm:$0xff] }
   0x5   :  { %v35_v12 = vld [vmem:[%s454_s0 + $0x18] sm:$0xff]  ;;  %v328_v14 = vld [vmem:[%s453_s1 + $0x28] sm:$0xff]   ;;  %v329_v15 = vld [vmem:[%s453_s1 + $0x70] sm:$0xff]  }
   0x6   :  { %v37_v13 = vpack.c.bf16 %v35_v12, %v33_v11  ;;  %v330_v16 = vld [vmem:[%s453_s1 + $0x30] sm:$0xff]   ;;  %v331_v17 = vld [vmem:[%s453_s1 + $0x78] sm:$0xff]   ;;  %v32_v19 = vld [vmem:[%s454_s0] sm:$0xff] }
   0x7   :  { %298 = vmatpush3.bf16.msra.mxu0 %v320_v3  ;;  %v332_v18 = vld [vmem:[%s453_s1 + $0x38] sm:$0xff]   ;;  %v34_v20 = vld [vmem:[%s454_s0 + $0x10] sm:$0xff]  ;;  %v292_v24 = vld [vmem:[%s455_s2] ss:$0 sm:$0xff] }
   0x8   :  { %299 = vmatprep.subr.bf16.mxu0 %v321_v4  ;;  %198 = vmatprep.mubr.bf16.mxu0 %v37_v13  ;;  %v36_v21 = vpack.c.bf16 %v34_v20, %v32_v19  ;;  %v225_v28 = vld [vmem:[%s456_s3] sm:$0xff]  ;;  %v226_v33 = vld [vmem:[%s456_s3 + $0x8] sm:$0xff] }
   0x9   :  { %v293_v50 = vld [vmem:[%s457_s4] ss:$0 sm:$0xff] }
   0xa   :  { %v294_v52 = vld [vmem:[%s458_s5] ss:$0 sm:$0xff] }
   0xb   :  { %300 = vmatpush3.bf16.msra.mxu0 %v322_v5 }
   0xc   :  { %301 = vmatprep.subr.bf16.mxu0 %v323_v6 }
   0xf   :  { %302 = vmatpush3.bf16.msra.mxu0 %v324_v7 }
  0x10   :  { %303 = vmatprep.subr.bf16.mxu0 %v325_v8 }
  0x13   :  { %304 = vmatpush3.bf16.msra.mxu0 %v326_v9 }
  0x14   :  { %305 = vmatprep.subr.bf16.mxu0 %v327_v10 }
  0x17   :  { %306 = vmatpush3.bf16.msra.mxu0 %v328_v14 }
  0x18   :  { %307 = vmatprep.subr.bf16.mxu0 %v329_v15 }
  0x1b   :  { %308 = vmatpush3.bf16.msra.mxu0 %v330_v16 }
  0x1c   :  { %309 = vmatprep.subr.bf16.mxu0 %v331_v17 }
  0x1f   :  { %310 = vmatpush3.bf16.msra.mxu0 %v332_v18 }
  0x22   :  { %199 = vmatmul.mubr.bf16.vlgmr.msra.gmra.mrb[0].mxu0 %v36_v21 }
  0xf5   :  { %v311_v22 = vpop.f32.mrb[0].mxu0 }
  0xf6   :  { %v312_v23 = vpop.f32.mrb[1].mxu0 }
  0xf7   :  { %v313_v25 = vadd.f32 %v312_v23, %v311_v22  ;;  %v314_v26 = vpop.f32.mrb[2].mxu0 }
  0xf8   :  { %v315_v27 = vpop.f32.mrb[3].mxu0 }
  0xf9   :  { %v223_v29 = vadd.f32 %v313_v25, %v292_v24  ;;  %v316_v30 = vadd.f32 %v315_v27, %v314_v26 }
  0xfb   :  { %v224_v31 = vadd.f32 %v316_v30, %v292_v24  ;;  %v227_v32 = vadd.f32 %v225_v28, %v223_v29 }
  0xfd   :  { %229 = vadd.xlane.f32.xlu0 %v227_v32  ;;  %v228_v34 = vadd.f32 %v226_v33, %v224_v31 }
 0x101   :  { %231 = vadd.xlane.f32.xlu0 %v228_v34 }
 0x18a   :  { %v230_v35 = vpop.xlane.xlu0 %229 }
 0x18b   :  { %v234_v36 = vmul.f32 0.0078125, %v230_v35 }
 0x18d   :  { %v236_v37 = vsub.f32 %v227_v32, %v234_v36 }
 0x18e   :  { %v232_v38 = vpop.xlane.xlu0 %231 }
 0x18f   :  { %v235_v39 = vmul.f32 0.0078125, %v232_v38  ;;  %v238_v40 = vmul.f32 %v236_v37, %v236_v37 }
 0x191   :  { %v237_v41 = vsub.f32 %v228_v34, %v235_v39  ;;  %240 = vadd.xlane.f32.xlu1 %v238_v40 }
 0x193   :  { %v239_v42 = vmul.f32 %v237_v41, %v237_v41 }
 0x195   :  { %242 = vadd.xlane.f32.xlu1 %v239_v42 }
 0x21e   :  { %v241_v43 = vpop.xlane.xlu1 %240 }
 0x21f   :  { %v244_v44 = vmul.f32 0.0078125, %v241_v43 }
 0x221   :  { %v246_v45 = vadd.f32 1e-05, %v244_v44 }
 0x222   :  { %v243_v46 = vpop.xlane.xlu1 %242 }
 0x223   :  { %333 = vrsqrt.f32 %v246_v45  ;;  %v245_v47 = vmul.f32 0.0078125, %v243_v46 }
 0x225   :  { %v247_v48 = vadd.f32 1e-05, %v245_v47 }
 0x227   :  { %335 = vrsqrt.f32 %v247_v48 }
 0x22d   :  { %v334_v49 = vpop.eup %333 }
 0x22e   :  { %v250_v51 = vmul.f32 %v334_v49, %v236_v37 }
 0x230   :  { %v259_v53 = vmul.f32 %v293_v50, %v250_v51 }
 0x231   :  { %v336_v54 = vpop.eup %335 }
 0x232   :  { %v268_v55 = vadd.f32 %v294_v52, %v259_v53  ;;  %v251_v56 = vmul.f32 %v336_v54, %v237_v41 }
 0x234   :  { %270 = vst [vmem:[%s459_s6] sm:$0xff] %v268_v55  ;;  %v260_v57 = vmul.f32 %v293_v50, %v251_v56 }
 0x236   :  { %v269_v58 = vadd.f32 %v294_v52, %v260_v57 }
 0x238   :  { %271 = vst [vmem:[%s459_s6 + $0x8] sm:$0xff] %v269_v58 }

// kernel: _lambda_.32
= control target key start
LH: loop header
LB: loop body
LE: loop exit
PB: predicated region body
PF: predicated region fallthrough
CT: control target
= control target key end

     0   :  { %v253_v1 = vmov 0   ;;  %v186_v20 = vlaneseq  ;;  %s343_s1 = inlined_call_operand.vmem [shape: bf16[128,256], index: 1, kind: input, shape index: {}]   ;;  %s344_s0 = inlined_call_operand.vmem [shape: f32[16,128], index: 0, kind: input, shape index: {}]   ;;  %s345_s2 = inlined_call_operand.vmem [shape: f32[1,256], index: 2, kind: input, shape index: {}]   ;;  %s346_s3 = inlined_call_operand.vmem [shape: f32[16,256], index: 3, kind: output, shape index: {}]  }
   0x1   :  { %v229_v0 = vld [vmem:[%s343_s1 + $0x4] ss:$8 sps:$4 sm:$0xff]   ;;  %158 = vmatprep.mubr.bf16.mxu0 %v253_v1  ;;  %v231_v2 = vld [vmem:[%s343_s1] ss:$8 sps:$4 sm:$0xff]   ;;  %v232_v3 = vld [vmem:[%s343_s1 + $0x14] ss:$8 sps:$4 sm:$0xff]  }
   0x2   :  { %126 = vmatprep.subr.bf16.mxu0 %v229_v0  ;;  %v234_v4 = vld [vmem:[%s343_s1 + $0x10] ss:$8 sps:$4 sm:$0xff]   ;;  %v235_v5 = vld [vmem:[%s343_s1 + $0x24] ss:$8 sps:$4 sm:$0xff]   ;;  %v237_v6 = vld [vmem:[%s343_s1 + $0x20] ss:$8 sps:$4 sm:$0xff]  }
   0x3   :  { %127 = vmatpush1.bf16.msra.mxu0 %v231_v2  ;;  %v238_v7 = vld [vmem:[%s343_s1 + $0x34] ss:$8 sps:$4 sm:$0xff]   ;;  %v240_v8 = vld [vmem:[%s343_s1 + $0x30] ss:$8 sps:$4 sm:$0xff]   ;;  %v241_v9 = vld [vmem:[%s343_s1 + $0x44] ss:$8 sps:$4 sm:$0xff]  }
   0x4   :  { %128 = vmatprep.subr.bf16.mxu0 %v232_v3  ;;  %v243_v10 = vld [vmem:[%s343_s1 + $0x40] ss:$8 sps:$4 sm:$0xff]   ;;  %v244_v11 = vld [vmem:[%s343_s1 + $0x54] ss:$8 sps:$4 sm:$0xff]   ;;  %v246_v12 = vld [vmem:[%s343_s1 + $0x50] ss:$8 sps:$4 sm:$0xff]  }
   0x5   :  { %v247_v13 = vld [vmem:[%s343_s1 + $0x64] ss:$8 sps:$4 sm:$0xff]   ;;  %v249_v14 = vld [vmem:[%s343_s1 + $0x60] ss:$8 sps:$4 sm:$0xff]   ;;  %v250_v15 = vld [vmem:[%s343_s1 + $0x74] ss:$8 sps:$4 sm:$0xff]  }
   0x6   :  { %v252_v16 = vld [vmem:[%s343_s1 + $0x70] ss:$8 sps:$4 sm:$0xff]   ;;  %v27_v17 = vld [vmem:[%s344_s0] sm:$0xff]  ;;  %v28_v18 = vld [vmem:[%s344_s0 + $0x8] sm:$0xff]  ;;  %v187_v21 = vshrl.u32 %v186_v20, 7 }
   0x7   :  { %129 = vmatpush1.bf16.msra.mxu0 %v234_v4  ;;  %v29_v19 = vpack.c.bf16 %v28_v18, %v27_v17  ;;  %v184_v23 = vld [vmem:[%s345_s2] sm:$0x3] }
   0x8   :  { %130 = vmatprep.subr.bf16.mxu0 %v235_v5  ;;  %v188_v22 = vsub.s32 0, %v187_v21  ;;  %v192_v24 = vsub.s32 1, %v187_v21 }
   0xa   :  { %v189_v25 = vrot.slane %v184_v23, %v188_v22  ;;  %v193_v26 = vrot.slane %v184_v23, %v192_v24 }
   0xb   :  { %131 = vmatpush1.bf16.msra.mxu0 %v237_v6 }
   0xc   :  { %132 = vmatprep.subr.bf16.mxu0 %v238_v7 }
   0xf   :  { %133 = vmatpush1.bf16.msra.mxu0 %v240_v8 }
  0x10   :  { %134 = vmatprep.subr.bf16.mxu0 %v241_v9 }
  0x13   :  { %135 = vmatpush1.bf16.msra.mxu0 %v243_v10 }
  0x14   :  { %136 = vmatprep.subr.bf16.mxu0 %v244_v11 }
  0x17   :  { %137 = vmatpush1.bf16.msra.mxu0 %v246_v12 }
  0x18   :  { %138 = vmatprep.subr.bf16.mxu0 %v247_v13 }
  0x1b   :  { %139 = vmatpush1.bf16.msra.mxu0 %v249_v14 }
  0x1c   :  { %140 = vmatprep.subr.bf16.mxu0 %v250_v15 }
  0x1f   :  { %141 = vmatpush1.bf16.msra.mxu0 %v252_v16 }
  0x22   :  { %159 = vmatmul.mubr.bf16.vlgmr.msra.gmra.mrb[0].mxu0 %v29_v19 }
  0xf5   :  { %v160_v27 = vpop.f32.mrb[0].mxu0 }
  0xf6   :  { %v196_v28 = vadd.f32 %v189_v25, %v160_v27  ;;  %v162_v29 = vpop.f32.mrb[1].mxu0 }
  0xf7   :  { %v197_v30 = vadd.f32 %v193_v26, %v162_v29  ;;  %v164_v31 = vpop.f32.mrb[2].mxu0 }
  0xf8   :  { %v200_v32 = vmax.f32 %v196_v28, 0.0  ;;  %v198_v33 = vadd.f32 %v189_v25, %v164_v31  ;;  %v166_v34 = vpop.f32.mrb[3].mxu0 }
  0xf9   :  { %v201_v35 = vmax.f32 %v197_v30, 0.0  ;;  %v199_v36 = vadd.f32 %v193_v26, %v166_v34 }
  0xfa   :  { %204 = vst [vmem:[%s346_s3] sm:$0xff] %v200_v32  ;;  %v202_v37 = vmax.f32 %v198_v33, 0.0 }
  0xfb   :  { %205 = vst [vmem:[%s346_s3 + $0x8] sm:$0xff] %v201_v35  ;;  %v203_v38 = vmax.f32 %v199_v36, 0.0 }
  0xfc   :  { %206 = vst [vmem:[%s346_s3 + $0x10] sm:$0xff] %v202_v37 }
  0xfd   :  { %207 = vst [vmem:[%s346_s3 + $0x18] sm:$0xff] %v203_v38 }

// kernel: _lambda_.43
= control target key start
LH: loop header
LB: loop body
LE: loop exit
PB: predicated region body
PF: predicated region fallthrough
CT: control target
= control target key end

     0   :  { %v249_v1 = vmov 0   ;;  %v186_v20 = vlaneseq  ;;  %s339_s1 = inlined_call_operand.vmem [shape: bf16[128,256], index: 1, kind: input, shape index: {}]   ;;  %s340_s0 = inlined_call_operand.vmem [shape: f32[16,128], index: 0, kind: input, shape index: {}]   ;;  %s341_s2 = inlined_call_operand.vmem [shape: f32[1,256], index: 2, kind: input, shape index: {}]   ;;  %s342_s3 = inlined_call_operand.vmem [shape: f32[16,256], index: 3, kind: output, shape index: {}]  }
   0x1   :  { %v225_v0 = vld [vmem:[%s339_s1 + $0x4] ss:$8 sps:$4 sm:$0xff]   ;;  %158 = vmatprep.mubr.bf16.mxu0 %v249_v1  ;;  %v227_v2 = vld [vmem:[%s339_s1] ss:$8 sps:$4 sm:$0xff]   ;;  %v228_v3 = vld [vmem:[%s339_s1 + $0x14] ss:$8 sps:$4 sm:$0xff]  }
   0x2   :  { %126 = vmatprep.subr.bf16.mxu0 %v225_v0  ;;  %v230_v4 = vld [vmem:[%s339_s1 + $0x10] ss:$8 sps:$4 sm:$0xff]   ;;  %v231_v5 = vld [vmem:[%s339_s1 + $0x24] ss:$8 sps:$4 sm:$0xff]   ;;  %v233_v6 = vld [vmem:[%s339_s1 + $0x20] ss:$8 sps:$4 sm:$0xff]  }
   0x3   :  { %127 = vmatpush1.bf16.msra.mxu0 %v227_v2  ;;  %v234_v7 = vld [vmem:[%s339_s1 + $0x34] ss:$8 sps:$4 sm:$0xff]   ;;  %v236_v8 = vld [vmem:[%s339_s1 + $0x30] ss:$8 sps:$4 sm:$0xff]   ;;  %v237_v9 = vld [vmem:[%s339_s1 + $0x44] ss:$8 sps:$4 sm:$0xff]  }
   0x4   :  { %128 = vmatprep.subr.bf16.mxu0 %v228_v3  ;;  %v239_v10 = vld [vmem:[%s339_s1 + $0x40] ss:$8 sps:$4 sm:$0xff]   ;;  %v240_v11 = vld [vmem:[%s339_s1 + $0x54] ss:$8 sps:$4 sm:$0xff]   ;;  %v242_v12 = vld [vmem:[%s339_s1 + $0x50] ss:$8 sps:$4 sm:$0xff]  }
   0x5   :  { %v243_v13 = vld [vmem:[%s339_s1 + $0x64] ss:$8 sps:$4 sm:$0xff]   ;;  %v245_v14 = vld [vmem:[%s339_s1 + $0x60] ss:$8 sps:$4 sm:$0xff]   ;;  %v246_v15 = vld [vmem:[%s339_s1 + $0x74] ss:$8 sps:$4 sm:$0xff]  }
   0x6   :  { %v248_v16 = vld [vmem:[%s339_s1 + $0x70] ss:$8 sps:$4 sm:$0xff]   ;;  %v27_v17 = vld [vmem:[%s340_s0] sm:$0xff]  ;;  %v28_v18 = vld [vmem:[%s340_s0 + $0x8] sm:$0xff]  ;;  %v187_v21 = vshrl.u32 %v186_v20, 7 }
   0x7   :  { %129 = vmatpush1.bf16.msra.mxu0 %v230_v4  ;;  %v29_v19 = vpack.c.bf16 %v28_v18, %v27_v17  ;;  %v184_v23 = vld [vmem:[%s341_s2] sm:$0x3] }
   0x8   :  { %130 = vmatprep.subr.bf16.mxu0 %v231_v5  ;;  %v188_v22 = vsub.s32 0, %v187_v21  ;;  %v192_v24 = vsub.s32 1, %v187_v21 }
   0xa   :  { %v189_v25 = vrot.slane %v184_v23, %v188_v22  ;;  %v193_v26 = vrot.slane %v184_v23, %v192_v24 }
   0xb   :  { %131 = vmatpush1.bf16.msra.mxu0 %v233_v6 }
   0xc   :  { %132 = vmatprep.subr.bf16.mxu0 %v234_v7 }
   0xf   :  { %133 = vmatpush1.bf16.msra.mxu0 %v236_v8 }
  0x10   :  { %134 = vmatprep.subr.bf16.mxu0 %v237_v9 }
  0x13   :  { %135 = vmatpush1.bf16.msra.mxu0 %v239_v10 }
  0x14   :  { %136 = vmatprep.subr.bf16.mxu0 %v240_v11 }
  0x17   :  { %137 = vmatpush1.bf16.msra.mxu0 %v242_v12 }
  0x18   :  { %138 = vmatprep.subr.bf16.mxu0 %v243_v13 }
  0x1b   :  { %139 = vmatpush1.bf16.msra.mxu0 %v245_v14 }
  0x1c   :  { %140 = vmatprep.subr.bf16.mxu0 %v246_v15 }
  0x1f   :  { %141 = vmatpush1.bf16.msra.mxu0 %v248_v16 }
  0x22   :  { %159 = vmatmul.mubr.bf16.vlgmr.msra.gmra.mrb[0].mxu0 %v29_v19 }
  0xf5   :  { %v160_v27 = vpop.f32.mrb[0].mxu0 }
  0xf6   :  { %v196_v28 = vadd.f32 %v189_v25, %v160_v27  ;;  %v162_v29 = vpop.f32.mrb[1].mxu0 }
  0xf7   :  { %v197_v30 = vadd.f32 %v193_v26, %v162_v29  ;;  %v164_v31 = vpop.f32.mrb[2].mxu0 }
  0xf8   :  { %200 = vst [vmem:[%s342_s3] sm:$0xff] %v196_v28  ;;  %v198_v32 = vadd.f32 %v189_v25, %v164_v31  ;;  %v166_v33 = vpop.f32.mrb[3].mxu0 }
  0xf9   :  { %201 = vst [vmem:[%s342_s3 + $0x8] sm:$0xff] %v197_v30  ;;  %v199_v34 = vadd.f32 %v193_v26, %v166_v33 }
  0xfa   :  { %202 = vst [vmem:[%s342_s3 + $0x10] sm:$0xff] %v198_v32 }
  0xfb   :  { %203 = vst [vmem:[%s342_s3 + $0x18] sm:$0xff] %v199_v34 }

// kernel: _lambda_.46
= control target key start
LH: loop header
LB: loop body
LE: loop exit
PB: predicated region body
PF: predicated region fallthrough
CT: control target
= control target key end

     0   :  { %v295_v1 = vmov 0   ;;  %v206_v22 = vlaneseq  ;;  %s394_s1 = inlined_call_operand.vmem [shape: bf16[128,256], index: 1, kind: input, shape index: {}]   ;;  %s395_s0 = inlined_call_operand.vmem [shape: f32[24,128], index: 0, kind: input, shape index: {}]   ;;  %s396_s2 = inlined_call_operand.vmem [shape: f32[1,256], index: 2, kind: input, shape index: {}]   ;;  %s397_s3 = inlined_call_operand.vmem [shape: f32[24,256], index: 3, kind: output, shape index: {}]  }
   0x1   :  { %v271_v0 = vld [vmem:[%s394_s1 + $0x4] ss:$8 sps:$4 sm:$0xff]   ;;  %164 = vmatprep.mubr.bf16.mxu0 %v295_v1  ;;  %174 = vmatprep.mubr.bf16.mxu1 %v295_v1  ;;  %v273_v2 = vld [vmem:[%s394_s1] ss:$8 sps:$4 sm:$0xff]   ;;  %v274_v3 = vld [vmem:[%s394_s1 + $0x14] ss:$8 sps:$4 sm:$0xff]  }
   0x2   :  { %132 = vmatprep.subr.bf16.mxu0 %v271_v0  ;;  %254 = vmatprep.subr.bf16.mxu1 %v271_v0  ;;  %v276_v4 = vld [vmem:[%s394_s1 + $0x10] ss:$8 sps:$4 sm:$0xff]   ;;  %v277_v5 = vld [vmem:[%s394_s1 + $0x24] ss:$8 sps:$4 sm:$0xff]   ;;  %v279_v6 = vld [vmem:[%s394_s1 + $0x20] ss:$8 sps:$4 sm:$0xff]  }
   0x3   :  { %133 = vmatpush1.bf16.msra.mxu0 %v273_v2  ;;  %262 = vmatpush1.bf16.msra.mxu1 %v273_v2  ;;  %v280_v7 = vld [vmem:[%s394_s1 + $0x34] ss:$8 sps:$4 sm:$0xff]   ;;  %v282_v8 = vld [vmem:[%s394_s1 + $0x30] ss:$8 sps:$4 sm:$0xff]   ;;  %v283_v9 = vld [vmem:[%s394_s1 + $0x44] ss:$8 sps:$4 sm:$0xff]  }
   0x4   :  { %134 = vmatprep.subr.bf16.mxu0 %v274_v3  ;;  %255 = vmatprep.subr.bf16.mxu1 %v274_v3  ;;  %v285_v10 = vld [vmem:[%s394_s1 + $0x40] ss:$8 sps:$4 sm:$0xff]   ;;  %v286_v11 = vld [vmem:[%s394_s1 + $0x54] ss:$8 sps:$4 sm:$0xff]   ;;  %v288_v12 = vld [vmem:[%s394_s1 + $0x50] ss:$8 sps:$4 sm:$0xff]  }
   0x5   :  { %v289_v13 = vld [vmem:[%s394_s1 + $0x64] ss:$8 sps:$4 sm:$0xff]   ;;  %v291_v14 = vld [vmem:[%s394_s1 + $0x60] ss:$8 sps:$4 sm:$0xff]   ;;  %v292_v15 = vld [vmem:[%s394_s1 + $0x74] ss:$8 sps:$4 sm:$0xff]  }
   0x6   :  { %v294_v16 = vld [vmem:[%s394_s1 + $0x70] ss:$8 sps:$4 sm:$0xff]   ;;  %v31_v17 = vld [vmem:[%s395_s0] sm:$0xff]  ;;  %v32_v18 = vld [vmem:[%s395_s0 + $0x8] sm:$0xff]  ;;  %v207_v23 = vshrl.u32 %v206_v22, 7 }
   0x7   :  { %135 = vmatpush1.bf16.msra.mxu0 %v276_v4  ;;  %263 = vmatpush1.bf16.msra.mxu1 %v276_v4  ;;  %v33_v19 = vld [vmem:[%s395_s0 + $0x10] sm:$0xff]  ;;  %v34_v20 = vpack.c.bf16 %v32_v18, %v31_v17  ;;  %v204_v25 = vld [vmem:[%s396_s2] sm:$0x3] }
   0x8   :  { %136 = vmatprep.subr.bf16.mxu0 %v277_v5  ;;  %256 = vmatprep.subr.bf16.mxu1 %v277_v5  ;;  %v35_v21 = vpack.c.bf16 %v33_v19, %v33_v19  ;;  %v208_v24 = vsub.s32 0, %v207_v23  ;;  %v212_v26 = vsub.s32 1, %v207_v23 }
   0xa   :  { %v209_v27 = vrot.slane %v204_v25, %v208_v24  ;;  %v213_v28 = vrot.slane %v204_v25, %v212_v26 }
   0xb   :  { %137 = vmatpush1.bf16.msra.mxu0 %v279_v6  ;;  %264 = vmatpush1.bf16.msra.mxu1 %v279_v6 }
   0xc   :  { %138 = vmatprep.subr.bf16.mxu0 %v280_v7  ;;  %257 = vmatprep.subr.bf16.mxu1 %v280_v7 }
   0xf   :  { %139 = vmatpush1.bf16.msra.mxu0 %v282_v8  ;;  %265 = vmatpush1.bf16.msra.mxu1 %v282_v8 }
  0x10   :  { %140 = vmatprep.subr.bf16.mxu0 %v283_v9  ;;  %258 = vmatprep.subr.bf16.mxu1 %v283_v9 }
  0x13   :  { %141 = vmatpush1.bf16.msra.mxu0 %v285_v10  ;;  %266 = vmatpush1.bf16.msra.mxu1 %v285_v10 }
  0x14   :  { %142 = vmatprep.subr.bf16.mxu0 %v286_v11  ;;  %259 = vmatprep.subr.bf16.mxu1 %v286_v11 }
  0x17   :  { %143 = vmatpush1.bf16.msra.mxu0 %v288_v12  ;;  %267 = vmatpush1.bf16.msra.mxu1 %v288_v12 }
  0x18   :  { %144 = vmatprep.subr.bf16.mxu0 %v289_v13  ;;  %260 = vmatprep.subr.bf16.mxu1 %v289_v13 }
  0x1b   :  { %145 = vmatpush1.bf16.msra.mxu0 %v291_v14  ;;  %268 = vmatpush1.bf16.msra.mxu1 %v291_v14 }
  0x1c   :  { %146 = vmatprep.subr.bf16.mxu0 %v292_v15  ;;  %261 = vmatprep.subr.bf16.mxu1 %v292_v15 }
  0x1f   :  { %147 = vmatpush1.bf16.msra.mxu0 %v294_v16  ;;  %269 = vmatpush1.bf16.msra.mxu1 %v294_v16 }
  0x22   :  { %165 = vmatmul.mubr.bf16.vlgmr.msra.gmra.mrb[0].mxu0 %v34_v20  ;;  %175 = vmatmul.mubr.bf16.vlgmr.msra.gmra.mrb[0].mxu1 %v35_v21 }
  0xf5   :  { %v166_v29 = vpop.f32.mrb[0].mxu0  ;;  %v176_v30 = vpop.f32.mrb[0].mxu1 }
  0xf6   :  { %v216_v31 = vadd.f32 %v209_v27, %v166_v29  ;;  %v220_v32 = vadd.f32 %v209_v27, %v176_v30  ;;  %v168_v33 = vpop.f32.mrb[1].mxu0  ;;  %v178_v34 = vpop.f32.mrb[1].mxu1 }
  0xf7   :  { %v217_v35 = vadd.f32 %v213_v28, %v168_v33  ;;  %v221_v36 = vadd.f32 %v213_v28, %v178_v34  ;;  %v170_v37 = vpop.f32.mrb[2].mxu0  ;;  %v180_v38 = vpop.f32.mrb[2].mxu1 }
  0xf8   :  { %v222_v39 = vmax.f32 %v216_v31, 0.0  ;;  %v226_v40 = vmax.f32 %v220_v32, 0.0  ;;  %v218_v41 = vadd.f32 %v209_v27, %v170_v37  ;;  %v172_v42 = vpop.f32.mrb[3].mxu0  ;;  %v181_v43 = vpop.f32.mrb[3].mxu1 }
  0xf9   :  { %v223_v44 = vmax.f32 %v217_v35, 0.0  ;;  %v227_v45 = vmax.f32 %v221_v36, 0.0  ;;  %v219_v46 = vadd.f32 %v213_v28, %v172_v42 }
  0xfa   :  { %228 = vst [vmem:[%s397_s3] sm:$0xff] %v222_v39  ;;  %232 = vst [vmem:[%s397_s3 + $0x20] sm:$0xff] %v226_v40  ;;  %v224_v47 = vmax.f32 %v218_v41, 0.0 }
  0xfb   :  { %229 = vst [vmem:[%s397_s3 + $0x8] sm:$0xff] %v223_v44  ;;  %233 = vst [vmem:[%s397_s3 + $0x28] sm:$0xff] %v227_v45  ;;  %v225_v48 = vmax.f32 %v219_v46, 0.0 }
  0xfc   :  { %230 = vst [vmem:[%s397_s3 + $0x10] sm:$0xff] %v224_v47 }
  0xfd   :  { %231 = vst [vmem:[%s397_s3 + $0x18] sm:$0xff] %v225_v48 }

// kernel: _lambda_.44
= control target key start
LH: loop header
LB: loop body
LE: loop exit
PB: predicated region body
PF: predicated region fallthrough
CT: control target
= control target key end

     0   :  { %s992_s12 = smov 0   ;;  %s1112_s0 = inlined_call_operand.vmem [shape: f32[2,9,128], index: 0, kind: input, shape index: {}]   ;;  %s1113_s1 = inlined_call_operand.vmem [shape: f32[2,8,128], index: 1, kind: input, shape index: {}]   ;;  %s1114_s2 = inlined_call_operand.vmem [shape: f32[2,8,128], index: 2, kind: input, shape index: {}]   ;;  %s1115_s3 = inlined_call_operand.vmem [shape: f32[2,9,128], index: 3, kind: output, shape index: {}]  }
   0x1 LB: > { %s827_s13 = sadd.s32 4294967295, %s965_s12   ;;  %p831_p0 = scmp.ge.s32.totalorder %s965_s12, 1  ;;  %s965_s12 = sphi %s992_s12, %s13_s12  }
   0x2   : > { %p155_p1 = scmp.lt.s32.totalorder %s965_s12, 3 }
   0x4   : > { %p156_p2 = pnand %p831_p0, %p155_p1 }
   0x5   : > { %p187_p3 = scmp.lt.s32.totalorder (!%p156_p2), %s827_s13, 1  ;;  %v967_v0 = vmov (!%p156_p2), 0.0   ;;  %vm968_vm0 = vmmov (!%p156_p2), 0   ;;  %vm213_vm1 = vcmask (!%p156_p2), 261120   ;;  %vm263_vm2 = vcmask (!%p156_p2), 64512   ;;  %s969_s22 = smov (!%p156_p2), 96  }
   0x6   : > { %159 = sbr.rel (%p156_p2) target bundleno = 1495 (0x5d7), region = 32  ;;  %866 = vmatprep.subr.bf16.mxu0 (!%p156_p2), %v967_v0  ;;  %868 = vmatprep.mubr.msk.bf16.mxu0 (!%p156_p2), %vm968_vm0, %v967_v0  ;;  %vm267_vm3 = vcmask (!%p156_p2), 57344   ;;  %s970_s23 = smov (!%p156_p2), 32   ;;  %vm291_vm4 = vcmask (!%p156_p2), 1043456   ;;  %vm740_vm5 = vcmask (!%p156_p2), 523264   ;;  %vm743_vm6 = vcmask (!%p156_p2), 785408  }
   0x7   : > { %872 = vmatprep.subr.bf16.mxu1 (!%p156_p2), %v967_v0  ;;  %874 = vmatprep.mubr.msk.bf16.mxu1 (!%p156_p2), %vm968_vm0, %v967_v0  ;;  %s971_s27 = smov (!%p156_p2), 64  }
   0xd   : > { %s1117_s13 = smov (!%p187_p3, %s827_s13), 1 }
   0xe   : > { %s834_s14 = sshll.u32 %s1117_s13, 3  ;;  %s848_s15 = sshll.u32 %s1117_s13, 4 }
   0xf   : > { %s195_s18 = scalar_lea.vmem %s1113_s1, %s834_s14  ;;  %s191_s21 = scalar_lea.vmem %s1112_s0, %s848_s15 }
  0x10   : > { %v209_v1 = vld [vmem:[%s195_s18] sm:$0xff]  ;;  %v207_v5 = vld [vmem:[%s191_s21 + $0x8] sm:$0x1]  ;;  %s199_s26 = scalar_lea.vmem %s1114_s2, %s834_s14  ;;  %s204_s30 = scalar_lea.vmem %s1115_s3, %s848_s15 }
  0x11   : > { %v210_v2 = vpack.c.bf16 %v209_v1, %v209_v1  ;;  %v206_v4 = vld [vmem:[%s191_s21] sm:$0xff] }
  0x12   : > { %v208_v6 = vpack.c.bf16 %v207_v5, %v206_v4  ;;  %v211_v25 = vld [vmem:[%s199_s26] sm:$0xff] }
  0x13   : > { %v218_v3 = vsel %vm213_vm1, %v210_v2, 0  ;;  %v1036_v26 = vpack.c.bf16 %v211_v25, %v211_v25 }
  0x14   : > { %867 = vmatpush3.bf16.xpose.msra.mxu0 %v218_v3 }
  0x15   : > { %884 = vmatprep.subr.bf16.mxu0 %v967_v0  ;;  %v293_v27 = vsel %vm291_vm4, %v1036_v26, 0 }
  0x16   : > { %873 = vmatpush3.bf16.msra.mxu1 %v293_v27 }
  0x17   : > { %878 = vmatprep.subr.bf16.mxu1 %v967_v0 }
  0x1b   : > { %869 = vmatmul.mubr.msk.bf16.vlgmr.msra.gmra.mrb[0].mxu0 %vm213_vm1, %v208_v6 }
  0x1c   : > { %886 = vmatprep.mubr.msk.bf16.mxu0 %vm968_vm0, %v967_v0 }
  0xee   : > { %v254_v7 = vpop.f32.mrb[0].mxu0 }
  0xef   : > { %v261_v8 = vmul.f32 0.17677669, %v254_v7  ;;  %v870_v9 = vpop.f32.mrb[1].mxu0 }
  0xf0   : > { %v257_v10 = vpop.f32.mrb[2].mxu0 }
  0xf1   : > { %v262_v11 = vmul.f32 0.17677669, %v257_v10  ;;  %v871_v12 = vpop.f32.mrb[3].mxu0  ;;  %v264_v13 = vsel %vm263_vm2, %v261_v8, -inf }
  0xf2   : > { %265 = vmax.xlane.f32.xlu0 %v264_v13 }
  0xf3   : > { %v268_v14 = vsel %vm267_vm3, %v262_v11, -inf }
  0xf6   : > { %269 = vmax.xlane.f32.xlu0 %v268_v14 }
 0x10c   : > { %340 = vrot.lane.b32.xlu0 %v210_v2, %s969_s22 }
 0x110   : > { %591 = vrot.lane.b32.xlu0 %v210_v2, %s970_s23 }
 0x17f   : > { %v266_v15 = vpop.xlane.xlu0 %265 }
 0x180   : > { %v271_v16 = vsub.f32 %v261_v8, %v266_v15 }
 0x182   : > { %v273_v17 = vmul.f32 1.442695, %v271_v16 }
 0x183   : > { %v270_v18 = vpop.xlane.xlu0 %269 }
 0x184   : > { %927 = vpow2.f32 %v273_v17  ;;  %v272_v19 = vsub.f32 %v262_v11, %v270_v18 }
 0x186   : > { %v275_v20 = vmul.f32 1.442695, %v272_v19 }
 0x187   : > { %v341_v32 = vpop.permute.xlu0 %340 }
 0x188   : > { %929 = vpow2.f32 %v275_v20  ;;  %v346_v36 = vsel %vm213_vm1, %v341_v32, 0 }
 0x18b   : > { %v592_v40 = vpop.permute.xlu0 %591 }
 0x18c   : > { %v597_v42 = vsel %vm213_vm1, %v592_v40, 0 }
 0x18e   : > { %v928_v21 = vpop.eup %927 }
 0x18f   : > { %v277_v22 = vsel %vm263_vm2, %v928_v21, 0.0 }
 0x190   : > { %278 = vadd.xlane.f32.xlu1 %v277_v22 }
 0x192   : > { %v930_v23 = vpop.eup %929 }
 0x193   : > { %v280_v24 = vsel %vm267_vm3, %v930_v23, 0.0 }
 0x194   : > { %281 = vadd.xlane.f32.xlu1 %v280_v24 }
 0x1a5   : > { %337 = vrot.lane.b32.xlu1 %v208_v6, %s969_s22 }
 0x1a9   : > { %466 = vrot.lane.b32.xlu1 %v210_v2, %s971_s27 }
 0x1ad   : > { %464 = vrot.lane.b32.xlu1 %v208_v6, %s971_s27 }
 0x1b1   : > { %589 = vrot.lane.b32.xlu1 %v208_v6, %s970_s23 }
 0x21d   : > { %v279_v28 = vpop.xlane.xlu1 %278 }
 0x21e   : > { %931 = vrcp.f32 %v279_v28 }
 0x221   : > { %v282_v29 = vpop.xlane.xlu1 %281 }
 0x222   : > { %933 = vrcp.f32 %v282_v29 }
 0x225   : > { %v338_v35 = vpop.permute.xlu1 %337 }
 0x228   : > { %v932_v30 = vpop.eup %931 }
 0x229   : > { %v285_v33 = vmul.f32 %v932_v30, %v928_v21  ;;  %v467_v38 = vpop.permute.xlu1 %466 }
 0x22a   : > { %v472_v39 = vsel %vm213_vm1, %v467_v38, 0 }
 0x22c   : > { %v934_v31 = vpop.eup %933 }
 0x22d   : > { %v286_v34 = vmul.f32 %v934_v31, %v930_v23  ;;  %v465_v41 = vpop.permute.xlu1 %464 }
 0x22f   : > { %v287_v37 = vpack.c.bf16 %v286_v34, %v285_v33 }
 0x231   : > { %875 = vmatmul.mubr.msk.bf16.vlgmr.msra.gmra.mrb[0].mxu1 %vm263_vm2, %v287_v37  ;;  %v590_v43 = vpop.permute.xlu1 %589 }
 0x232   : > { %879 = vmatpush3.bf16.xpose.msra.mxu1 %v346_v36  ;;  %880 = vmatprep.mubr.msk.bf16.mxu1 %vm968_vm0, %v967_v0 }
 0x233   : > { %890 = vmatprep.subr.bf16.mxu1 %v967_v0 }
 0x239   : > { %881 = vmatmul.mubr.msk.bf16.vlgmr.msra.gmra.mrb[4].mxu1 %vm213_vm1, %v338_v35 }
 0x23a   : > { %891 = vmatpush3.bf16.xpose.msra.mxu1 %v472_v39  ;;  %892 = vmatprep.mubr.msk.bf16.mxu1 %vm968_vm0, %v967_v0 }
 0x23b   : > { %902 = vmatprep.subr.bf16.mxu1 %v967_v0 }
 0x241   : > { %893 = vmatmul.mubr.msk.bf16.vlgmr.msra.gmra.mrb[8].mxu1 %vm213_vm1, %v465_v41 }
 0x242   : > { %903 = vmatpush3.bf16.xpose.msra.mxu1 %v597_v42  ;;  %904 = vmatprep.mubr.msk.bf16.mxu1 %vm968_vm0, %v967_v0 }
 0x249   : > { %905 = vmatmul.mubr.msk.bf16.vlgmr.msra.gmra.mrb[12].mxu1 %vm213_vm1, %v590_v43 }
 0x304   : > { %v1060_v44 = vpop.f32.mrb[0].mxu1 }
 0x305   : > { %v876_v45 = vpop.f32.mrb[1].mxu1 }
 0x306   : > { %v1062_v46 = vpop.f32.mrb[2].mxu1 }
 0x307   : > { %v877_v47 = vpop.f32.mrb[3].mxu1 }
 0x30c   : > { %v382_v48 = vpop.f32.mrb[4].mxu1 }
 0x30d   : > { %v389_v49 = vmul.f32 0.17677669, %v382_v48  ;;  %v882_v50 = vpop.f32.mrb[5].mxu1 }
 0x30e   : > { %v385_v51 = vpop.f32.mrb[6].mxu1 }
 0x30f   : > { %v390_v52 = vmul.f32 0.17677669, %v385_v51  ;;  %v883_v53 = vpop.f32.mrb[7].mxu1  ;;  %v391_v54 = vsel %vm263_vm2, %v389_v49, -inf }
 0x310   : > { %392 = vmax.xlane.f32.xlu0 %v391_v54 }
 0x311   : > { %v394_v55 = vsel %vm267_vm3, %v390_v52, -inf }
 0x312   : > { %395 = vmax.xlane.f32.xlu1 %v394_v55 }
 0x314   : > { %v508_v56 = vpop.f32.mrb[8].mxu1 }
 0x315   : > { %v515_v57 = vmul.f32 0.17677669, %v508_v56  ;;  %v894_v58 = vpop.f32.mrb[9].mxu1 }
 0x316   : > { %v511_v59 = vpop.f32.mrb[10].mxu1 }
 0x317   : > { %v516_v60 = vmul.f32 0.17677669, %v511_v59  ;;  %v895_v61 = vpop.f32.mrb[11].mxu1  ;;  %v517_v62 = vsel %vm263_vm2, %v515_v57, -inf }
 0x318   : > { %518 = vmax.xlane.f32.xlu0 %v517_v62 }
 0x319   : > { %v520_v63 = vsel %vm267_vm3, %v516_v60, -inf }
 0x31c   : > { %521 = vmax.xlane.f32.xlu0 %v520_v63  ;;  %v633_v1 = vpop.f32.mrb[12].mxu1 }
 0x31d   : > { %v640_v2 = vmul.f32 0.17677669, %v633_v1  ;;  %v906_v3 = vpop.f32.mrb[13].mxu1 }
 0x31e   : > { %v636_v4 = vpop.f32.mrb[14].mxu1 }
 0x31f   : > { %v641_v5 = vmul.f32 0.17677669, %v636_v4  ;;  %v642_v6 = vsel %vm263_vm2, %v640_v2, -inf  ;;  %v907_v7 = vpop.f32.mrb[15].mxu1 }
 0x320   : > { %643 = vmax.xlane.f32.xlu0 %v642_v6 }
 0x321   : > { %v645_v8 = vsel %vm267_vm3, %v641_v5, -inf }
 0x322   : > { %646 = vmax.xlane.f32.xlu1 %v645_v8 }
 0x39d   : > { %v393_v9 = vpop.xlane.xlu0 %392 }
 0x39e   : > { %v397_v10 = vsub.f32 %v389_v49, %v393_v9 }
 0x39f   : > { %v396_v11 = vpop.xlane.xlu1 %395 }
 0x3a0   : > { %v399_v12 = vmul.f32 1.442695, %v397_v10  ;;  %v398_v13 = vsub.f32 %v390_v52, %v396_v11 }
 0x3a2   : > { %935 = vpow2.f32 %v399_v12  ;;  %v401_v14 = vmul.f32 1.442695, %v398_v13 }
 0x3a4   : > { %937 = vpow2.f32 %v401_v14 }
 0x3a5   : > { %v519_v15 = vpop.xlane.xlu0 %518 }
 0x3a6   : > { %v523_v16 = vsub.f32 %v515_v57, %v519_v15 }
 0x3a8   : > { %v525_v17 = vmul.f32 1.442695, %v523_v16 }
 0x3a9   : > { %v522_v18 = vpop.xlane.xlu0 %521 }
 0x3aa   : > { %939 = vpow2.f32 %v525_v17  ;;  %v524_v19 = vsub.f32 %v516_v60, %v522_v18 }
 0x3ac   : > { %v936_v20 = vpop.eup %935  ;;  %v527_v21 = vmul.f32 1.442695, %v524_v19 }
 0x3ad   : > { %v644_v22 = vpop.xlane.xlu0 %643  ;;  %v403_v23 = vsel %vm263_vm2, %v936_v20, 0.0 }
 0x3ae   : > { %v938_v24 = vpop.eup %937  ;;  %941 = vpow2.f32 %v527_v21  ;;  %v648_v25 = vsub.f32 %v640_v2, %v644_v22  ;;  %404 = vadd.xlane.f32.xlu0 %v403_v23 }
 0x3af   : > { %v406_v27 = vsel %vm267_vm3, %v938_v24, 0.0  ;;  %v647_v35 = vpop.xlane.xlu1 %646 }
 0x3b0   : > { %v650_v28 = vmul.f32 1.442695, %v648_v25  ;;  %407 = vadd.xlane.f32.xlu1 %v406_v27  ;;  %v649_v36 = vsub.f32 %v641_v5, %v647_v35 }
 0x3b2   : > { %943 = vpow2.f32 %v650_v28  ;;  %v652_v37 = vmul.f32 1.442695, %v649_v36 }
 0x3b4   : > { %v940_v29 = vpop.eup %939  ;;  %945 = vpow2.f32 %v652_v37 }
 0x3b5   : > { %v529_v30 = vsel %vm263_vm2, %v940_v29, 0.0 }
 0x3b6   : > { %530 = vadd.xlane.f32.xlu0 %v529_v30 }
 0x3b8   : > { %v942_v31 = vpop.eup %941 }
 0x3b9   : > { %v532_v32 = vsel %vm267_vm3, %v942_v31, 0.0 }
 0x3ba   : > { %533 = vadd.xlane.f32.xlu1 %v532_v32 }
 0x3bc   : > { %v944_v33 = vpop.eup %943 }
 0x3bd   : > { %v654_v34 = vsel %vm263_vm2, %v944_v33, 0.0 }
 0x3be   : > { %655 = vadd.xlane.f32.xlu0 %v654_v34  ;;  %v946_v38 = vpop.eup %945 }
 0x3bf   : > { %v657_v39 = vsel %vm267_vm3, %v946_v38, 0.0 }
 0x3cb   : > { %540 = vrot.lane.b32.xlu1 %v1036_v26, %s971_s27 }
 0x3d4   : > { %415 = vrot.lane.b32.xlu0 %v1036_v26, %s969_s22 }
 0x3ef   : > { %658 = vadd.xlane.f32.xlu1 %v657_v39 }
 0x400   : > { %665 = vrot.lane.b32.xlu1 %v1036_v26, %s970_s23 }
 0x43b   : > { %v405_v41 = vpop.xlane.xlu0 %404 }
 0x43d   : > { %v408_v40 = vpop.xlane.xlu1 %407 }
 0x43e   : > { %947 = vrcp.f32 %v408_v40 }
 0x43f   : > { %949 = vrcp.f32 %v405_v41 }
 0x443   : > { %v531_v42 = vpop.xlane.xlu0 %530 }
 0x447   : > { %v534_v43 = vpop.xlane.xlu1 %533 }
 0x448   : > { %951 = vrcp.f32 %v534_v43  ;;  %v948_v45 = vpop.eup %947 }
 0x449   : > { %953 = vrcp.f32 %v531_v42  ;;  %v950_v48 = vpop.eup %949  ;;  %v412_v49 = vmul.f32 %v948_v45, %v938_v24 }
 0x44a   : > { %v411_v51 = vmul.f32 %v950_v48, %v936_v20 }
 0x44b   : > { %v656_v47 = vpop.xlane.xlu0 %655  ;;  %v541_v53 = vpop.permute.xlu1 %540 }
 0x44c   : > { %v413_v54 = vpack.c.bf16 %v412_v49, %v411_v51  ;;  %v546_v55 = vsel %vm291_vm4, %v541_v53, 0  ;;  %955 = vrcp.f32 %v656_v47 }
 0x44f   : > { %v416_v50 = vpop.permute.xlu0 %415 }
 0x450   : > { %v421_v52 = vsel %vm291_vm4, %v416_v50, 0 }
 0x451   : > { %885 = vmatpush3.bf16.msra.mxu0 %v421_v52 }
 0x452   : > { %896 = vmatprep.subr.bf16.mxu0 %v967_v0  ;;  %v952_v26 = vpop.eup %951 }
 0x453   : > { %v954_v56 = vpop.eup %953  ;;  %v538_v57 = vmul.f32 %v952_v26, %v942_v31 }
 0x454   : > { %887 = vmatmul.mubr.msk.bf16.vlgmr.msra.gmra.mrb[4].mxu0 %vm263_vm2, %v413_v54  ;;  %v537_v58 = vmul.f32 %v954_v56, %v940_v29 }
 0x455   : > { %897 = vmatpush3.bf16.msra.mxu0 %v546_v55  ;;  %898 = vmatprep.mubr.msk.bf16.mxu0 %vm968_vm0, %v967_v0 }
 0x456   : > { %908 = vmatprep.subr.bf16.mxu0 %v967_v0  ;;  %v539_v59 = vpack.c.bf16 %v538_v57, %v537_v58  ;;  %v956_v63 = vpop.eup %955 }
 0x457   : > { %v662_v2 = vmul.f32 %v956_v63, %v944_v33 }
 0x45c   : > { %899 = vmatmul.mubr.msk.bf16.vlgmr.msra.gmra.mrb[8].mxu0 %vm263_vm2, %v539_v59 }
 0x45d   : > { %910 = vmatprep.mubr.msk.bf16.mxu0 %vm968_vm0, %v967_v0 }
 0x47c   : > { %v659_v60 = vpop.xlane.xlu1 %658 }
 0x47d   : > { %957 = vrcp.f32 %v659_v60 }
 0x480   : > { %v666_v61 = vpop.permute.xlu1 %665 }
 0x481   : > { %v671_v62 = vsel %vm291_vm4, %v666_v61, 0 }
 0x482   : > { %909 = vmatpush3.bf16.msra.mxu0 %v671_v62 }
 0x487   : > { %v958_v1 = vpop.eup %957 }
 0x488   : > { %v663_v3 = vmul.f32 %v958_v1, %v946_v38 }
 0x48a   : > { %v664_v4 = vpack.c.bf16 %v663_v3, %v662_v2 }
 0x48c   : > { %911 = vmatmul.mubr.msk.bf16.vlgmr.msra.gmra.mrb[12].mxu0 %vm263_vm2, %v664_v4 }
 0x527   : > { %v457_v5 = vpop.f32.mrb[4].mxu0 }
 0x528   : > { %716 = vrot.lane.b32.xlu1 %v457_v5, %s970_s23  ;;  %v888_v6 = vpop.f32.mrb[5].mxu0 }
 0x529   : > { %v460_v7 = vpop.f32.mrb[6].mxu0 }
 0x52a   : > { %718 = vrot.lane.b32.xlu0 %v460_v7, %s970_s23  ;;  %v889_v0 = vpop.f32.mrb[7].mxu0 }
 0x52f   : > { %v582_v8 = vpop.f32.mrb[8].mxu0 }
 0x530   : > { %724 = vrot.lane.b32.xlu1 %v582_v8, %s971_s27  ;;  %v900_v9 = vpop.f32.mrb[9].mxu0 }
 0x531   : > { %v585_v10 = vpop.f32.mrb[10].mxu0 }
 0x532   : > { %726 = vrot.lane.b32.xlu0 %v585_v10, %s971_s27  ;;  %v901_v11 = vpop.f32.mrb[11].mxu0 }
 0x55f   : > { %v707_v12 = vpop.f32.mrb[12].mxu0 }
 0x560   : > { %732 = vrot.lane.b32.xlu1 %v707_v12, %s969_s22  ;;  %v912_v13 = vpop.f32.mrb[13].mxu0 }
 0x561   : > { %v710_v14 = vpop.f32.mrb[14].mxu0 }
 0x562   : > { %734 = vrot.lane.b32.xlu0 %v710_v14, %s969_s22  ;;  %v913_v15 = vpop.f32.mrb[15].mxu0 }
 0x59a   : > { %v717_v16 = vpop.permute.xlu1 %716 }
 0x59b   : > { %v738_v20 = vsel %vm213_vm1, %v1060_v44, %v717_v16 }
 0x59c   : > { %v719_v17 = vpop.permute.xlu0 %718 }
 0x59d   : > { %v739_v23 = vsel %vm213_vm1, %v1062_v46, %v719_v17 }
 0x5a2   : > { %v725_v18 = vpop.permute.xlu1 %724 }
 0x5a3   : > { %v741_v21 = vsel %vm740_vm5, %v738_v20, %v725_v18 }
 0x5a4   : > { %v727_v19 = vpop.permute.xlu0 %726 }
 0x5a5   : > { %v742_v25 = vsel %vm740_vm5, %v739_v23, %v727_v19 }
 0x5d2   : > { %v733_v22 = vpop.permute.xlu1 %732 }
 0x5d3   : > { %v744_v24 = vsel %vm743_vm6, %v741_v21, %v733_v22 }
 0x5d4   : > { %746 = vst [vmem:[%s204_s30] sm:$0xff] %v744_v24  ;;  %v735_v27 = vpop.permute.xlu0 %734 }
 0x5d5   : > { %v745_v28 = vsel %vm743_vm6, %v742_v25, %v735_v27 }
 0x5d6   : > { %747 = vst [vmem:[%s204_s30 + $0x8] sm:$0x1] %v745_v28 }
 0x5d7 PF: > { %s13_s12 = sadd.s32 1, %s965_s12  }
 0x5d8   : > { %p10_p4 = scmp.ge.s32.totalorder %s13_s12, 4  }
 0x5da   :  { %12 = sbr.rel (!%p10_p4) target bundleno = 1 (0x1), region = 68 }

// kernel: _lambda_.47
= control target key start
LH: loop header
LB: loop body
LE: loop exit
PB: predicated region body
PF: predicated region fallthrough
CT: control target
= control target key end

     0   :  { %s522_s1 = inlined_call_operand.vmem [shape: bf16[256,128], index: 1, kind: input, shape index: {}]   ;;  %s523_s0 = inlined_call_operand.vmem [shape: f32[24,256], index: 0, kind: input, shape index: {}]   ;;  %s524_s2 = inlined_call_operand.vmem [shape: f32[1,128], index: 2, kind: input, shape index: {}, may-alias: {2,5}]   ;;  %s525_s3 = inlined_call_operand.vmem [shape: f32[24,128], index: 3, kind: input, shape index: {}]   ;;  %s526_s4 = inlined_call_operand.vmem [shape: f32[1,128], index: 4, kind: input, shape index: {}]   ;;  %s527_s5 = inlined_call_operand.vmem [shape: f32[1,128], index: 5, kind: input, shape index: {}, may-alias: {2,5}]   ;;  %s528_s6 = inlined_call_operand.vmem [shape: f32[24,128], index: 6, kind: output, shape index: {}]  }
   0x1   :  { %v372_v0 = vld [vmem:[%s522_s1 + $0x40] sm:$0xff]   ;;  %v374_v2 = vld [vmem:[%s522_s1 + $0x48] sm:$0xff]   ;;  %v376_v4 = vld [vmem:[%s522_s1 + $0x50] sm:$0xff]  }
   0x2   :  { %v373_v1 = vld [vmem:[%s522_s1] sm:$0xff]   ;;  %328 = vmatprep.subr.bf16.mxu0 %v372_v0  ;;  %356 = vmatprep.subr.bf16.mxu1 %v372_v0  ;;  %v375_v3 = vld [vmem:[%s522_s1 + $0x8] sm:$0xff]   ;;  %v377_v5 = vld [vmem:[%s522_s1 + $0x10] sm:$0xff]  }
   0x3   :  { %329 = vmatpush3.bf16.msra.mxu0 %v373_v1  ;;  %364 = vmatpush3.bf16.msra.mxu1 %v373_v1  ;;  %v378_v6 = vld [vmem:[%s522_s1 + $0x58] sm:$0xff]   ;;  %v380_v8 = vld [vmem:[%s522_s1 + $0x60] sm:$0xff]   ;;  %v382_v10 = vld [vmem:[%s522_s1 + $0x68] sm:$0xff]  }
   0x4   :  { %330 = vmatprep.subr.bf16.mxu0 %v374_v2  ;;  %357 = vmatprep.subr.bf16.mxu1 %v374_v2  ;;  %v379_v7 = vld [vmem:[%s522_s1 + $0x18] sm:$0xff]   ;;  %v381_v9 = vld [vmem:[%s522_s1 + $0x20] sm:$0xff]   ;;  %v35_v11 = vld [vmem:[%s523_s0 + $0x8] sm:$0xff] }
   0x5   :  { %v37_v12 = vld [vmem:[%s523_s0 + $0x18] sm:$0xff]  ;;  %v39_v13 = vld [vmem:[%s523_s0 + $0x28] sm:$0xff]  ;;  %v384_v17 = vld [vmem:[%s522_s1 + $0x70] sm:$0xff]  }
   0x6   :  { %v41_v14 = vpack.c.bf16 %v37_v12, %v35_v11  ;;  %v43_v15 = vpack.c.bf16 %v39_v13, %v39_v13  ;;  %v383_v16 = vld [vmem:[%s522_s1 + $0x28] sm:$0xff]   ;;  %v385_v18 = vld [vmem:[%s522_s1 + $0x30] sm:$0xff]   ;;  %v386_v19 = vld [vmem:[%s522_s1 + $0x78] sm:$0xff]  }
   0x7   :  { %331 = vmatpush3.bf16.msra.mxu0 %v375_v3  ;;  %365 = vmatpush3.bf16.msra.mxu1 %v375_v3  ;;  %v387_v20 = vld [vmem:[%s522_s1 + $0x38] sm:$0xff]   ;;  %v34_v21 = vld [vmem:[%s523_s0] sm:$0xff]  ;;  %v36_v22 = vld [vmem:[%s523_s0 + $0x10] sm:$0xff] }
   0x8   :  { %332 = vmatprep.subr.bf16.mxu0 %v376_v4  ;;  %358 = vmatprep.subr.bf16.mxu1 %v376_v4  ;;  %v38_v23 = vld [vmem:[%s523_s0 + $0x20] sm:$0xff]  ;;  %v40_v24 = vpack.c.bf16 %v36_v22, %v34_v21  ;;  %v244_v37 = vld [vmem:[%s525_s3 + $0x10] sm:$0xff]  ;;  %v243_v45 = vld [vmem:[%s525_s3 + $0x8] sm:$0xff] }
   0x9   :  { %204 = vmatprep.mubr.bf16.mxu0 %v41_v14  ;;  %212 = vmatprep.mubr.bf16.mxu1 %v43_v15  ;;  %v42_v25 = vpack.c.bf16 %v38_v23, %v38_v23  ;;  %v325_v29 = vld [vmem:[%s524_s2] ss:$0 sm:$0xff] }
   0xa   :  { %v242_v38 = vld [vmem:[%s525_s3] sm:$0xff] }
   0xb   :  { %333 = vmatpush3.bf16.msra.mxu0 %v377_v5  ;;  %366 = vmatpush3.bf16.msra.mxu1 %v377_v5  ;;  %v326_v5 = vld [vmem:[%s526_s4] ss:$0 sm:$0xff] }
   0xc   :  { %334 = vmatprep.subr.bf16.mxu0 %v378_v6  ;;  %359 = vmatprep.subr.bf16.mxu1 %v378_v6 }
   0xf   :  { %335 = vmatpush3.bf16.msra.mxu0 %v379_v7  ;;  %367 = vmatpush3.bf16.msra.mxu1 %v379_v7  ;;  %v327_v7 = vld [vmem:[%s527_s5] ss:$0 sm:$0xff] }
  0x10   :  { %336 = vmatprep.subr.bf16.mxu0 %v380_v8  ;;  %360 = vmatprep.subr.bf16.mxu1 %v380_v8 }
  0x13   :  { %337 = vmatpush3.bf16.msra.mxu0 %v381_v9  ;;  %368 = vmatpush3.bf16.msra.mxu1 %v381_v9 }
  0x14   :  { %338 = vmatprep.subr.bf16.mxu0 %v382_v10  ;;  %361 = vmatprep.subr.bf16.mxu1 %v382_v10 }
  0x17   :  { %339 = vmatpush3.bf16.msra.mxu0 %v383_v16  ;;  %369 = vmatpush3.bf16.msra.mxu1 %v383_v16 }
  0x18   :  { %340 = vmatprep.subr.bf16.mxu0 %v384_v17  ;;  %362 = vmatprep.subr.bf16.mxu1 %v384_v17 }
  0x1b   :  { %341 = vmatpush3.bf16.msra.mxu0 %v385_v18  ;;  %370 = vmatpush3.bf16.msra.mxu1 %v385_v18 }
  0x1c   :  { %342 = vmatprep.subr.bf16.mxu0 %v386_v19  ;;  %363 = vmatprep.subr.bf16.mxu1 %v386_v19 }
  0x1f   :  { %343 = vmatpush3.bf16.msra.mxu0 %v387_v20  ;;  %371 = vmatpush3.bf16.msra.mxu1 %v387_v20 }
  0x22   :  { %205 = vmatmul.mubr.bf16.vlgmr.msra.gmra.mrb[0].mxu0 %v40_v24  ;;  %213 = vmatmul.mubr.bf16.vlgmr.msra.gmra.mrb[0].mxu1 %v42_v25 }
  0xf5   :  { %v344_v26 = vpop.f32.mrb[0].mxu0  ;;  %v350_v27 = vpop.f32.mrb[0].mxu1 }
  0xf6   :  { %v345_v28 = vpop.f32.mrb[1].mxu0  ;;  %v351_v30 = vpop.f32.mrb[1].mxu1 }
  0xf7   :  { %v346_v31 = vadd.f32 %v345_v28, %v344_v26  ;;  %v352_v32 = vadd.f32 %v351_v30, %v350_v27  ;;  %v347_v33 = vpop.f32.mrb[2].mxu0  ;;  %v353_v34 = vpop.f32.mrb[2].mxu1 }
  0xf8   :  { %v348_v35 = vpop.f32.mrb[3].mxu0  ;;  %v354_v36 = vpop.f32.mrb[3].mxu1 }
  0xf9   :  { %v239_v39 = vadd.f32 %v346_v31, %v325_v29  ;;  %v241_v40 = vadd.f32 %v352_v32, %v325_v29  ;;  %v349_v41 = vadd.f32 %v348_v35, %v347_v33 }
  0xfb   :  { %v240_v42 = vadd.f32 %v349_v41, %v325_v29  ;;  %v247_v43 = vadd.f32 %v244_v37, %v241_v40  ;;  %v245_v44 = vadd.f32 %v242_v38, %v239_v39 }
  0xfd   :  { %252 = vadd.xlane.f32.xlu1 %v247_v43  ;;  %248 = vadd.xlane.f32.xlu0 %v245_v44  ;;  %v246_v46 = vadd.f32 %v243_v45, %v240_v42 }
 0x101   :  { %250 = vadd.xlane.f32.xlu0 %v246_v46 }
 0x18a   :  { %v253_v47 = vpop.xlane.xlu1 %252  ;;  %v249_v48 = vpop.xlane.xlu0 %248 }
 0x18b   :  { %v257_v49 = vmul.f32 0.0078125, %v253_v47  ;;  %v255_v50 = vmul.f32 0.0078125, %v249_v48 }
 0x18d   :  { %v258_v51 = vsub.f32 %v245_v44, %v255_v50  ;;  %v260_v53 = vsub.f32 %v247_v43, %v257_v49 }
 0x18e   :  { %v251_v52 = vpop.xlane.xlu0 %250 }
 0x18f   :  { %v256_v54 = vmul.f32 0.0078125, %v251_v52  ;;  %v261_v55 = vmul.f32 %v258_v51, %v258_v51  ;;  %v263_v57 = vmul.f32 %v260_v53, %v260_v53 }
 0x191   :  { %v259_v56 = vsub.f32 %v246_v46, %v256_v54  ;;  %264 = vadd.xlane.f32.xlu1 %v261_v55 }
 0x193   :  { %v262_v58 = vmul.f32 %v259_v56, %v259_v56 }
 0x195   :  { %268 = vadd.xlane.f32.xlu1 %v263_v57  ;;  %266 = vadd.xlane.f32.xlu0 %v262_v58 }
 0x21e   :  { %v265_v59 = vpop.xlane.xlu1 %264 }
 0x21f   :  { %v270_v60 = vmul.f32 0.0078125, %v265_v59 }
 0x221   :  { %v273_v61 = vadd.f32 1e-05, %v270_v60 }
 0x222   :  { %v269_v62 = vpop.xlane.xlu1 %268  ;;  %v267_v63 = vpop.xlane.xlu0 %266 }
 0x223   :  { %388 = vrsqrt.f32 %v273_v61  ;;  %v272_v0 = vmul.f32 0.0078125, %v269_v62  ;;  %v271_v1 = vmul.f32 0.0078125, %v267_v63 }
 0x225   :  { %v275_v2 = vadd.f32 1e-05, %v272_v0  ;;  %v274_v3 = vadd.f32 1e-05, %v271_v1 }
 0x227   :  { %390 = vrsqrt.f32 %v275_v2 }
 0x228   :  { %392 = vrsqrt.f32 %v274_v3 }
 0x22d   :  { %v389_v4 = vpop.eup %388 }
 0x22e   :  { %v279_v6 = vmul.f32 %v389_v4, %v258_v51 }
 0x230   :  { %v289_v8 = vmul.f32 %v326_v5, %v279_v6 }
 0x231   :  { %v391_v9 = vpop.eup %390 }
 0x232   :  { %v393_v10 = vpop.eup %392  ;;  %v299_v11 = vadd.f32 %v327_v7, %v289_v8  ;;  %v281_v12 = vmul.f32 %v391_v9, %v260_v53 }
 0x233   :  { %v280_v13 = vmul.f32 %v393_v10, %v259_v56 }
 0x234   :  { %302 = vst [vmem:[%s528_s6] sm:$0xff] %v299_v11  ;;  %v291_v14 = vmul.f32 %v326_v5, %v281_v12 }
 0x235   :  { %v290_v15 = vmul.f32 %v326_v5, %v280_v13 }
 0x236   :  { %v301_v16 = vadd.f32 %v327_v7, %v291_v14 }
 0x237   :  { %v300_v17 = vadd.f32 %v327_v7, %v290_v15 }
 0x238   :  { %304 = vst [vmem:[%s528_s6 + $0x10] sm:$0xff] %v301_v16 }
 0x239   :  { %303 = vst [vmem:[%s528_s6 + $0x8] sm:$0xff] %v300_v17 }

</bundles_post_ra>
